<compile_context>
chip_gen: v7x
topology: tpu7x:2x2x1
jax: 0.10.0
libtpu: 0.0.40
codegen_flags: <defaults>
</compile_context>

<pallas_src>
import jax
import jax.numpy as jnp
from jax.experimental import pallas as pl
from jax.experimental.pallas import tpu as pltpu

ACTION_DIM = 3
HEAD_PAD = 128          # lane-dense padded width for the FC2 heads (3 / 1 -> 128)
FC_HIDDEN = 512
FC_IN = 64 * 7 * 7      # 3136


# ----------------------------------------------------------------------------
# Pallas kernels
# ----------------------------------------------------------------------------
def _conv_gemm_kernel(x_ref, w_ref, b_ref, o_ref):
    """relu(x @ w + b) for one (branch, M-tile) grid point.

    x_ref: (TM, K) bf16   w_ref: (K, N) bf16 (resident across M tiles)
    b_ref: (1, N) f32     o_ref: (TM, N) bf16       fp32 MXU accumulation.
    """
    acc = jnp.dot(x_ref[...], w_ref[...], preferred_element_type=jnp.float32)
    acc = acc + b_ref[...]
    o_ref[...] = jnp.maximum(acc, 0.0).astype(o_ref.dtype)


def _fc_head_kernel(x_ref, w1_ref, b1_ref, w2_ref, b2_ref, mask_ref, o_ref):
    """Fused FC1 + ReLU + FC2 (+ masked softmax on the actor branch).

    Grid axis 0 = branch (0: actor -> softmax over first ACTION_DIM lanes,
    1: critic -> raw logits). h1 never touches HBM.
    """
    g = pl.program_id(0)
    h = jnp.dot(x_ref[...], w1_ref[...], preferred_element_type=jnp.float32)
    h = jnp.maximum(h + b1_ref[...], 0.0)
    logits = jnp.dot(h.astype(w2_ref.dtype), w2_ref[...],
                     preferred_element_type=jnp.float32) + b2_ref[...]
    # softmax restricted to valid (un-padded) lanes
    masked = logits + mask_ref[...]
    m = jnp.max(masked, axis=-1, keepdims=True)
    e = jnp.exp(masked - m)
    probs = e / jnp.sum(e, axis=-1, keepdims=True)
    o_ref[...] = jnp.where(g == 0, probs, logits).astype(o_ref.dtype)


# ----------------------------------------------------------------------------
# Kernel wrappers
# ----------------------------------------------------------------------------
def _pick_tile_m(m, cap=512):
    """Largest M tile <= cap that divides M and is a multiple of 8 (else full M)."""
    if m <= cap:
        return m
    for t in range(cap, 7, -8):
        if m % t == 0:
            return t
    return m


def conv_gemm_bias_relu(patches, w, b):
    """patches: [G, M, K] bf16, w: [G, K, N] bf16, b: [G, 1, N] f32 -> [G, M, N] bf16."""
    G, M, K = patches.shape
    N = w.shape[-1]
    TM = _pick_tile_m(M)
    nm = M // TM
    flops = 2 * G * M * K * N
    bytes_acc = patches.size * 2 + w.size * 2 + b.size * 4 + G * M * N * 2
    return pl.pallas_call(
        _conv_gemm_kernel,
        out_shape=jax.ShapeDtypeStruct((G, M, N), jnp.bfloat16),
        grid=(G, nm),
        in_specs=[
            pl.BlockSpec((None, TM, K), lambda g, m_: (g, m_, 0)),
            pl.BlockSpec((None, K, N), lambda g, m_: (g, 0, 0)),
            pl.BlockSpec((None, 1, N), lambda g, m_: (g, 0, 0)),
        ],
        out_specs=pl.BlockSpec((None, TM, N), lambda g, m_: (g, m_, 0)),
        compiler_params=pltpu.CompilerParams(
            dimension_semantics=("parallel", "parallel")),
        cost_estimate=pl.CostEstimate(
            flops=flops, transcendentals=0, bytes_accessed=bytes_acc),
    )(patches, w, b)


def fc_head(flat, w1, b1, w2, b2, mask):
    """flat: [2, B, FC_IN] bf16 -> [2, B, HEAD_PAD] f32 (actor softmax / critic value)."""
    G, B, F = flat.shape
    H = w1.shape[-1]
    NP = w2.shape[-1]
    flops = 2 * G * B * (F * H + H * NP)
    bytes_acc = (flat.size * 2 + w1.size * 2 + w2.size * 2
                 + b1.size * 4 + b2.size * 4 + mask.size * 4 + G * B * NP * 4)
    return pl.pallas_call(
        _fc_head_kernel,
        out_shape=jax.ShapeDtypeStruct((G, B, NP), jnp.float32),
        grid=(G,),
        in_specs=[
            pl.BlockSpec((None, B, F), lambda g: (g, 0, 0)),
            pl.BlockSpec((None, F, H), lambda g: (g, 0, 0)),
            pl.BlockSpec((None, 1, H), lambda g: (g, 0, 0)),
            pl.BlockSpec((None, H, NP), lambda g: (g, 0, 0)),
            pl.BlockSpec((None, 1, NP), lambda g: (g, 0, 0)),
            pl.BlockSpec((1, NP), lambda g: (0, 0)),
        ],
        out_specs=pl.BlockSpec((None, B, NP), lambda g: (g, 0, 0)),
        compiler_params=pltpu.CompilerParams(
            dimension_semantics=("parallel",)),
        cost_estimate=pl.CostEstimate(
            flops=flops, transcendentals=G * B * NP, bytes_accessed=bytes_acc),
    )(flat, w1, b1, w2, b2, mask)


# ----------------------------------------------------------------------------
# im2col glue (plain JAX; patch order = (kh, kw, Cin) to match weight prep)
# ----------------------------------------------------------------------------
def _im2col(x_nhwc, k, s):
    B, H, W, C = x_nhwc.shape
    Ho = (H - k) // s + 1
    Wo = (W - k) // s + 1
    cols = []
    for di in range(k):
        for dj in range(k):
            cols.append(x_nhwc[:, di:di + s * Ho:s, dj:dj + s * Wo:s, :])
    p = jnp.stack(cols, axis=3)                          # [B, Ho, Wo, k*k, C]
    return p.reshape(B * Ho * Wo, k * k * C), (B, Ho, Wo)


# ----------------------------------------------------------------------------
# Parameters: PyTorch-layout init + one-time conversion to kernel layout
# ----------------------------------------------------------------------------
def init_params(key):
    def tensor(k, shape):
        fan_in = 1
        for d in shape[1:]:
            fan_in *= d
        return (jax.random.normal(k, shape, dtype=jnp.float32)
                / jnp.sqrt(jnp.float32(max(fan_in, 1))))

    def branch(k, out_dim):
        ks = jax.random.split(k, 10)
        return {
            "c1_w": tensor(ks[0], (32, 4, 8, 8)),   "c1_b": tensor(ks[1], (32, 1))[:, 0],
            "c2_w": tensor(ks[2], (64, 32, 4, 4)),  "c2_b": tensor(ks[3], (64, 1))[:, 0],
            "c3_w": tensor(ks[4], (64, 64, 3, 3)),  "c3_b": tensor(ks[5], (64, 1))[:, 0],
            "f1_w": tensor(ks[6], (FC_HIDDEN, FC_IN)), "f1_b": tensor(ks[7], (FC_HIDDEN, 1))[:, 0],
            "f2_w": tensor(ks[8], (out_dim, FC_HIDDEN)), "f2_b": tensor(ks[9], (out_dim, 1))[:, 0],
        }

    ka, kc = jax.random.split(key)
    return {"actor": branch(ka, ACTION_DIM), "critic": branch(kc, 1)}


def _conv_w_mat(w_oihw):
    """OIHW conv weight -> [kh*kw*Cin, Cout] matching the im2col (kh,kw,Cin) order."""
    cout, cin, k, _ = w_oihw.shape
    return jnp.transpose(w_oihw, (2, 3, 1, 0)).reshape(k * k * cin, cout)


def _fc1_w_mat(w):
    """torch fc1 weight [512, 3136] (NCHW flatten) -> [3136, 512] in NHWC-flatten order."""
    return jnp.transpose(w.reshape(FC_HIDDEN, 64, 7, 7), (0, 2, 3, 1)).reshape(FC_HIDDEN, -1).T


def prepare_kernel_params(params):
    """One-time weight prep: no transposes / reshapes remain in the hot path."""
    a, c = params["actor"], params["critic"]
    bf16 = jnp.bfloat16
    prep = {}
    # conv1: both branches read the same input -> concat Cout 32+32 = 64
    prep["c1_w"] = jnp.concatenate(
        [_conv_w_mat(a["c1_w"]), _conv_w_mat(c["c1_w"])], axis=1)[None].astype(bf16)
    prep["c1_b"] = jnp.concatenate([a["c1_b"], c["c1_b"]])[None, None, :].astype(jnp.float32)
    # conv2 / conv3: branch-stacked
    prep["c2_w"] = jnp.stack([_conv_w_mat(a["c2_w"]), _conv_w_mat(c["c2_w"])]).astype(bf16)
    prep["c2_b"] = jnp.stack([a["c2_b"], c["c2_b"]])[:, None, :].astype(jnp.float32)
    prep["c3_w"] = jnp.stack([_conv_w_mat(a["c3_w"]), _conv_w_mat(c["c3_w"])]).astype(bf16)
    prep["c3_b"] = jnp.stack([a["c3_b"], c["c3_b"]])[:, None, :].astype(jnp.float32)
    # fc1: rows pre-permuted so NHWC flatten == torch's NCHW .view(B,-1)
    prep["f1_w"] = jnp.stack([_fc1_w_mat(a["f1_w"]), _fc1_w_mat(c["f1_w"])]).astype(bf16)
    prep["f1_b"] = jnp.stack([a["f1_b"], c["f1_b"]])[:, None, :].astype(jnp.float32)

    # fc2: pad heads to HEAD_PAD lanes (lane-dense); padded actor lanes masked pre-softmax
    def pad_head(w, b):
        n = w.shape[0]
        wp = jnp.zeros((FC_HIDDEN, HEAD_PAD), jnp.float32).at[:, :n].set(w.T)
        bp = jnp.zeros((HEAD_PAD,), jnp.float32).at[:n].set(b)
        return wp, bp

    aw, ab = pad_head(a["f2_w"], a["f2_b"])
    cw, cb = pad_head(c["f2_w"], c["f2_b"])
    prep["f2_w"] = jnp.stack([aw, cw]).astype(bf16)
    prep["f2_b"] = jnp.stack([ab, cb])[:, None, :].astype(jnp.float32)
    lane = jnp.arange(HEAD_PAD)
    prep["head_mask"] = jnp.where(lane < ACTION_DIM, 0.0, -1e30)[None, :].astype(jnp.float32)
    return prep


# ----------------------------------------------------------------------------
# Forward
# ----------------------------------------------------------------------------
@jax.jit
def conv_actor_critic_forward(prep, x_nchw):
    B = x_nchw.shape[0]
    x = jnp.transpose(x_nchw, (0, 2, 3, 1)).astype(jnp.bfloat16)        # NHWC

    # conv1 (actor + critic fused along Cout)
    p1, (_, H1, W1) = _im2col(x, 8, 4)                                  # [B*400, 256]
    h1 = conv_gemm_bias_relu(p1[None], prep["c1_w"], prep["c1_b"])      # [1, B*400, 64]
    h1 = h1.reshape(B, H1, W1, 64)

    # conv2 (branch grid axis: channels 0:32 = actor, 32:64 = critic)
    p2a, (_, H2, W2) = _im2col(h1[..., :32], 4, 2)
    p2c, _ = _im2col(h1[..., 32:], 4, 2)
    p2 = jnp.stack([p2a, p2c], axis=0)                                  # [2, B*81, 512]
    h2 = conv_gemm_bias_relu(p2, prep["c2_w"], prep["c2_b"])            # [2, B*81, 64]
    h2 = h2.reshape(2, B, H2, W2, 64)

    # conv3
    p3a, (_, H3, W3) = _im2col(h2[0], 3, 1)
    p3c, _ = _im2col(h2[1], 3, 1)
    p3 = jnp.stack([p3a, p3c], axis=0)                                  # [2, B*49, 576]
    h3 = conv_gemm_bias_relu(p3, prep["c3_w"], prep["c3_b"])            # [2, B*49, 64]

    # NHWC flatten (fc1 weights were pre-permuted to match torch's NCHW flatten)
    flat = h3.reshape(2, B, H3 * W3 * 64)                               # [2, B, 3136]

    # fused FC1 + ReLU + FC2 (+ actor softmax), both branches in one kernel
    out = fc_head(flat, prep["f1_w"], prep["f1_b"],
                  prep["f2_w"], prep["f2_b"], prep["head_mask"])        # [2, B, 128]
    actor_out = out[0, :, :ACTION_DIM]
    critic_out = out[1, :, :1]
    return actor_out, critic_out


# ----------------------------------------------------------------------------
if __name__ == "__main__":
    key = jax.random.PRNGKey(0)
    params = init_params(key)
    prep = prepare_kernel_params(params)          # one-time weight layout prep

    # Input must be 84x84 so the flatten is 64*7*7, as the module requires.
    x = jax.random.normal(jax.random.fold_in(key, 123), (2, 4, 84, 84),
                          dtype=jnp.float32)

    actor_out, critic_out = conv_actor_critic_forward(prep, x)
    jax.block_until_ready((actor_out, critic_out))

    assert actor_out.shape == (2, ACTION_DIM), actor_out.shape
    assert critic_out.shape == (2, 1), critic_out.shape
    assert bool(jnp.all(jnp.isfinite(actor_out))) and bool(jnp.all(jnp.isfinite(critic_out)))
    assert bool(jnp.allclose(jnp.sum(actor_out, axis=-1), 1.0, atol=1e-5))

    print("KERNEL_OK")
</pallas_src>

<mosaic_0001>
module attributes {stable_mosaic.version = 11 : i64} {
  func.func @_conv_gemm_kernel(%arg0: i32, %arg1: i32, %arg2: memref<1x400x256xbf16, #tpu.memory_space<vmem>>, %arg3: memref<1x256x64xbf16, #tpu.memory_space<vmem>>, %arg4: memref<1x1x64xf32, #tpu.memory_space<vmem>>, %arg5: memref<1x400x64xbf16, #tpu.memory_space<vmem>>) attributes {dimension_semantics = [#tpu.dimension_semantics<parallel>, #tpu.dimension_semantics<parallel>], iteration_bounds = array<i64: 1, 2>, scalar_prefetch = 0 : i64, scratch_operands = 0 : i64, tpu.core_type = #tpu.core_type<tc>, window_params = [{transform_indices = @transform_0, window_bounds = array<i64: 1, 400, 256>}, {transform_indices = @transform_1, window_bounds = array<i64: 1, 256, 64>}, {transform_indices = @transform_2, window_bounds = array<i64: 1, 1, 64>}, {transform_indices = @transform_3, window_bounds = array<i64: 1, 400, 64>}]} {
    %c0 = arith.constant 0 : index
    %c0_0 = arith.constant 0 : index
    %c0_1 = arith.constant 0 : index
    %0 = vector.load %arg2[%c0, %c0_0, %c0_1] : memref<1x400x256xbf16, #tpu.memory_space<vmem>>, vector<1x400x256xbf16>
    %1 = vector.shape_cast %0 : vector<1x400x256xbf16> to vector<400x256xbf16>
    %c0_2 = arith.constant 0 : index
    %c0_3 = arith.constant 0 : index
    %c0_4 = arith.constant 0 : index
    %2 = vector.load %arg3[%c0_2, %c0_3, %c0_4] : memref<1x256x64xbf16, #tpu.memory_space<vmem>>, vector<1x256x64xbf16>
    %3 = vector.shape_cast %2 : vector<1x256x64xbf16> to vector<256x64xbf16>
    %cst = arith.constant dense<0.000000e+00> : vector<400x64xf32>
    %4 = tpu.matmul %1, %3, %cst {dimension_numbers = #tpu.dot_dimension_numbers<[1], [0], [0], [1], [0, 0, 1, 1], [], []>} : vector<400x256xbf16>, vector<256x64xbf16>, vector<400x64xf32> -> vector<400x64xf32>
    %c0_5 = arith.constant 0 : index
    %c0_6 = arith.constant 0 : index
    %c0_7 = arith.constant 0 : index
    %5 = vector.load %arg4[%c0_5, %c0_6, %c0_7] : memref<1x1x64xf32, #tpu.memory_space<vmem>>, vector<1x1x64xf32>
    %6 = vector.shape_cast %5 : vector<1x1x64xf32> to vector<1x64xf32>
    %7 = vector.broadcast %6 : vector<1x64xf32> to vector<400x64xf32>
    %8 = arith.addf %4, %7 : vector<400x64xf32>
    %cst_8 = arith.constant 0.000000e+00 : f32
    %9 = vector.broadcast %cst_8 : f32 to vector<400x64xf32>
    %10 = arith.maximumf %8, %9 : vector<400x64xf32>
    %11 = arith.truncf %10 : vector<400x64xf32> to vector<400x64xbf16>
    %c0_9 = arith.constant 0 : index
    %c0_10 = arith.constant 0 : index
    %c0_11 = arith.constant 0 : index
    %12 = vector.load %arg5[%c0_9, %c0_10, %c0_11] : memref<1x400x64xbf16, #tpu.memory_space<vmem>>, vector<1x400x64xbf16>
    %13 = vector.shape_cast %12 : vector<1x400x64xbf16> to vector<400x64xbf16>
    %14 = vector.shape_cast %11 : vector<400x64xbf16> to vector<1x400x64xbf16>
    tpu.vector_store %arg5[%c0_9, %c0_10, %c0_11], %14 {strides = array<i32>} : memref<1x400x64xbf16, #tpu.memory_space<vmem>>, vector<1x400x64xbf16>,
    return
  }
  func.func @transform_0(%arg0: i32, %arg1: i32) -> (i32, i32, i32) {
    %c0_i32 = arith.constant 0 : i32
    %c0_i32_0 = arith.constant 0 : i32
    return %arg0, %arg1, %c0_i32 : i32, i32, i32
  }
  func.func @transform_1(%arg0: i32, %arg1: i32) -> (i32, i32, i32) {
    %c0_i32 = arith.constant 0 : i32
    %c0_i32_0 = arith.constant 0 : i32
    %c0_i32_1 = arith.constant 0 : i32
    return %arg0, %c0_i32, %c0_i32_0 : i32, i32, i32
  }
  func.func @transform_2(%arg0: i32, %arg1: i32) -> (i32, i32, i32) {
    %c0_i32 = arith.constant 0 : i32
    %c0_i32_0 = arith.constant 0 : i32
    %c0_i32_1 = arith.constant 0 : i32
    return %arg0, %c0_i32, %c0_i32_0 : i32, i32, i32
  }
  func.func @transform_3(%arg0: i32, %arg1: i32) -> (i32, i32, i32) {
    %c0_i32 = arith.constant 0 : i32
    %c0_i32_0 = arith.constant 0 : i32
    return %arg0, %arg1, %c0_i32 : i32, i32, i32
  }
}

module attributes {stable_mosaic.version = 11 : i64} {
  func.func @_conv_gemm_kernel(%arg0: i32, %arg1: i32, %arg2: memref<1x162x512xbf16, #tpu.memory_space<vmem>>, %arg3: memref<1x512x64xbf16, #tpu.memory_space<vmem>>, %arg4: memref<1x1x64xf32, #tpu.memory_space<vmem>>, %arg5: memref<1x162x64xbf16, #tpu.memory_space<vmem>>) attributes {dimension_semantics = [#tpu.dimension_semantics<parallel>, #tpu.dimension_semantics<parallel>], iteration_bounds = array<i64: 2, 1>, scalar_prefetch = 0 : i64, scratch_operands = 0 : i64, tpu.core_type = #tpu.core_type<tc>, window_params = [{transform_indices = @transform_0, window_bounds = array<i64: 1, 162, 512>}, {transform_indices = @transform_1, window_bounds = array<i64: 1, 512, 64>}, {transform_indices = @transform_2, window_bounds = array<i64: 1, 1, 64>}, {transform_indices = @transform_3, window_bounds = array<i64: 1, 162, 64>}]} {
    %c0 = arith.constant 0 : index
    %c0_0 = arith.constant 0 : index
    %c0_1 = arith.constant 0 : index
    %0 = vector.load %arg2[%c0, %c0_0, %c0_1] : memref<1x162x512xbf16, #tpu.memory_space<vmem>>, vector<1x162x512xbf16>
    %1 = vector.shape_cast %0 : vector<1x162x512xbf16> to vector<162x512xbf16>
    %c0_2 = arith.constant 0 : index
    %c0_3 = arith.constant 0 : index
    %c0_4 = arith.constant 0 : index
    %2 = vector.load %arg3[%c0_2, %c0_3, %c0_4] : memref<1x512x64xbf16, #tpu.memory_space<vmem>>, vector<1x512x64xbf16>
    %3 = vector.shape_cast %2 : vector<1x512x64xbf16> to vector<512x64xbf16>
    %cst = arith.constant dense<0.000000e+00> : vector<162x64xf32>
    %4 = tpu.matmul %1, %3, %cst {dimension_numbers = #tpu.dot_dimension_numbers<[1], [0], [0], [1], [0, 0, 1, 1], [], []>} : vector<162x512xbf16>, vector<512x64xbf16>, vector<162x64xf32> -> vector<162x64xf32>
    %c0_5 = arith.constant 0 : index
    %c0_6 = arith.constant 0 : index
    %c0_7 = arith.constant 0 : index
    %5 = vector.load %arg4[%c0_5, %c0_6, %c0_7] : memref<1x1x64xf32, #tpu.memory_space<vmem>>, vector<1x1x64xf32>
    %6 = vector.shape_cast %5 : vector<1x1x64xf32> to vector<1x64xf32>
    %7 = vector.broadcast %6 : vector<1x64xf32> to vector<162x64xf32>
    %8 = arith.addf %4, %7 : vector<162x64xf32>
    %cst_8 = arith.constant 0.000000e+00 : f32
    %9 = vector.broadcast %cst_8 : f32 to vector<162x64xf32>
    %10 = arith.maximumf %8, %9 : vector<162x64xf32>
    %11 = arith.truncf %10 : vector<162x64xf32> to vector<162x64xbf16>
    %c0_9 = arith.constant 0 : index
    %c0_10 = arith.constant 0 : index
    %c0_11 = arith.constant 0 : index
    %12 = vector.load %arg5[%c0_9, %c0_10, %c0_11] : memref<1x162x64xbf16, #tpu.memory_space<vmem>>, vector<1x162x64xbf16>
    %13 = vector.shape_cast %12 : vector<1x162x64xbf16> to vector<162x64xbf16>
    %14 = vector.shape_cast %11 : vector<162x64xbf16> to vector<1x162x64xbf16>
    tpu.vector_store %arg5[%c0_9, %c0_10, %c0_11], %14 {strides = array<i32>} : memref<1x162x64xbf16, #tpu.memory_space<vmem>>, vector<1x162x64xbf16>,
    return
  }
  func.func @transform_0(%arg0: i32, %arg1: i32) -> (i32, i32, i32) {
    %c0_i32 = arith.constant 0 : i32
    %c0_i32_0 = arith.constant 0 : i32
    return %arg0, %arg1, %c0_i32 : i32, i32, i32
  }
  func.func @transform_1(%arg0: i32, %arg1: i32) -> (i32, i32, i32) {
    %c0_i32 = arith.constant 0 : i32
    %c0_i32_0 = arith.constant 0 : i32
    %c0_i32_1 = arith.constant 0 : i32
    return %arg0, %c0_i32, %c0_i32_0 : i32, i32, i32
  }
  func.func @transform_2(%arg0: i32, %arg1: i32) -> (i32, i32, i32) {
    %c0_i32 = arith.constant 0 : i32
    %c0_i32_0 = arith.constant 0 : i32
    %c0_i32_1 = arith.constant 0 : i32
    return %arg0, %c0_i32, %c0_i32_0 : i32, i32, i32
  }
  func.func @transform_3(%arg0: i32, %arg1: i32) -> (i32, i32, i32) {
    %c0_i32 = arith.constant 0 : i32
    %c0_i32_0 = arith.constant 0 : i32
    return %arg0, %arg1, %c0_i32 : i32, i32, i32
  }
}

module attributes {stable_mosaic.version = 11 : i64} {
  func.func @_conv_gemm_kernel(%arg0: i32, %arg1: i32, %arg2: memref<1x98x576xbf16, #tpu.memory_space<vmem>>, %arg3: memref<1x576x64xbf16, #tpu.memory_space<vmem>>, %arg4: memref<1x1x64xf32, #tpu.memory_space<vmem>>, %arg5: memref<1x98x64xbf16, #tpu.memory_space<vmem>>) attributes {dimension_semantics = [#tpu.dimension_semantics<parallel>, #tpu.dimension_semantics<parallel>], iteration_bounds = array<i64: 2, 1>, scalar_prefetch = 0 : i64, scratch_operands = 0 : i64, tpu.core_type = #tpu.core_type<tc>, window_params = [{transform_indices = @transform_0, window_bounds = array<i64: 1, 98, 576>}, {transform_indices = @transform_1, window_bounds = array<i64: 1, 576, 64>}, {transform_indices = @transform_2, window_bounds = array<i64: 1, 1, 64>}, {transform_indices = @transform_3, window_bounds = array<i64: 1, 98, 64>}]} {
    %c0 = arith.constant 0 : index
    %c0_0 = arith.constant 0 : index
    %c0_1 = arith.constant 0 : index
    %0 = vector.load %arg2[%c0, %c0_0, %c0_1] : memref<1x98x576xbf16, #tpu.memory_space<vmem>>, vector<1x98x576xbf16>
    %1 = vector.shape_cast %0 : vector<1x98x576xbf16> to vector<98x576xbf16>
    %c0_2 = arith.constant 0 : index
    %c0_3 = arith.constant 0 : index
    %c0_4 = arith.constant 0 : index
    %2 = vector.load %arg3[%c0_2, %c0_3, %c0_4] : memref<1x576x64xbf16, #tpu.memory_space<vmem>>, vector<1x576x64xbf16>
    %3 = vector.shape_cast %2 : vector<1x576x64xbf16> to vector<576x64xbf16>
    %cst = arith.constant dense<0.000000e+00> : vector<98x64xf32>
    %4 = tpu.matmul %1, %3, %cst {dimension_numbers = #tpu.dot_dimension_numbers<[1], [0], [0], [1], [0, 0, 1, 1], [], []>} : vector<98x576xbf16>, vector<576x64xbf16>, vector<98x64xf32> -> vector<98x64xf32>
    %c0_5 = arith.constant 0 : index
    %c0_6 = arith.constant 0 : index
    %c0_7 = arith.constant 0 : index
    %5 = vector.load %arg4[%c0_5, %c0_6, %c0_7] : memref<1x1x64xf32, #tpu.memory_space<vmem>>, vector<1x1x64xf32>
    %6 = vector.shape_cast %5 : vector<1x1x64xf32> to vector<1x64xf32>
    %7 = vector.broadcast %6 : vector<1x64xf32> to vector<98x64xf32>
    %8 = arith.addf %4, %7 : vector<98x64xf32>
    %cst_8 = arith.constant 0.000000e+00 : f32
    %9 = vector.broadcast %cst_8 : f32 to vector<98x64xf32>
    %10 = arith.maximumf %8, %9 : vector<98x64xf32>
    %11 = arith.truncf %10 : vector<98x64xf32> to vector<98x64xbf16>
    %c0_9 = arith.constant 0 : index
    %c0_10 = arith.constant 0 : index
    %c0_11 = arith.constant 0 : index
    %12 = vector.load %arg5[%c0_9, %c0_10, %c0_11] : memref<1x98x64xbf16, #tpu.memory_space<vmem>>, vector<1x98x64xbf16>
    %13 = vector.shape_cast %12 : vector<1x98x64xbf16> to vector<98x64xbf16>
    %14 = vector.shape_cast %11 : vector<98x64xbf16> to vector<1x98x64xbf16>
    tpu.vector_store %arg5[%c0_9, %c0_10, %c0_11], %14 {strides = array<i32>} : memref<1x98x64xbf16, #tpu.memory_space<vmem>>, vector<1x98x64xbf16>,
    return
  }
  func.func @transform_0(%arg0: i32, %arg1: i32) -> (i32, i32, i32) {
    %c0_i32 = arith.constant 0 : i32
    %c0_i32_0 = arith.constant 0 : i32
    return %arg0, %arg1, %c0_i32 : i32, i32, i32
  }
  func.func @transform_1(%arg0: i32, %arg1: i32) -> (i32, i32, i32) {
    %c0_i32 = arith.constant 0 : i32
    %c0_i32_0 = arith.constant 0 : i32
    %c0_i32_1 = arith.constant 0 : i32
    return %arg0, %c0_i32, %c0_i32_0 : i32, i32, i32
  }
  func.func @transform_2(%arg0: i32, %arg1: i32) -> (i32, i32, i32) {
    %c0_i32 = arith.constant 0 : i32
    %c0_i32_0 = arith.constant 0 : i32
    %c0_i32_1 = arith.constant 0 : i32
    return %arg0, %c0_i32, %c0_i32_0 : i32, i32, i32
  }
  func.func @transform_3(%arg0: i32, %arg1: i32) -> (i32, i32, i32) {
    %c0_i32 = arith.constant 0 : i32
    %c0_i32_0 = arith.constant 0 : i32
    return %arg0, %arg1, %c0_i32 : i32, i32, i32
  }
}

module attributes {stable_mosaic.version = 11 : i64} {
  func.func @_fc_head_kernel(%arg0: i32, %arg1: memref<1x2x3136xbf16, #tpu.memory_space<vmem>>, %arg2: memref<1x3136x512xbf16, #tpu.memory_space<vmem>>, %arg3: memref<1x1x512xf32, #tpu.memory_space<vmem>>, %arg4: memref<1x512x128xbf16, #tpu.memory_space<vmem>>, %arg5: memref<1x1x128xf32, #tpu.memory_space<vmem>>, %arg6: memref<1x128xf32, #tpu.memory_space<vmem>>, %arg7: memref<1x2x128xf32, #tpu.memory_space<vmem>>) attributes {dimension_semantics = [#tpu.dimension_semantics<parallel>], iteration_bounds = array<i64: 2>, scalar_prefetch = 0 : i64, scratch_operands = 0 : i64, tpu.core_type = #tpu.core_type<tc>, window_params = [{transform_indices = @transform_0, window_bounds = array<i64: 1, 2, 3136>}, {transform_indices = @transform_1, window_bounds = array<i64: 1, 3136, 512>}, {transform_indices = @transform_2, window_bounds = array<i64: 1, 1, 512>}, {transform_indices = @transform_3, window_bounds = array<i64: 1, 512, 128>}, {transform_indices = @transform_4, window_bounds = array<i64: 1, 1, 128>}, {pipeline_mode = #tpu.pipeline_mode<synchronous>, transform_indices = @transform_5, window_bounds = array<i64: 1, 128>}, {transform_indices = @transform_6, window_bounds = array<i64: 1, 2, 128>}]} {
    %c0 = arith.constant 0 : index
    %c0_0 = arith.constant 0 : index
    %c0_1 = arith.constant 0 : index
    %0 = vector.load %arg1[%c0, %c0_0, %c0_1] : memref<1x2x3136xbf16, #tpu.memory_space<vmem>>, vector<1x2x3136xbf16>
    %1 = vector.shape_cast %0 : vector<1x2x3136xbf16> to vector<2x3136xbf16>
    %c0_2 = arith.constant 0 : index
    %c0_3 = arith.constant 0 : index
    %c0_4 = arith.constant 0 : index
    %2 = vector.load %arg2[%c0_2, %c0_3, %c0_4] : memref<1x3136x512xbf16, #tpu.memory_space<vmem>>, vector<1x3136x512xbf16>
    %3 = vector.shape_cast %2 : vector<1x3136x512xbf16> to vector<3136x512xbf16>
    %cst = arith.constant dense<0.000000e+00> : vector<2x512xf32>
    %4 = tpu.matmul %1, %3, %cst {dimension_numbers = #tpu.dot_dimension_numbers<[1], [0], [0], [1], [0, 0, 1, 1], [], []>} : vector<2x3136xbf16>, vector<3136x512xbf16>, vector<2x512xf32> -> vector<2x512xf32>
    %c0_5 = arith.constant 0 : index
    %c0_6 = arith.constant 0 : index
    %c0_7 = arith.constant 0 : index
    %5 = vector.load %arg3[%c0_5, %c0_6, %c0_7] : memref<1x1x512xf32, #tpu.memory_space<vmem>>, vector<1x1x512xf32>
    %6 = vector.shape_cast %5 : vector<1x1x512xf32> to vector<1x512xf32>
    %7 = vector.broadcast %6 : vector<1x512xf32> to vector<2x512xf32>
    %8 = arith.addf %4, %7 : vector<2x512xf32>
    %cst_8 = arith.constant 0.000000e+00 : f32
    %9 = vector.broadcast %cst_8 : f32 to vector<2x512xf32>
    %10 = arith.maximumf %8, %9 : vector<2x512xf32>
    %11 = arith.truncf %10 : vector<2x512xf32> to vector<2x512xbf16>
    %c0_9 = arith.constant 0 : index
    %c0_10 = arith.constant 0 : index
    %c0_11 = arith.constant 0 : index
    %12 = vector.load %arg4[%c0_9, %c0_10, %c0_11] : memref<1x512x128xbf16, #tpu.memory_space<vmem>>, vector<1x512x128xbf16>
    %13 = vector.shape_cast %12 : vector<1x512x128xbf16> to vector<512x128xbf16>
    %cst_12 = arith.constant dense<0.000000e+00> : vector<2x128xf32>
    %14 = tpu.matmul %11, %13, %cst_12 {dimension_numbers = #tpu.dot_dimension_numbers<[1], [0], [0], [1], [0, 0, 1, 1], [], []>} : vector<2x512xbf16>, vector<512x128xbf16>, vector<2x128xf32> -> vector<2x128xf32>
    %c0_13 = arith.constant 0 : index
    %c0_14 = arith.constant 0 : index
    %c0_15 = arith.constant 0 : index
    %15 = vector.load %arg5[%c0_13, %c0_14, %c0_15] : memref<1x1x128xf32, #tpu.memory_space<vmem>>, vector<1x1x128xf32>
    %16 = vector.shape_cast %15 : vector<1x1x128xf32> to vector<1x128xf32>
    %17 = vector.broadcast %16 : vector<1x128xf32> to vector<2x128xf32>
    %18 = arith.addf %14, %17 : vector<2x128xf32>
    %c0_16 = arith.constant 0 : index
    %c0_17 = arith.constant 0 : index
    %19 = vector.load %arg6[%c0_16, %c0_17] : memref<1x128xf32, #tpu.memory_space<vmem>>, vector<1x128xf32>
    %20 = vector.broadcast %19 : vector<1x128xf32> to vector<2x128xf32>
    %21 = arith.addf %18, %20 : vector<2x128xf32>
    %cst_18 = arith.constant dense<0xFF800000> : vector<2xf32>
    %22 = vector.multi_reduction <maximumf>, %21, %cst_18 [1] : vector<2x128xf32> to vector<2xf32>
    %23 = vector.shape_cast %22 : vector<2xf32> to vector<2x1xf32>
    %24 = vector.broadcast %23 : vector<2x1xf32> to vector<2x128xf32>
    %25 = arith.subf %21, %24 : vector<2x128xf32>
    %26 = math.exp %25 : vector<2x128xf32>
    %cst_19 = arith.constant dense<0.000000e+00> : vector<2xf32>
    %27 = vector.multi_reduction <add>, %26, %cst_19 [1] : vector<2x128xf32> to vector<2xf32>
    %28 = vector.shape_cast %27 : vector<2xf32> to vector<2x1xf32>
    %29 = vector.broadcast %28 : vector<2x1xf32> to vector<2x128xf32>
    %30 = arith.divf %26, %29 : vector<2x128xf32>
    %c0_i32 = arith.constant 0 : i32
    %31 = arith.cmpi eq, %arg0, %c0_i32 : i32
    %32 = arith.select %31, %30, %18 : vector<2x128xf32>
    %c0_20 = arith.constant 0 : index
    %c0_21 = arith.constant 0 : index
    %c0_22 = arith.constant 0 : index
    %33 = vector.load %arg7[%c0_20, %c0_21, %c0_22] : memref<1x2x128xf32, #tpu.memory_space<vmem>>, vector<1x2x128xf32>
    %34 = vector.shape_cast %33 : vector<1x2x128xf32> to vector<2x128xf32>
    %35 = vector.shape_cast %32 : vector<2x128xf32> to vector<1x2x128xf32>
    tpu.vector_store %arg7[%c0_20, %c0_21, %c0_22], %35 {strides = array<i32>} : memref<1x2x128xf32, #tpu.memory_space<vmem>>, vector<1x2x128xf32>,
    return
  }
  func.func @transform_0(%arg0: i32) -> (i32, i32, i32) {
    %c0_i32 = arith.constant 0 : i32
    %c0_i32_0 = arith.constant 0 : i32
    %c0_i32_1 = arith.constant 0 : i32
    return %arg0, %c0_i32, %c0_i32_0 : i32, i32, i32
  }
  func.func @transform_1(%arg0: i32) -> (i32, i32, i32) {
    %c0_i32 = arith.constant 0 : i32
    %c0_i32_0 = arith.constant 0 : i32
    %c0_i32_1 = arith.constant 0 : i32
    return %arg0, %c0_i32, %c0_i32_0 : i32, i32, i32
  }
  func.func @transform_2(%arg0: i32) -> (i32, i32, i32) {
    %c0_i32 = arith.constant 0 : i32
    %c0_i32_0 = arith.constant 0 : i32
    %c0_i32_1 = arith.constant 0 : i32
    return %arg0, %c0_i32, %c0_i32_0 : i32, i32, i32
  }
  func.func @transform_3(%arg0: i32) -> (i32, i32, i32) {
    %c0_i32 = arith.constant 0 : i32
    %c0_i32_0 = arith.constant 0 : i32
    %c0_i32_1 = arith.constant 0 : i32
    return %arg0, %c0_i32, %c0_i32_0 : i32, i32, i32
  }
  func.func @transform_4(%arg0: i32) -> (i32, i32, i32) {
    %c0_i32 = arith.constant 0 : i32
    %c0_i32_0 = arith.constant 0 : i32
    %c0_i32_1 = arith.constant 0 : i32
    return %arg0, %c0_i32, %c0_i32_0 : i32, i32, i32
  }
  func.func @transform_5(%arg0: i32) -> (i32, i32) {
    %c0_i32 = arith.constant 0 : i32
    %c0_i32_0 = arith.constant 0 : i32
    %c0_i32_1 = arith.constant 0 : i32
    return %c0_i32, %c0_i32_0 : i32, i32
  }
  func.func @transform_6(%arg0: i32) -> (i32, i32, i32) {
    %c0_i32 = arith.constant 0 : i32
    %c0_i32_0 = arith.constant 0 : i32
    %c0_i32_1 = arith.constant 0 : i32
    return %arg0, %c0_i32, %c0_i32_0 : i32, i32, i32
  }
}

</mosaic_0001>

<bundles_post_ra>
// kernel: conv_actor_critic_forward.4
= control target key start
LH: loop header
LB: loop body
LE: loop exit
PB: predicated region body
PF: predicated region fallthrough
CT: control target
= control target key end

     0   :  { %s1707_s12 = smov 0   ;;  %s1709_s13 = smov 0   ;;  %s2033_s0 = inlined_call_operand.vmem [shape: bf16[1,800,256], index: 0, kind: input, shape index: {}]   ;;  %s2034_s1 = inlined_call_operand.vmem [shape: bf16[1,256,64], index: 1, kind: input, shape index: {}]   ;;  %s2035_s2 = inlined_call_operand.vmem [shape: f32[1,1,64], index: 2, kind: input, shape index: {}]   ;;  %s2036_s3 = inlined_call_operand.vmem [shape: bf16[1,800,64], index: 3, kind: output, shape index: {}]  }
   0x1   :  { %s1711_s14 = smov 0  }
   0x2 LB: > { %s22_s15 = sadd.s32 1, %s1680_s13  ;;  %p1340_p0 = scmp.ge.s32.totalorder %s1684_s14, 1  ;;  %s1684_s14 = sphi %s1711_s14, %s13_s14   ;;  %s1680_s13 = sphi %s1709_s13, %s2038_s13   ;;  %s1676_s12 = sphi %s1707_s12, %s2037_s12  }
   0x3   : > { %p23_p1 = scmp.ge.s32.totalorder %s22_s15, 2  ;;  %p177_p2 = scmp.lt.s32.totalorder %s1684_s14, 3 }
   0x5   : > { %s2040_s15 = smov (%p23_p1, %s22_s15), 0  ;;  %p178_p3 = pnand %p1340_p0, %p177_p2 }
   0x6   : > { %v1571_v0 = vld [vmem:[%s2034_s1] sm:$0xff] (!%p178_p3)   ;;  %v1686_v1 = vmov (!%p178_p3), 0   ;;  %s218_s18 = smul.u32 (!%p178_p3), 50, %s1676_s12  ;;  %v1572_v2 = vld [vmem:[%s2034_s1 + $0x8] sm:$0xff] (!%p178_p3)   ;;  %v1573_v3 = vld [vmem:[%s2034_s1 + $0x10] sm:$0xff] (!%p178_p3)   ;;  %vm1166_vm0 = vcmask (!%p178_p3), 519168  }
   0x7   : > { %181 = sbr.rel (%p178_p3) target bundleno = 388 (0x184), region = 32  ;;  %683 = vmatprep.subr.bf16.mxu0 (!%p178_p3), %v1686_v1  ;;  %1514 = vmatprep.subr.bf16.mxu1 (!%p178_p3), %v1686_v1  ;;  %v1574_v4 = vld [vmem:[%s2034_s1 + $0x18] sm:$0xff] (!%p178_p3)   ;;  %v1575_v5 = vld [vmem:[%s2034_s1 + $0x20] sm:$0xff] (!%p178_p3)   ;;  %v1576_v7 = vld [vmem:[%s2034_s1 + $0x28] sm:$0xff] (!%p178_p3)  }
   0x8   : > { %684 = vmatpush1.bf16.msra.mxu0 (!%p178_p3), %v1571_v0  ;;  %1530 = vmatpush1.bf16.msra.mxu1 (!%p178_p3), %v1571_v0  ;;  %p221_p4 = scmp.lt.s32.totalorder (!%p178_p3), %s218_s18, 99  ;;  %v1577_v9 = vld [vmem:[%s2034_s1 + $0x30] sm:$0xff] (!%p178_p3)   ;;  %v1578_v10 = vld [vmem:[%s2034_s1 + $0x38] sm:$0xff] (!%p178_p3)   ;;  %v1579_v11 = vld [vmem:[%s2034_s1 + $0x40] sm:$0xff] (!%p178_p3)  }
   0x9   : > { %685 = vmatprep.subr.bf16.mxu0 (!%p178_p3), %v1686_v1  ;;  %1515 = vmatprep.subr.bf16.mxu1 (!%p178_p3), %v1686_v1  ;;  %v1580_v12 = vld [vmem:[%s2034_s1 + $0x48] sm:$0xff] (!%p178_p3)   ;;  %v1581_v13 = vld [vmem:[%s2034_s1 + $0x50] sm:$0xff] (!%p178_p3)   ;;  %v1582_v14 = vld [vmem:[%s2034_s1 + $0x58] sm:$0xff] (!%p178_p3)  }
   0xa   : > { %v1583_v15 = vld [vmem:[%s2034_s1 + $0x60] sm:$0xff] (!%p178_p3)   ;;  %v1584_v16 = vld [vmem:[%s2034_s1 + $0x68] sm:$0xff] (!%p178_p3)   ;;  %v1585_v17 = vld [vmem:[%s2034_s1 + $0x70] sm:$0xff] (!%p178_p3)  }
   0xb   : > { %v1586_v18 = vld [vmem:[%s2034_s1 + $0x78] sm:$0xff] (!%p178_p3)  }
   0xc   : > { %686 = vmatpush1.bf16.msra.mxu0 (!%p178_p3), %v1572_v2  ;;  %1531 = vmatpush1.bf16.msra.mxu1 (!%p178_p3), %v1572_v2 }
   0xd   : > { %687 = vmatprep.subr.bf16.mxu0 (!%p178_p3), %v1686_v1  ;;  %1516 = vmatprep.subr.bf16.mxu1 (!%p178_p3), %v1686_v1 }
   0xe   : > { %s2042_s18 = smov (!%p221_p4, %s218_s18), 99 }
   0xf   : > { %s1463_s25 = sshll.u32 %s2042_s18, 3  ;;  %s1343_s6 = sshll.u32 %s2042_s18, 2 }
  0x10   : > { %688 = vmatpush1.bf16.msra.mxu0 %v1573_v3  ;;  %1532 = vmatpush1.bf16.msra.mxu1 %v1573_v3  ;;  %s1754_s30 = scalar_lea.vmem %s2033_s0, %s1463_s25  ;;  %v1866_v3 = vld [vmem:[%s2035_s2] ss:$0 sm:$0xff]  ;;  %s1876_s18 = scalar_lea.vmem %s2036_s3, %s1343_s6 }
  0x11   : > { %689 = vmatprep.subr.bf16.mxu0 %v1686_v1  ;;  %1517 = vmatprep.subr.bf16.mxu1 %v1686_v1  ;;  %v1589_v6 = vld [vmem:[%s1754_s30 + $0x4] ss:$8 sps:$4 sm:$0xff]   ;;  %v1592_v8 = vld [vmem:[%s1754_s30 + $0xd4] ss:$8 sps:$4 sm:$0xff]   ;;  %v1587_v19 = vld [vmem:[%s1754_s30] ss:$8 sps:$4 sm:$0xff]  }
  0x12   : > { %715 = vmatprep.mubr.bf16.mxu0 %v1589_v6  ;;  %819 = vmatprep.mubr.bf16.mxu1 %v1592_v8  ;;  %v1590_v20 = vld [vmem:[%s1754_s30 + $0xd0] ss:$8 sps:$4 sm:$0xff]   ;;  %v1593_v21 = vld [vmem:[%s1754_s30 + $0x14] ss:$8 sps:$4 sm:$0xff]   ;;  %v1596_v22 = vld [vmem:[%s1754_s30 + $0xe4] ss:$8 sps:$4 sm:$0xff]  }
  0x13   : > { %v1595_v23 = vld [vmem:[%s1754_s30 + $0x10] ss:$8 sps:$4 sm:$0xff]   ;;  %v1598_v24 = vld [vmem:[%s1754_s30 + $0xe0] ss:$8 sps:$4 sm:$0xff]   ;;  %v1599_v25 = vld [vmem:[%s1754_s30 + $0x24] ss:$8 sps:$4 sm:$0xff]  }
  0x14   : > { %690 = vmatpush1.bf16.msra.mxu0 %v1574_v4  ;;  %1533 = vmatpush1.bf16.msra.mxu1 %v1574_v4  ;;  %v1602_v26 = vld [vmem:[%s1754_s30 + $0xf4] ss:$8 sps:$4 sm:$0xff]   ;;  %v1601_v27 = vld [vmem:[%s1754_s30 + $0x20] ss:$8 sps:$4 sm:$0xff]   ;;  %v1604_v28 = vld [vmem:[%s1754_s30 + $0xf0] ss:$8 sps:$4 sm:$0xff]  }
  0x15   : > { %691 = vmatprep.subr.bf16.mxu0 %v1686_v1  ;;  %1518 = vmatprep.subr.bf16.mxu1 %v1686_v1  ;;  %v1605_v29 = vld [vmem:[%s1754_s30 + $0x34] ss:$8 sps:$4 sm:$0xff]   ;;  %v1608_v30 = vld [vmem:[%s1754_s30 + $0x104] ss:$8 sps:$4 sm:$0xff]   ;;  %v1607_v31 = vld [vmem:[%s1754_s30 + $0x30] ss:$8 sps:$4 sm:$0xff]  }
  0x16   : > { %v1610_v32 = vld [vmem:[%s1754_s30 + $0x100] ss:$8 sps:$4 sm:$0xff]   ;;  %v1611_v33 = vld [vmem:[%s1754_s30 + $0x44] ss:$8 sps:$4 sm:$0xff]   ;;  %v1614_v34 = vld [vmem:[%s1754_s30 + $0x114] ss:$8 sps:$4 sm:$0xff]  }
  0x17   : > { %v1613_v35 = vld [vmem:[%s1754_s30 + $0x40] ss:$8 sps:$4 sm:$0xff]   ;;  %v1616_v36 = vld [vmem:[%s1754_s30 + $0x110] ss:$8 sps:$4 sm:$0xff]   ;;  %v1617_v37 = vld [vmem:[%s1754_s30 + $0x54] ss:$8 sps:$4 sm:$0xff]  }
  0x18   : > { %692 = vmatpush1.bf16.msra.mxu0 %v1575_v5  ;;  %1534 = vmatpush1.bf16.msra.mxu1 %v1575_v5  ;;  %v1620_v38 = vld [vmem:[%s1754_s30 + $0x124] ss:$8 sps:$4 sm:$0xff]   ;;  %v1619_v39 = vld [vmem:[%s1754_s30 + $0x50] ss:$8 sps:$4 sm:$0xff]   ;;  %v1622_v40 = vld [vmem:[%s1754_s30 + $0x120] ss:$8 sps:$4 sm:$0xff]  }
  0x19   : > { %693 = vmatprep.subr.bf16.mxu0 %v1686_v1  ;;  %1519 = vmatprep.subr.bf16.mxu1 %v1686_v1  ;;  %v1623_v41 = vld [vmem:[%s1754_s30 + $0x64] ss:$8 sps:$4 sm:$0xff]   ;;  %v1626_v42 = vld [vmem:[%s1754_s30 + $0x134] ss:$8 sps:$4 sm:$0xff]   ;;  %v1625_v43 = vld [vmem:[%s1754_s30 + $0x60] ss:$8 sps:$4 sm:$0xff]  }
  0x1a   : > { %v1628_v44 = vld [vmem:[%s1754_s30 + $0x130] ss:$8 sps:$4 sm:$0xff]   ;;  %v1629_v45 = vld [vmem:[%s1754_s30 + $0x74] ss:$8 sps:$4 sm:$0xff]   ;;  %v1632_v46 = vld [vmem:[%s1754_s30 + $0x144] ss:$8 sps:$4 sm:$0xff]  }
  0x1b   : > { %v1631_v47 = vld [vmem:[%s1754_s30 + $0x70] ss:$8 sps:$4 sm:$0xff]   ;;  %v1634_v48 = vld [vmem:[%s1754_s30 + $0x140] ss:$8 sps:$4 sm:$0xff]   ;;  %v1635_v49 = vld [vmem:[%s1754_s30 + $0x84] ss:$8 sps:$4 sm:$0xff]  }
  0x1c   : > { %694 = vmatpush1.bf16.msra.mxu0 %v1576_v7  ;;  %1535 = vmatpush1.bf16.msra.mxu1 %v1576_v7  ;;  %v1638_v50 = vld [vmem:[%s1754_s30 + $0x154] ss:$8 sps:$4 sm:$0xff]   ;;  %v1637_v51 = vld [vmem:[%s1754_s30 + $0x80] ss:$8 sps:$4 sm:$0xff]   ;;  %v1640_v52 = vld [vmem:[%s1754_s30 + $0x150] ss:$8 sps:$4 sm:$0xff]  }
  0x1d   : > { %695 = vmatprep.subr.bf16.mxu0 %v1686_v1  ;;  %1520 = vmatprep.subr.bf16.mxu1 %v1686_v1  ;;  %v1641_v53 = vld [vmem:[%s1754_s30 + $0x94] ss:$8 sps:$4 sm:$0xff]   ;;  %v1644_v54 = vld [vmem:[%s1754_s30 + $0x164] ss:$8 sps:$4 sm:$0xff]   ;;  %v1643_v55 = vld [vmem:[%s1754_s30 + $0x90] ss:$8 sps:$4 sm:$0xff]  }
  0x1e   : > { %v1646_v56 = vld [vmem:[%s1754_s30 + $0x160] ss:$8 sps:$4 sm:$0xff]   ;;  %v1647_v57 = vld [vmem:[%s1754_s30 + $0xa4] ss:$8 sps:$4 sm:$0xff]   ;;  %v1650_v58 = vld [vmem:[%s1754_s30 + $0x174] ss:$8 sps:$4 sm:$0xff]  }
  0x1f   : > { %v1649_v59 = vld [vmem:[%s1754_s30 + $0xa0] ss:$8 sps:$4 sm:$0xff]   ;;  %v1652_v60 = vld [vmem:[%s1754_s30 + $0x170] ss:$8 sps:$4 sm:$0xff]   ;;  %v1653_v61 = vld [vmem:[%s1754_s30 + $0xb4] ss:$8 sps:$4 sm:$0xff]  }
  0x20   : > { %696 = vmatpush1.bf16.msra.mxu0 %v1577_v9  ;;  %1536 = vmatpush1.bf16.msra.mxu1 %v1577_v9  ;;  %v1656_v62 = vld [vmem:[%s1754_s30 + $0x184] ss:$8 sps:$4 sm:$0xff]   ;;  %v1655_v63 = vld [vmem:[%s1754_s30 + $0xb0] ss:$8 sps:$4 sm:$0xff]   ;;  %v1658_v0 = vld [vmem:[%s1754_s30 + $0x180] ss:$8 sps:$4 sm:$0xff]  }
  0x21   : > { %697 = vmatprep.subr.bf16.mxu0 %v1686_v1  ;;  %1521 = vmatprep.subr.bf16.mxu1 %v1686_v1  ;;  %v1661_v2 = vld [vmem:[%s1754_s30 + $0xc0] ss:$8 sps:$4 sm:$0xff]  }
  0x24   : > { %698 = vmatpush1.bf16.msra.mxu0 %v1578_v10  ;;  %1537 = vmatpush1.bf16.msra.mxu1 %v1578_v10 }
  0x25   : > { %699 = vmatprep.subr.bf16.mxu0 %v1686_v1  ;;  %1522 = vmatprep.subr.bf16.mxu1 %v1686_v1 }
  0x28   : > { %700 = vmatpush1.bf16.msra.mxu0 %v1579_v11  ;;  %1538 = vmatpush1.bf16.msra.mxu1 %v1579_v11 }
  0x29   : > { %701 = vmatprep.subr.bf16.mxu0 %v1686_v1  ;;  %1523 = vmatprep.subr.bf16.mxu1 %v1686_v1 }
  0x2c   : > { %702 = vmatpush1.bf16.msra.mxu0 %v1580_v12  ;;  %1539 = vmatpush1.bf16.msra.mxu1 %v1580_v12 }
  0x2d   : > { %703 = vmatprep.subr.bf16.mxu0 %v1686_v1  ;;  %1524 = vmatprep.subr.bf16.mxu1 %v1686_v1 }
  0x30   : > { %704 = vmatpush1.bf16.msra.mxu0 %v1581_v13  ;;  %1540 = vmatpush1.bf16.msra.mxu1 %v1581_v13 }
  0x31   : > { %705 = vmatprep.subr.bf16.mxu0 %v1686_v1  ;;  %1525 = vmatprep.subr.bf16.mxu1 %v1686_v1 }
  0x34   : > { %706 = vmatpush1.bf16.msra.mxu0 %v1582_v14  ;;  %1541 = vmatpush1.bf16.msra.mxu1 %v1582_v14 }
  0x35   : > { %707 = vmatprep.subr.bf16.mxu0 %v1686_v1  ;;  %1526 = vmatprep.subr.bf16.mxu1 %v1686_v1 }
  0x38   : > { %708 = vmatpush1.bf16.msra.mxu0 %v1583_v15  ;;  %1542 = vmatpush1.bf16.msra.mxu1 %v1583_v15 }
  0x39   : > { %709 = vmatprep.subr.bf16.mxu0 %v1686_v1  ;;  %1527 = vmatprep.subr.bf16.mxu1 %v1686_v1 }
  0x3c   : > { %710 = vmatpush1.bf16.msra.mxu0 %v1584_v16  ;;  %1543 = vmatpush1.bf16.msra.mxu1 %v1584_v16 }
  0x3d   : > { %711 = vmatprep.subr.bf16.mxu0 %v1686_v1  ;;  %1528 = vmatprep.subr.bf16.mxu1 %v1686_v1 }
  0x40   : > { %712 = vmatpush1.bf16.msra.mxu0 %v1585_v17  ;;  %1544 = vmatpush1.bf16.msra.mxu1 %v1585_v17 }
  0x41   : > { %713 = vmatprep.subr.bf16.mxu0 %v1686_v1  ;;  %1529 = vmatprep.subr.bf16.mxu1 %v1686_v1  ;;  %v1659_v1 = vld [vmem:[%s1754_s30 + $0xc4] ss:$8 sps:$4 sm:$0xff]  }
  0x44   : > { %714 = vmatpush1.bf16.msra.mxu0 %v1586_v18  ;;  %1545 = vmatpush1.bf16.msra.mxu1 %v1586_v18 }
  0x47   : > { %716 = vmatmul.mubr.bf16.vlgmr.msra.gmra.mrb[0].mxu0 %v1587_v19  ;;  %820 = vmatmul.mubr.bf16.vlgmr.msra.gmra.mrb[0].mxu1 %v1590_v20 }
  0x48   : > { %723 = vmatprep.mubr.bf16.mxu0 %v1593_v21  ;;  %827 = vmatprep.mubr.bf16.mxu1 %v1596_v22 }
  0x4f   : > { %724 = vmatmul.mubr.bf16.gmra.mrb[4].mxu0 %v1595_v23  ;;  %828 = vmatmul.mubr.bf16.gmra.mrb[4].mxu1 %v1598_v24 }
  0x50   : > { %731 = vmatprep.mubr.bf16.mxu0 %v1599_v25  ;;  %835 = vmatprep.mubr.bf16.mxu1 %v1602_v26 }
  0x57   : > { %732 = vmatmul.mubr.bf16.gmra.mrb[8].mxu0 %v1601_v27  ;;  %836 = vmatmul.mubr.bf16.gmra.mrb[8].mxu1 %v1604_v28 }
  0x58   : > { %739 = vmatprep.mubr.bf16.mxu0 %v1605_v29  ;;  %843 = vmatprep.mubr.bf16.mxu1 %v1608_v30 }
  0x5f   : > { %740 = vmatmul.mubr.bf16.gmra.mrb[12].mxu0 %v1607_v31  ;;  %844 = vmatmul.mubr.bf16.gmra.mrb[12].mxu1 %v1610_v32 }
  0x60   : > { %747 = vmatprep.mubr.bf16.mxu0 %v1611_v33  ;;  %851 = vmatprep.mubr.bf16.mxu1 %v1614_v34 }
  0x67   : > { %748 = vmatmul.mubr.bf16.gmra.mrb[16].mxu0 %v1613_v35  ;;  %852 = vmatmul.mubr.bf16.gmra.mrb[16].mxu1 %v1616_v36 }
  0x68   : > { %755 = vmatprep.mubr.bf16.mxu0 %v1617_v37  ;;  %859 = vmatprep.mubr.bf16.mxu1 %v1620_v38 }
  0x6f   : > { %756 = vmatmul.mubr.bf16.gmra.mrb[20].mxu0 %v1619_v39  ;;  %860 = vmatmul.mubr.bf16.gmra.mrb[20].mxu1 %v1622_v40 }
  0x70   : > { %763 = vmatprep.mubr.bf16.mxu0 %v1623_v41  ;;  %867 = vmatprep.mubr.bf16.mxu1 %v1626_v42 }
  0x77   : > { %764 = vmatmul.mubr.bf16.gmra.mrb[24].mxu0 %v1625_v43  ;;  %868 = vmatmul.mubr.bf16.gmra.mrb[24].mxu1 %v1628_v44 }
  0x78   : > { %771 = vmatprep.mubr.bf16.mxu0 %v1629_v45  ;;  %875 = vmatprep.mubr.bf16.mxu1 %v1632_v46 }
  0x7f   : > { %772 = vmatmul.mubr.bf16.gmra.mrb[28].mxu0 %v1631_v47  ;;  %876 = vmatmul.mubr.bf16.gmra.mrb[28].mxu1 %v1634_v48 }
  0x80   : > { %779 = vmatprep.mubr.bf16.mxu0 %v1635_v49  ;;  %883 = vmatprep.mubr.bf16.mxu1 %v1638_v50 }
  0x87   : > { %780 = vmatmul.mubr.bf16.gmra.mrb[32].mxu0 %v1637_v51  ;;  %884 = vmatmul.mubr.bf16.gmra.mrb[32].mxu1 %v1640_v52 }
  0x88   : > { %787 = vmatprep.mubr.bf16.mxu0 %v1641_v53  ;;  %891 = vmatprep.mubr.bf16.mxu1 %v1644_v54 }
  0x8f   : > { %788 = vmatmul.mubr.bf16.gmra.mrb[36].mxu0 %v1643_v55  ;;  %892 = vmatmul.mubr.bf16.gmra.mrb[36].mxu1 %v1646_v56 }
  0x90   : > { %795 = vmatprep.mubr.bf16.mxu0 %v1647_v57  ;;  %899 = vmatprep.mubr.bf16.mxu1 %v1650_v58 }
  0x97   : > { %796 = vmatmul.mubr.bf16.gmra.mrb[40].mxu0 %v1649_v59  ;;  %900 = vmatmul.mubr.bf16.gmra.mrb[40].mxu1 %v1652_v60 }
  0x98   : > { %803 = vmatprep.mubr.bf16.mxu0 %v1653_v61  ;;  %907 = vmatprep.mubr.bf16.mxu1 %v1656_v62 }
  0x9f   : > { %804 = vmatmul.mubr.bf16.gmra.mrb[44].mxu0 %v1655_v63  ;;  %908 = vmatmul.mubr.bf16.gmra.mrb[44].mxu1 %v1658_v0 }
  0xa0   : > { %811 = vmatprep.mubr.bf16.mxu0 %v1659_v1 }
  0xa7   : > { %812 = vmatmul.mubr.bf16.gmra.mrb[48].mxu0 %v1661_v2 }
 0x11a   : > { %v717_v4 = vpop.f32.mrb[0].mxu0  ;;  %v821_v5 = vpop.f32.mrb[0].mxu1 }
 0x11b   : > { %v718_v6 = vadd.f32 %v1866_v3, %v717_v4  ;;  %v719_v7 = vpop.f32.mrb[1].mxu0  ;;  %v822_v8 = vadd.f32 %v1866_v3, %v821_v5  ;;  %v823_v9 = vpop.f32.mrb[1].mxu1 }
 0x11c   : > { %v720_v10 = vpop.f32.mrb[2].mxu0  ;;  %v824_v11 = vpop.f32.mrb[2].mxu1 }
 0x11d   : > { %v916_v12 = vmax.f32 %v718_v6, 0.0  ;;  %v721_v13 = vadd.f32 %v1866_v3, %v720_v10  ;;  %v722_v14 = vpop.f32.mrb[3].mxu0  ;;  %v942_v15 = vmax.f32 %v822_v8, 0.0  ;;  %v825_v16 = vadd.f32 %v1866_v3, %v824_v11  ;;  %v826_v17 = vpop.f32.mrb[3].mxu1 }
 0x11f   : > { %v1464_v18 = vpack.c.bf16 %v916_v12, %v916_v12  ;;  %v917_v19 = vmax.f32 %v721_v13, 0.0  ;;  %v1490_v20 = vpack.c.bf16 %v942_v15, %v942_v15  ;;  %v943_v21 = vmax.f32 %v825_v16, 0.0 }
 0x121   : > { %1167 = vst.msk [vmem:[%s1876_s18] sm:$0xf] %vm1166_vm0, %v1464_v18  ;;  %v1465_v22 = vpack.c.bf16 %v917_v19, %v917_v19  ;;  %1193 = vst.msk [vmem:[%s1876_s18 + $0x68] sm:$0xf] %vm1166_vm0, %v1490_v20  ;;  %v1491_v23 = vpack.c.bf16 %v943_v21, %v943_v21 }
 0x122   : > { %v725_v24 = vpop.f32.mrb[4].mxu0  ;;  %v829_v25 = vpop.f32.mrb[4].mxu1 }
 0x123   : > { %1168 = vst.msk [vmem:[%s1876_s18 + $0x4] sm:$0xf] %vm1166_vm0, %v1465_v22  ;;  %1194 = vst.msk [vmem:[%s1876_s18 + $0x6c] sm:$0xf] %vm1166_vm0, %v1491_v23  ;;  %v726_v26 = vadd.f32 %v1866_v3, %v725_v24  ;;  %v727_v27 = vpop.f32.mrb[5].mxu0  ;;  %v830_v28 = vadd.f32 %v1866_v3, %v829_v25  ;;  %v831_v29 = vpop.f32.mrb[5].mxu1 }
 0x124   : > { %v728_v30 = vpop.f32.mrb[6].mxu0  ;;  %v832_v31 = vpop.f32.mrb[6].mxu1 }
 0x125   : > { %v918_v32 = vmax.f32 %v726_v26, 0.0  ;;  %v729_v33 = vadd.f32 %v1866_v3, %v728_v30  ;;  %v730_v34 = vpop.f32.mrb[7].mxu0  ;;  %v944_v35 = vmax.f32 %v830_v28, 0.0  ;;  %v833_v36 = vadd.f32 %v1866_v3, %v832_v31  ;;  %v834_v37 = vpop.f32.mrb[7].mxu1 }
 0x127   : > { %v1466_v38 = vpack.c.bf16 %v918_v32, %v918_v32  ;;  %v919_v39 = vmax.f32 %v729_v33, 0.0  ;;  %v1492_v40 = vpack.c.bf16 %v944_v35, %v944_v35  ;;  %v945_v41 = vmax.f32 %v833_v36, 0.0 }
 0x129   : > { %1169 = vst.msk [vmem:[%s1876_s18 + $0x8] sm:$0xf] %vm1166_vm0, %v1466_v38  ;;  %v1467_v42 = vpack.c.bf16 %v919_v39, %v919_v39  ;;  %1195 = vst.msk [vmem:[%s1876_s18 + $0x70] sm:$0xf] %vm1166_vm0, %v1492_v40  ;;  %v1493_v43 = vpack.c.bf16 %v945_v41, %v945_v41 }
 0x12a   : > { %v733_v44 = vpop.f32.mrb[8].mxu0  ;;  %v837_v45 = vpop.f32.mrb[8].mxu1 }
 0x12b   : > { %1170 = vst.msk [vmem:[%s1876_s18 + $0xc] sm:$0xf] %vm1166_vm0, %v1467_v42  ;;  %1196 = vst.msk [vmem:[%s1876_s18 + $0x74] sm:$0xf] %vm1166_vm0, %v1493_v43  ;;  %v734_v46 = vadd.f32 %v1866_v3, %v733_v44  ;;  %v735_v47 = vpop.f32.mrb[9].mxu0  ;;  %v838_v48 = vadd.f32 %v1866_v3, %v837_v45  ;;  %v839_v49 = vpop.f32.mrb[9].mxu1 }
 0x12c   : > { %v736_v50 = vpop.f32.mrb[10].mxu0  ;;  %v840_v51 = vpop.f32.mrb[10].mxu1 }
 0x12d   : > { %v920_v52 = vmax.f32 %v734_v46, 0.0  ;;  %v737_v53 = vadd.f32 %v1866_v3, %v736_v50  ;;  %v738_v54 = vpop.f32.mrb[11].mxu0  ;;  %v946_v55 = vmax.f32 %v838_v48, 0.0  ;;  %v841_v56 = vadd.f32 %v1866_v3, %v840_v51  ;;  %v842_v57 = vpop.f32.mrb[11].mxu1 }
 0x12f   : > { %v1468_v58 = vpack.c.bf16 %v920_v52, %v920_v52  ;;  %v921_v59 = vmax.f32 %v737_v53, 0.0  ;;  %v1494_v60 = vpack.c.bf16 %v946_v55, %v946_v55  ;;  %v947_v61 = vmax.f32 %v841_v56, 0.0 }
 0x131   : > { %1171 = vst.msk [vmem:[%s1876_s18 + $0x10] sm:$0xf] %vm1166_vm0, %v1468_v58  ;;  %v1469_v62 = vpack.c.bf16 %v921_v59, %v921_v59  ;;  %1197 = vst.msk [vmem:[%s1876_s18 + $0x78] sm:$0xf] %vm1166_vm0, %v1494_v60  ;;  %v1495_v63 = vpack.c.bf16 %v947_v61, %v947_v61 }
 0x132   : > { %v741_v0 = vpop.f32.mrb[12].mxu0  ;;  %v845_v1 = vpop.f32.mrb[12].mxu1 }
 0x133   : > { %1172 = vst.msk [vmem:[%s1876_s18 + $0x14] sm:$0xf] %vm1166_vm0, %v1469_v62  ;;  %1198 = vst.msk [vmem:[%s1876_s18 + $0x7c] sm:$0xf] %vm1166_vm0, %v1495_v63  ;;  %v742_v2 = vadd.f32 %v1866_v3, %v741_v0  ;;  %v743_v4 = vpop.f32.mrb[13].mxu0  ;;  %v846_v5 = vadd.f32 %v1866_v3, %v845_v1  ;;  %v847_v6 = vpop.f32.mrb[13].mxu1 }
 0x134   : > { %v744_v7 = vpop.f32.mrb[14].mxu0  ;;  %v848_v8 = vpop.f32.mrb[14].mxu1 }
 0x135   : > { %v922_v9 = vmax.f32 %v742_v2, 0.0  ;;  %v745_v10 = vadd.f32 %v1866_v3, %v744_v7  ;;  %v746_v11 = vpop.f32.mrb[15].mxu0  ;;  %v948_v12 = vmax.f32 %v846_v5, 0.0  ;;  %v849_v13 = vadd.f32 %v1866_v3, %v848_v8  ;;  %v850_v14 = vpop.f32.mrb[15].mxu1 }
 0x137   : > { %v1470_v15 = vpack.c.bf16 %v922_v9, %v922_v9  ;;  %v923_v16 = vmax.f32 %v745_v10, 0.0  ;;  %v1496_v17 = vpack.c.bf16 %v948_v12, %v948_v12  ;;  %v949_v18 = vmax.f32 %v849_v13, 0.0 }
 0x139   : > { %1173 = vst.msk [vmem:[%s1876_s18 + $0x18] sm:$0xf] %vm1166_vm0, %v1470_v15  ;;  %v1471_v19 = vpack.c.bf16 %v923_v16, %v923_v16  ;;  %1199 = vst.msk [vmem:[%s1876_s18 + $0x80] sm:$0xf] %vm1166_vm0, %v1496_v17  ;;  %v1497_v20 = vpack.c.bf16 %v949_v18, %v949_v18 }
 0x13a   : > { %v749_v21 = vpop.f32.mrb[16].mxu0  ;;  %v853_v22 = vpop.f32.mrb[16].mxu1 }
 0x13b   : > { %1174 = vst.msk [vmem:[%s1876_s18 + $0x1c] sm:$0xf] %vm1166_vm0, %v1471_v19  ;;  %1200 = vst.msk [vmem:[%s1876_s18 + $0x84] sm:$0xf] %vm1166_vm0, %v1497_v20  ;;  %v750_v23 = vadd.f32 %v1866_v3, %v749_v21  ;;  %v751_v24 = vpop.f32.mrb[17].mxu0  ;;  %v854_v25 = vadd.f32 %v1866_v3, %v853_v22  ;;  %v855_v26 = vpop.f32.mrb[17].mxu1 }
 0x13c   : > { %v752_v27 = vpop.f32.mrb[18].mxu0  ;;  %v856_v28 = vpop.f32.mrb[18].mxu1 }
 0x13d   : > { %v924_v29 = vmax.f32 %v750_v23, 0.0  ;;  %v753_v30 = vadd.f32 %v1866_v3, %v752_v27  ;;  %v754_v31 = vpop.f32.mrb[19].mxu0  ;;  %v950_v32 = vmax.f32 %v854_v25, 0.0  ;;  %v857_v33 = vadd.f32 %v1866_v3, %v856_v28  ;;  %v858_v34 = vpop.f32.mrb[19].mxu1 }
 0x13f   : > { %v1472_v35 = vpack.c.bf16 %v924_v29, %v924_v29  ;;  %v925_v36 = vmax.f32 %v753_v30, 0.0  ;;  %v1498_v37 = vpack.c.bf16 %v950_v32, %v950_v32  ;;  %v951_v38 = vmax.f32 %v857_v33, 0.0 }
 0x141   : > { %1175 = vst.msk [vmem:[%s1876_s18 + $0x20] sm:$0xf] %vm1166_vm0, %v1472_v35  ;;  %v1473_v39 = vpack.c.bf16 %v925_v36, %v925_v36  ;;  %1201 = vst.msk [vmem:[%s1876_s18 + $0x88] sm:$0xf] %vm1166_vm0, %v1498_v37  ;;  %v1499_v40 = vpack.c.bf16 %v951_v38, %v951_v38 }
 0x142   : > { %v757_v41 = vpop.f32.mrb[20].mxu0  ;;  %v861_v42 = vpop.f32.mrb[20].mxu1 }
 0x143   : > { %1176 = vst.msk [vmem:[%s1876_s18 + $0x24] sm:$0xf] %vm1166_vm0, %v1473_v39  ;;  %1202 = vst.msk [vmem:[%s1876_s18 + $0x8c] sm:$0xf] %vm1166_vm0, %v1499_v40  ;;  %v758_v43 = vadd.f32 %v1866_v3, %v757_v41  ;;  %v759_v44 = vpop.f32.mrb[21].mxu0  ;;  %v862_v45 = vadd.f32 %v1866_v3, %v861_v42  ;;  %v863_v46 = vpop.f32.mrb[21].mxu1 }
 0x144   : > { %v760_v47 = vpop.f32.mrb[22].mxu0  ;;  %v864_v48 = vpop.f32.mrb[22].mxu1 }
 0x145   : > { %v926_v49 = vmax.f32 %v758_v43, 0.0  ;;  %v761_v50 = vadd.f32 %v1866_v3, %v760_v47  ;;  %v762_v51 = vpop.f32.mrb[23].mxu0  ;;  %v952_v52 = vmax.f32 %v862_v45, 0.0  ;;  %v865_v53 = vadd.f32 %v1866_v3, %v864_v48  ;;  %v866_v54 = vpop.f32.mrb[23].mxu1 }
 0x147   : > { %v1474_v55 = vpack.c.bf16 %v926_v49, %v926_v49  ;;  %v927_v56 = vmax.f32 %v761_v50, 0.0  ;;  %v1500_v57 = vpack.c.bf16 %v952_v52, %v952_v52  ;;  %v953_v58 = vmax.f32 %v865_v53, 0.0 }
 0x149   : > { %1177 = vst.msk [vmem:[%s1876_s18 + $0x28] sm:$0xf] %vm1166_vm0, %v1474_v55  ;;  %v1475_v59 = vpack.c.bf16 %v927_v56, %v927_v56  ;;  %1203 = vst.msk [vmem:[%s1876_s18 + $0x90] sm:$0xf] %vm1166_vm0, %v1500_v57  ;;  %v1501_v60 = vpack.c.bf16 %v953_v58, %v953_v58 }
 0x14a   : > { %v765_v61 = vpop.f32.mrb[24].mxu0  ;;  %v869_v62 = vpop.f32.mrb[24].mxu1 }
 0x14b   : > { %1178 = vst.msk [vmem:[%s1876_s18 + $0x2c] sm:$0xf] %vm1166_vm0, %v1475_v59  ;;  %1204 = vst.msk [vmem:[%s1876_s18 + $0x94] sm:$0xf] %vm1166_vm0, %v1501_v60  ;;  %v766_v63 = vadd.f32 %v1866_v3, %v765_v61  ;;  %v767_v0 = vpop.f32.mrb[25].mxu0  ;;  %v870_v1 = vadd.f32 %v1866_v3, %v869_v62  ;;  %v871_v2 = vpop.f32.mrb[25].mxu1 }
 0x14c   : > { %v768_v4 = vpop.f32.mrb[26].mxu0  ;;  %v872_v5 = vpop.f32.mrb[26].mxu1 }
 0x14d   : > { %v928_v6 = vmax.f32 %v766_v63, 0.0  ;;  %v769_v7 = vadd.f32 %v1866_v3, %v768_v4  ;;  %v770_v8 = vpop.f32.mrb[27].mxu0  ;;  %v954_v9 = vmax.f32 %v870_v1, 0.0  ;;  %v873_v10 = vadd.f32 %v1866_v3, %v872_v5  ;;  %v874_v11 = vpop.f32.mrb[27].mxu1 }
 0x14f   : > { %v1476_v12 = vpack.c.bf16 %v928_v6, %v928_v6  ;;  %v929_v13 = vmax.f32 %v769_v7, 0.0  ;;  %v1502_v14 = vpack.c.bf16 %v954_v9, %v954_v9  ;;  %v955_v15 = vmax.f32 %v873_v10, 0.0 }
 0x151   : > { %1179 = vst.msk [vmem:[%s1876_s18 + $0x30] sm:$0xf] %vm1166_vm0, %v1476_v12  ;;  %v1477_v16 = vpack.c.bf16 %v929_v13, %v929_v13  ;;  %1205 = vst.msk [vmem:[%s1876_s18 + $0x98] sm:$0xf] %vm1166_vm0, %v1502_v14  ;;  %v1503_v17 = vpack.c.bf16 %v955_v15, %v955_v15 }
 0x152   : > { %v773_v18 = vpop.f32.mrb[28].mxu0  ;;  %v877_v19 = vpop.f32.mrb[28].mxu1 }
 0x153   : > { %1180 = vst.msk [vmem:[%s1876_s18 + $0x34] sm:$0xf] %vm1166_vm0, %v1477_v16  ;;  %1206 = vst.msk [vmem:[%s1876_s18 + $0x9c] sm:$0xf] %vm1166_vm0, %v1503_v17  ;;  %v774_v20 = vadd.f32 %v1866_v3, %v773_v18  ;;  %v775_v21 = vpop.f32.mrb[29].mxu0  ;;  %v878_v22 = vadd.f32 %v1866_v3, %v877_v19  ;;  %v879_v23 = vpop.f32.mrb[29].mxu1 }
 0x154   : > { %v776_v24 = vpop.f32.mrb[30].mxu0  ;;  %v880_v25 = vpop.f32.mrb[30].mxu1 }
 0x155   : > { %v930_v26 = vmax.f32 %v774_v20, 0.0  ;;  %v777_v27 = vadd.f32 %v1866_v3, %v776_v24  ;;  %v778_v28 = vpop.f32.mrb[31].mxu0  ;;  %v956_v29 = vmax.f32 %v878_v22, 0.0  ;;  %v881_v30 = vadd.f32 %v1866_v3, %v880_v25  ;;  %v882_v31 = vpop.f32.mrb[31].mxu1 }
 0x157   : > { %v1478_v32 = vpack.c.bf16 %v930_v26, %v930_v26  ;;  %v931_v33 = vmax.f32 %v777_v27, 0.0  ;;  %v1504_v34 = vpack.c.bf16 %v956_v29, %v956_v29  ;;  %v957_v35 = vmax.f32 %v881_v30, 0.0 }
 0x159   : > { %1181 = vst.msk [vmem:[%s1876_s18 + $0x38] sm:$0xf] %vm1166_vm0, %v1478_v32  ;;  %v1479_v36 = vpack.c.bf16 %v931_v33, %v931_v33  ;;  %1207 = vst.msk [vmem:[%s1876_s18 + $0xa0] sm:$0xf] %vm1166_vm0, %v1504_v34  ;;  %v1505_v37 = vpack.c.bf16 %v957_v35, %v957_v35 }
 0x15a   : > { %v781_v38 = vpop.f32.mrb[32].mxu0  ;;  %v885_v39 = vpop.f32.mrb[32].mxu1 }
 0x15b   : > { %1182 = vst.msk [vmem:[%s1876_s18 + $0x3c] sm:$0xf] %vm1166_vm0, %v1479_v36  ;;  %1208 = vst.msk [vmem:[%s1876_s18 + $0xa4] sm:$0xf] %vm1166_vm0, %v1505_v37  ;;  %v782_v40 = vadd.f32 %v1866_v3, %v781_v38  ;;  %v783_v41 = vpop.f32.mrb[33].mxu0  ;;  %v886_v42 = vadd.f32 %v1866_v3, %v885_v39  ;;  %v887_v43 = vpop.f32.mrb[33].mxu1 }
 0x15c   : > { %v784_v44 = vpop.f32.mrb[34].mxu0  ;;  %v888_v45 = vpop.f32.mrb[34].mxu1 }
 0x15d   : > { %v932_v46 = vmax.f32 %v782_v40, 0.0  ;;  %v785_v47 = vadd.f32 %v1866_v3, %v784_v44  ;;  %v786_v48 = vpop.f32.mrb[35].mxu0  ;;  %v958_v49 = vmax.f32 %v886_v42, 0.0  ;;  %v889_v50 = vadd.f32 %v1866_v3, %v888_v45  ;;  %v890_v51 = vpop.f32.mrb[35].mxu1 }
 0x15f   : > { %v1480_v52 = vpack.c.bf16 %v932_v46, %v932_v46  ;;  %v933_v53 = vmax.f32 %v785_v47, 0.0  ;;  %v1506_v54 = vpack.c.bf16 %v958_v49, %v958_v49  ;;  %v959_v55 = vmax.f32 %v889_v50, 0.0 }
 0x161   : > { %1183 = vst.msk [vmem:[%s1876_s18 + $0x40] sm:$0xf] %vm1166_vm0, %v1480_v52  ;;  %v1481_v56 = vpack.c.bf16 %v933_v53, %v933_v53  ;;  %1209 = vst.msk [vmem:[%s1876_s18 + $0xa8] sm:$0xf] %vm1166_vm0, %v1506_v54  ;;  %v1507_v57 = vpack.c.bf16 %v959_v55, %v959_v55 }
 0x162   : > { %v789_v58 = vpop.f32.mrb[36].mxu0  ;;  %v893_v59 = vpop.f32.mrb[36].mxu1 }
 0x163   : > { %1184 = vst.msk [vmem:[%s1876_s18 + $0x44] sm:$0xf] %vm1166_vm0, %v1481_v56  ;;  %1210 = vst.msk [vmem:[%s1876_s18 + $0xac] sm:$0xf] %vm1166_vm0, %v1507_v57  ;;  %v790_v60 = vadd.f32 %v1866_v3, %v789_v58  ;;  %v791_v61 = vpop.f32.mrb[37].mxu0  ;;  %v894_v62 = vadd.f32 %v1866_v3, %v893_v59  ;;  %v895_v63 = vpop.f32.mrb[37].mxu1 }
 0x164   : > { %v792_v0 = vpop.f32.mrb[38].mxu0  ;;  %v896_v1 = vpop.f32.mrb[38].mxu1 }
 0x165   : > { %v934_v2 = vmax.f32 %v790_v60, 0.0  ;;  %v793_v4 = vadd.f32 %v1866_v3, %v792_v0  ;;  %v794_v5 = vpop.f32.mrb[39].mxu0  ;;  %v960_v6 = vmax.f32 %v894_v62, 0.0  ;;  %v897_v7 = vadd.f32 %v1866_v3, %v896_v1  ;;  %v898_v8 = vpop.f32.mrb[39].mxu1 }
 0x167   : > { %v1482_v9 = vpack.c.bf16 %v934_v2, %v934_v2  ;;  %v935_v10 = vmax.f32 %v793_v4, 0.0  ;;  %v1508_v11 = vpack.c.bf16 %v960_v6, %v960_v6  ;;  %v961_v12 = vmax.f32 %v897_v7, 0.0 }
 0x169   : > { %1185 = vst.msk [vmem:[%s1876_s18 + $0x48] sm:$0xf] %vm1166_vm0, %v1482_v9  ;;  %v1483_v13 = vpack.c.bf16 %v935_v10, %v935_v10  ;;  %1211 = vst.msk [vmem:[%s1876_s18 + $0xb0] sm:$0xf] %vm1166_vm0, %v1508_v11  ;;  %v1509_v14 = vpack.c.bf16 %v961_v12, %v961_v12 }
 0x16a   : > { %v797_v15 = vpop.f32.mrb[40].mxu0  ;;  %v901_v16 = vpop.f32.mrb[40].mxu1 }
 0x16b   : > { %1186 = vst.msk [vmem:[%s1876_s18 + $0x4c] sm:$0xf] %vm1166_vm0, %v1483_v13  ;;  %1212 = vst.msk [vmem:[%s1876_s18 + $0xb4] sm:$0xf] %vm1166_vm0, %v1509_v14  ;;  %v798_v17 = vadd.f32 %v1866_v3, %v797_v15  ;;  %v799_v18 = vpop.f32.mrb[41].mxu0  ;;  %v902_v19 = vadd.f32 %v1866_v3, %v901_v16  ;;  %v903_v20 = vpop.f32.mrb[41].mxu1 }
 0x16c   : > { %v800_v21 = vpop.f32.mrb[42].mxu0  ;;  %v904_v22 = vpop.f32.mrb[42].mxu1 }
 0x16d   : > { %v936_v23 = vmax.f32 %v798_v17, 0.0  ;;  %v801_v24 = vadd.f32 %v1866_v3, %v800_v21  ;;  %v802_v25 = vpop.f32.mrb[43].mxu0  ;;  %v962_v26 = vmax.f32 %v902_v19, 0.0  ;;  %v905_v27 = vadd.f32 %v1866_v3, %v904_v22  ;;  %v906_v28 = vpop.f32.mrb[43].mxu1 }
 0x16f   : > { %v1484_v29 = vpack.c.bf16 %v936_v23, %v936_v23  ;;  %v937_v30 = vmax.f32 %v801_v24, 0.0  ;;  %v1510_v31 = vpack.c.bf16 %v962_v26, %v962_v26  ;;  %v963_v32 = vmax.f32 %v905_v27, 0.0 }
 0x171   : > { %1187 = vst.msk [vmem:[%s1876_s18 + $0x50] sm:$0xf] %vm1166_vm0, %v1484_v29  ;;  %v1485_v33 = vpack.c.bf16 %v937_v30, %v937_v30  ;;  %1213 = vst.msk [vmem:[%s1876_s18 + $0xb8] sm:$0xf] %vm1166_vm0, %v1510_v31  ;;  %v1511_v34 = vpack.c.bf16 %v963_v32, %v963_v32 }
 0x172   : > { %v805_v35 = vpop.f32.mrb[44].mxu0  ;;  %v909_v36 = vpop.f32.mrb[44].mxu1 }
 0x173   : > { %1188 = vst.msk [vmem:[%s1876_s18 + $0x54] sm:$0xf] %vm1166_vm0, %v1485_v33  ;;  %1214 = vst.msk [vmem:[%s1876_s18 + $0xbc] sm:$0xf] %vm1166_vm0, %v1511_v34  ;;  %v806_v37 = vadd.f32 %v1866_v3, %v805_v35  ;;  %v807_v38 = vpop.f32.mrb[45].mxu0  ;;  %v910_v39 = vadd.f32 %v1866_v3, %v909_v36  ;;  %v911_v40 = vpop.f32.mrb[45].mxu1 }
 0x174   : > { %v808_v41 = vpop.f32.mrb[46].mxu0  ;;  %v912_v42 = vpop.f32.mrb[46].mxu1 }
 0x175   : > { %v938_v43 = vmax.f32 %v806_v37, 0.0  ;;  %v809_v44 = vadd.f32 %v1866_v3, %v808_v41  ;;  %v810_v45 = vpop.f32.mrb[47].mxu0  ;;  %v964_v46 = vmax.f32 %v910_v39, 0.0  ;;  %v913_v47 = vadd.f32 %v1866_v3, %v912_v42  ;;  %v914_v48 = vpop.f32.mrb[47].mxu1 }
 0x177   : > { %v1486_v49 = vpack.c.bf16 %v938_v43, %v938_v43  ;;  %v939_v50 = vmax.f32 %v809_v44, 0.0  ;;  %v1512_v51 = vpack.c.bf16 %v964_v46, %v964_v46  ;;  %v965_v52 = vmax.f32 %v913_v47, 0.0 }
 0x179   : > { %1189 = vst.msk [vmem:[%s1876_s18 + $0x58] sm:$0xf] %vm1166_vm0, %v1486_v49  ;;  %v1487_v53 = vpack.c.bf16 %v939_v50, %v939_v50  ;;  %1215 = vst.msk [vmem:[%s1876_s18 + $0xc0] sm:$0xf] %vm1166_vm0, %v1512_v51  ;;  %v1513_v54 = vpack.c.bf16 %v965_v52, %v965_v52 }
 0x17a   : > { %v813_v55 = vpop.f32.mrb[48].mxu0 }
 0x17b   : > { %1190 = vst.msk [vmem:[%s1876_s18 + $0x5c] sm:$0xf] %vm1166_vm0, %v1487_v53  ;;  %1216 = vst.msk [vmem:[%s1876_s18 + $0xc4] sm:$0xf] %vm1166_vm0, %v1513_v54  ;;  %v814_v56 = vadd.f32 %v1866_v3, %v813_v55  ;;  %v815_v57 = vpop.f32.mrb[49].mxu0 }
 0x17c   : > { %v816_v58 = vpop.f32.mrb[50].mxu0 }
 0x17d   : > { %v940_v59 = vmax.f32 %v814_v56, 0.0  ;;  %v817_v60 = vadd.f32 %v1866_v3, %v816_v58  ;;  %v818_v61 = vpop.f32.mrb[51].mxu0 }
 0x17f   : > { %v1488_v62 = vpack.c.bf16 %v940_v59, %v940_v59  ;;  %v941_v63 = vmax.f32 %v817_v60, 0.0 }
 0x181   : > { %1191 = vst.msk [vmem:[%s1876_s18 + $0x60] sm:$0xf] %vm1166_vm0, %v1488_v62  ;;  %v1489_v0 = vpack.c.bf16 %v941_v63, %v941_v63 }
 0x183   : > { %1192 = vst.msk [vmem:[%s1876_s18 + $0x64] sm:$0xf] %vm1166_vm0, %v1489_v0 }
 0x184 PF: > { %s13_s14 = sadd.s32 1, %s1684_s14   ;;  %s2037_s12 = smov %s1680_s13 }
 0x185   : > { %p10_p5 = scmp.ge.s32.totalorder %s13_s14, 4   ;;  %s2038_s13 = smov %s2040_s15 }
 0x187   :  { %12 = sbr.rel (!%p10_p5) target bundleno = 2 (0x2), region = 68 }

// kernel: squeeze.4
= control target key start
LH: loop header
LB: loop body
LE: loop exit
PB: predicated region body
PF: predicated region fallthrough
CT: control target
= control target key end

     0   :  { %vm338_vm0 = vcmask 523264   ;;  %s1119_s0 = inlined_call_operand.vmem [shape: bf16[1,162,64], index: 0, kind: input, shape index: {}]   ;;  %s1120_s1 = inlined_call_operand.vmem [shape: bf16[2,9,9,64], index: 1, kind: output, shape index: {}]  }
   0x1   :  { %v775_v0 = vld [vmem:[%s1119_s0 + $0x50] sm:$0xf]  ;;  %v960_v1 = vld [vmem:[%s1119_s0 + $0x48] sm:$0xff]   ;;  %v961_v2 = vld [vmem:[%s1119_s0 + $0x40] sm:$0xff]  }
   0x2   :  { %v17_v3 = vunpack.c.l.bf16 %v775_v0  ;;  %v832_v4 = vunpack.c.l.bf16 %v960_v1  ;;  %v833_v5 = vunpack.c.h.bf16 %v960_v1  ;;  %v836_v6 = vunpack.c.l.bf16 %v961_v2  ;;  %v962_v7 = vld [vmem:[%s1119_s0 + $0x38] sm:$0xff]   ;;  %v963_v8 = vld [vmem:[%s1119_s0 + $0x30] sm:$0xff]   ;;  %v964_v9 = vld [vmem:[%s1119_s0 + $0x28] sm:$0xff]  }
   0x3   :  { %v837_v10 = vunpack.c.h.bf16 %v961_v2  ;;  %v840_v11 = vunpack.c.l.bf16 %v962_v7  ;;  %v841_v12 = vunpack.c.h.bf16 %v962_v7  ;;  %v844_v13 = vunpack.c.l.bf16 %v963_v8  ;;  %v965_v14 = vld [vmem:[%s1119_s0 + $0x20] sm:$0xff]   ;;  %v966_v15 = vld [vmem:[%s1119_s0 + $0x18] sm:$0xff]   ;;  %v967_v16 = vld [vmem:[%s1119_s0 + $0x10] sm:$0xff]  }
   0x4   :  { %20 = vst [vmem:[#allocation1 + $0xa0] sm:$0xff] %v17_v3  ;;  %v845_v17 = vunpack.c.h.bf16 %v963_v8  ;;  %v848_v18 = vunpack.c.l.bf16 %v964_v9  ;;  %v849_v19 = vunpack.c.h.bf16 %v964_v9  ;;  %v852_v20 = vunpack.c.l.bf16 %v965_v14  ;;  %v968_v21 = vld [vmem:[%s1119_s0 + $0x8] sm:$0xff]   ;;  %v867_v22 = vld [vmem:[%s1119_s0] sm:$0xff]   ;;  %445 = vst.msk [vmem:[#allocation0 + $0xe2] sm:$0x7f] %vm338_vm0, %v836_v6  }
   0x5   :  { %447 = vst.msk [vmem:[#allocation0 + $0xe9] sm:$0x80] %vm338_vm0, %v836_v6   ;;  %457 = vst.msk [vmem:[#allocation0 + $0x100] sm:$0xff] %vm338_vm0, %v832_v4   ;;  %v853_v23 = vunpack.c.h.bf16 %v965_v14  ;;  %v856_v24 = vunpack.c.l.bf16 %v966_v15  ;;  %v857_v25 = vunpack.c.h.bf16 %v966_v15  ;;  %v860_v26 = vunpack.c.l.bf16 %v967_v16 }
   0x6   :  { %462 = vst.msk [vmem:[#allocation0 + $0x108] ss:$8 sm:$0x3] %vm338_vm0, %v833_v5   ;;  %464 = vst.msk [vmem:[#allocation0 + $0x10f] sm:$0xfc] %vm338_vm0, %v833_v5   ;;  %v861_v27 = vunpack.c.h.bf16 %v967_v16  ;;  %v864_v28 = vunpack.c.l.bf16 %v968_v21  ;;  %v865_v29 = vunpack.c.h.bf16 %v968_v21  ;;  %v868_v30 = vunpack.c.l.bf16 %v867_v22 }
   0x7   :  { %417 = vst.msk [vmem:[#allocation0 + $0xa6] sm:$0x7] %vm338_vm0, %v844_v13   ;;  %419 = vst.msk [vmem:[#allocation0 + $0xad] sm:$0xf8] %vm338_vm0, %v844_v13   ;;  %v869_v31 = vunpack.c.h.bf16 %v867_v22 }
   0x8   :  { %431 = vst.msk [vmem:[#allocation0 + $0xc4] sm:$0x1f] %vm338_vm0, %v840_v11   ;;  %433 = vst.msk [vmem:[#allocation0 + $0xcb] sm:$0xe0] %vm338_vm0, %v840_v11  }
   0x9   :  { %438 = vst.msk [vmem:[#allocation0 + $0xd3] sm:$0x3f] %vm338_vm0, %v841_v12   ;;  %440 = vst.msk [vmem:[#allocation0 + $0xda] sm:$0xc0] %vm338_vm0, %v841_v12  }
   0xa   :  { %452 = vst.msk [vmem:[#allocation0 + $0xf1] sm:$0xff] %vm338_vm0, %v837_v10   ;;  %393 = vst.msk [vmem:[#allocation0 + $0x71] sm:$0xff] %vm338_vm0, %v852_v20  }
   0xb   :  { %403 = vst.msk [vmem:[#allocation0 + $0x88] ss:$8 sm:$0x3] %vm338_vm0, %v848_v18   ;;  %405 = vst.msk [vmem:[#allocation0 + $0x8f] sm:$0xfc] %vm338_vm0, %v848_v18   ;;  %v674_v54 = vld [vmem:[#allocation0 + $0xe8] sm:$0xff] }
   0xc   :  { %410 = vst.msk [vmem:[#allocation0 + $0x97] sm:$0x3] %vm338_vm0, %v849_v19   ;;  %412 = vst.msk [vmem:[#allocation0 + $0x9e] sm:$0xfc] %vm338_vm0, %v849_v19   ;;  %v466_v32 = vld [vmem:[#allocation1 + $0xa0] sm:$0x3]  }
   0xd   :  { %424 = vst.msk [vmem:[#allocation0 + $0xb5] sm:$0xf] %vm338_vm0, %v845_v17   ;;  %426 = vst.msk [vmem:[#allocation0 + $0xbc] sm:$0xf0] %vm338_vm0, %v845_v17   ;;  %v695_v60 = vld [vmem:[#allocation0 + $0x100] sm:$0xff]  ;;  %v702_v17 = vld [vmem:[#allocation0 + $0x108] sm:$0xff] }
   0xe   :  { %365 = vst.msk [vmem:[#allocation0 + $0x35] sm:$0xf] %vm338_vm0, %v860_v26   ;;  %367 = vst.msk [vmem:[#allocation0 + $0x3c] sm:$0xf0] %vm338_vm0, %v860_v26   ;;  %v618_v42 = vld [vmem:[#allocation0 + $0xa8] sm:$0xff]  ;;  %v953_v20 = vpack.c.bf16 %v702_v17, %v695_v60 }
   0xf   :  { %379 = vst.msk [vmem:[#allocation0 + $0x53] sm:$0x3f] %vm338_vm0, %v856_v24   ;;  %381 = vst.msk [vmem:[#allocation0 + $0x5a] sm:$0xc0] %vm338_vm0, %v856_v24   ;;  %v646_v46 = vld [vmem:[#allocation0 + $0xc8] sm:$0xff] }
  0x10   :  { %386 = vst.msk [vmem:[#allocation0 + $0x62] sm:$0x7f] %vm338_vm0, %v857_v25   ;;  %388 = vst.msk [vmem:[#allocation0 + $0x69] sm:$0x80] %vm338_vm0, %v857_v25   ;;  %v653_v53 = vld [vmem:[#allocation0 + $0xd0] sm:$0xff]  ;;  %v660_v11 = vld [vmem:[#allocation0 + $0xd8] sm:$0xff] }
  0x11   :  { %398 = vst.msk [vmem:[#allocation0 + $0x80] sm:$0xff] %vm338_vm0, %v853_v23   ;;  %339 = vst.msk [vmem:[#allocation0] sm:$0xff] %vm338_vm0, %v868_v30   ;;  %v576_v36 = vld [vmem:[#allocation0 + $0x78] sm:$0xff]  ;;  %v667_v12 = vld [vmem:[#allocation0 + $0xe0] sm:$0xff]  ;;  %v938_v14 = vpack.c.bf16 %v660_v11, %v653_v53 }
  0x12   :  { %351 = vst.msk [vmem:[#allocation0 + $0x17] sm:$0x3] %vm338_vm0, %v864_v28   ;;  %353 = vst.msk [vmem:[#allocation0 + $0x1e] sm:$0xfc] %vm338_vm0, %v864_v28   ;;  %v590_v40 = vld [vmem:[#allocation0 + $0x88] sm:$0xff]  ;;  %v681_v13 = vld [vmem:[#allocation0 + $0xf0] sm:$0xff]  ;;  %v943_v15 = vpack.c.bf16 %v674_v54, %v667_v12 }
  0x13   :  { %358 = vst.msk [vmem:[#allocation0 + $0x26] sm:$0x7] %vm338_vm0, %v865_v29   ;;  %360 = vst.msk [vmem:[#allocation0 + $0x2d] sm:$0xf8] %vm338_vm0, %v865_v29   ;;  %v597_v41 = vld [vmem:[#allocation0 + $0x90] sm:$0xff]  ;;  %v604_v1 = vld [vmem:[#allocation0 + $0x98] sm:$0xff] }
  0x14   :  { %372 = vst.msk [vmem:[#allocation0 + $0x44] sm:$0x1f] %vm338_vm0, %v861_v27   ;;  %374 = vst.msk [vmem:[#allocation0 + $0x4b] sm:$0xe0] %vm338_vm0, %v861_v27   ;;  %v611_v2 = vld [vmem:[#allocation0 + $0xa0] sm:$0xff]  ;;  %v918_v4 = vpack.c.bf16 %v604_v1, %v597_v41  ;;  %v625_v6 = vld [vmem:[#allocation0 + $0xb0] sm:$0xff] }
  0x15   :  { %344 = vst.msk [vmem:[#allocation0 + $0x8] ss:$8 sm:$0x3] %vm338_vm0, %v869_v31   ;;  %346 = vst.msk [vmem:[#allocation0 + $0xf] sm:$0xfc] %vm338_vm0, %v869_v31   ;;  %v520_v33 = vld [vmem:[#allocation0 + $0x38] sm:$0xff]  ;;  %v923_v5 = vpack.c.bf16 %v618_v42, %v611_v2 }
  0x16   :  { %469 = vst.msk [vmem:[#allocation0 + $0x117] sm:$0x3] %vm338_vm0, %v466_v32   ;;  %v548_v34 = vld [vmem:[#allocation0 + $0x58] sm:$0xff]  ;;  %v639_v8 = vld [vmem:[#allocation0 + $0xc0] sm:$0xff]  ;;  %977 = vst [vmem:[%s1120_s1 + $0x48] sm:$0xff] %v918_v4  }
  0x17   :  { %v555_v35 = vld [vmem:[#allocation0 + $0x60] sm:$0xff]  ;;  %v562_v58 = vld [vmem:[#allocation0 + $0x68] sm:$0xff]  ;;  %v569_v59 = vld [vmem:[#allocation0 + $0x70] sm:$0xff]  ;;  %v933_v10 = vpack.c.bf16 %v646_v46, %v639_v8  ;;  %978 = vst [vmem:[%s1120_s1 + $0x50] sm:$0xff] %v923_v5  }
  0x18   :  { %v474_v37 = vld [vmem:[#allocation0] sm:$0xff]  ;;  %v903_v62 = vpack.c.bf16 %v562_v58, %v555_v35  ;;  %v908_v63 = vpack.c.bf16 %v576_v36, %v569_v59  ;;  %v632_v7 = vld [vmem:[#allocation0 + $0xb8] sm:$0xff]  ;;  %981 = vst [vmem:[%s1120_s1 + $0x68] sm:$0xff] %v938_v14   ;;  %982 = vst [vmem:[%s1120_s1 + $0x70] sm:$0xff] %v943_v15  }
  0x19   :  { %v492_v38 = vld [vmem:[#allocation0 + $0x18] sm:$0xff]  ;;  %v583_v0 = vld [vmem:[#allocation0 + $0x80] sm:$0xff]  ;;  %v928_v9 = vpack.c.bf16 %v632_v7, %v625_v6  ;;  %980 = vst [vmem:[%s1120_s1 + $0x60] sm:$0xff] %v933_v10   ;;  %984 = vst [vmem:[%s1120_s1 + $0x80] sm:$0xff] %v953_v20  }
  0x1a   :  { %v499_v39 = vld [vmem:[#allocation0 + $0x20] sm:$0xff]  ;;  %v506_v45 = vld [vmem:[#allocation0 + $0x28] sm:$0xff]  ;;  %v513_v50 = vld [vmem:[#allocation0 + $0x30] sm:$0xff]  ;;  %v913_v3 = vpack.c.bf16 %v590_v40, %v583_v0  ;;  %974 = vst [vmem:[%s1120_s1 + $0x30] sm:$0xff] %v903_v62  }
  0x1b   :  { %v883_v49 = vpack.c.bf16 %v506_v45, %v499_v39  ;;  %v527_v51 = vld [vmem:[#allocation0 + $0x40] sm:$0xff]  ;;  %v534_v52 = vld [vmem:[#allocation0 + $0x48] sm:$0xff]  ;;  %v888_v55 = vpack.c.bf16 %v520_v33, %v513_v50  ;;  %v541_v57 = vld [vmem:[#allocation0 + $0x50] sm:$0xff]  ;;  %975 = vst [vmem:[%s1120_s1 + $0x38] sm:$0xff] %v908_v63  }
  0x1c   :  { %v479_v43 = vld [vmem:[#allocation0 + $0x8] sm:$0xff]  ;;  %v485_v44 = vld [vmem:[#allocation0 + $0x10] sm:$0xff]  ;;  %v893_v56 = vpack.c.bf16 %v534_v52, %v527_v51  ;;  %v898_v61 = vpack.c.bf16 %v548_v34, %v541_v57  ;;  %976 = vst [vmem:[%s1120_s1 + $0x40] sm:$0xff] %v913_v3   ;;  %v688_v16 = vld [vmem:[#allocation0 + $0xf8] sm:$0xff] }
  0x1d   :  { %v873_v47 = vpack.c.bf16 %v479_v43, %v474_v37  ;;  %v878_v48 = vpack.c.bf16 %v492_v38, %v485_v44  ;;  %970 = vst [vmem:[%s1120_s1 + $0x10] sm:$0xff] %v883_v49   ;;  %971 = vst [vmem:[%s1120_s1 + $0x18] sm:$0xff] %v888_v55   ;;  %v709_v18 = vld [vmem:[#allocation0 + $0x110] sm:$0xff]  ;;  %v948_v19 = vpack.c.bf16 %v688_v16, %v681_v13  ;;  %v716_v21 = vld [vmem:[#allocation0 + $0x118] sm:$0xff] }
  0x1e   :  { %972 = vst [vmem:[%s1120_s1 + $0x20] sm:$0xff] %v893_v56   ;;  %973 = vst [vmem:[%s1120_s1 + $0x28] sm:$0xff] %v898_v61   ;;  %v958_v22 = vpack.c.bf16 %v716_v21, %v709_v18 }
  0x1f   :  { %874 = vst [vmem:[%s1120_s1] sm:$0xff] %v873_v47   ;;  %969 = vst [vmem:[%s1120_s1 + $0x8] sm:$0xff] %v878_v48  }
  0x20   :  { %979 = vst [vmem:[%s1120_s1 + $0x58] sm:$0xff] %v928_v9   ;;  %983 = vst [vmem:[%s1120_s1 + $0x78] sm:$0xff] %v948_v19  }
  0x21   :  { %985 = vst [vmem:[%s1120_s1 + $0x88] sm:$0xff] %v958_v22  }

// kernel: conv_actor_critic_forward.5
= control target key start
LH: loop header
LB: loop body
LE: loop exit
PB: predicated region body
PF: predicated region fallthrough
CT: control target
= control target key end

     0   :  { %s1708_s12 = smov 0   ;;  %s1710_s13 = smov 0   ;;  %s1897_s0 = inlined_call_operand.vmem [shape: bf16[2,162,512], index: 0, kind: input, shape index: {}]   ;;  %s1898_s1 = inlined_call_operand.vmem [shape: bf16[2,512,64], index: 1, kind: input, shape index: {}]   ;;  %s1899_s2 = inlined_call_operand.vmem [shape: f32[2,1,64], index: 2, kind: input, shape index: {}]   ;;  %s1900_s3 = inlined_call_operand.vmem [shape: bf16[2,162,64], index: 3, kind: output, shape index: {}]  }
   0x1   :  { %s1712_s14 = smov 0  }
   0x2 LB: > { %s25_s15 = sadd.s32 1, %s1682_s13  ;;  %p1251_p0 = scmp.ge.s32.totalorder %s1686_s14, 1  ;;  %s1686_s14 = sphi %s1712_s14, %s13_s14   ;;  %s1682_s13 = sphi %s1710_s13, %s1902_s13   ;;  %s1678_s12 = sphi %s1708_s12, %s1901_s12  }
   0x3   : > { %p27_p1 = scmp.ge.s32.totalorder %s25_s15, 2  ;;  %p177_p2 = scmp.lt.s32.totalorder %s1686_s14, 3 }
   0x5   : > { %s1904_s15 = smov (%p27_p1, %s25_s15), 0  ;;  %p178_p3 = pnand %p1251_p0, %p177_p2 }
   0x6   : > { %p219_p4 = scmp.lt.s32.totalorder (!%p178_p3), %s1678_s12, 1  ;;  %vm1113_vm0 = vcmask (!%p178_p3), 519168   ;;  %vm1134_vm1 = vcmask (!%p178_p3), 516096  }
   0x7   : > { %181 = sbr.rel (%p178_p3) target bundleno = 355 (0x163), region = 32 }
   0xe   : > { %s1906_s12 = smov (!%p219_p4, %s1678_s12), 1 }
   0xf   : > { %s1356_s16 = sshll.u32 %s1906_s12, 8  ;;  %s1542_s20 = smul.u32 336, %s1906_s12 }
  0x10   : > { %s1732_s19 = scalar_lea.vmem %s1898_s1, %s1356_s16  ;;  %s236_s26 = scalar_lea.vmem %s1899_s2, %s1906_s12 }
  0x11   : > { %v1568_v0 = vld [vmem:[%s1732_s19 + $0x40] sm:$0xff]   ;;  %v1572_v4 = vld [vmem:[%s1732_s19 + $0x48] sm:$0xff]   ;;  %v1576_v8 = vld [vmem:[%s1732_s19 + $0x50] sm:$0xff]   ;;  %s1768_s23 = scalar_lea.vmem %s1897_s0, %s1542_s20  ;;  %s1543_s27 = smul.u32 84, %s1906_s12 }
  0x12   : > { %v1569_v1 = vld [vmem:[%s1732_s19 + $0xc0] sm:$0xff]   ;;  %1378 = vmatprep.subr.bf16.mxu0 %v1568_v0  ;;  %v1573_v5 = vld [vmem:[%s1732_s19 + $0xc8] sm:$0xff]   ;;  %v1577_v9 = vld [vmem:[%s1732_s19 + $0xd0] sm:$0xff]  }
  0x13   : > { %v1570_v2 = vld [vmem:[%s1732_s19] sm:$0xff]   ;;  %1460 = vmatprep.subr.bf16.mxu1 %v1569_v1  ;;  %v1574_v6 = vld [vmem:[%s1732_s19 + $0x8] sm:$0xff]   ;;  %v1578_v10 = vld [vmem:[%s1732_s19 + $0x10] sm:$0xff]   ;;  %s1826_s30 = scalar_lea.vmem %s1900_s3, %s1543_s27 }
  0x14   : > { %v1571_v3 = vld [vmem:[%s1732_s19 + $0x80] sm:$0xff]   ;;  %1379 = vmatpush3.bf16.msra.mxu0 %v1570_v2  ;;  %v1575_v7 = vld [vmem:[%s1732_s19 + $0x88] sm:$0xff]   ;;  %v1579_v11 = vld [vmem:[%s1732_s19 + $0x90] sm:$0xff]  }
  0x15   : > { %1461 = vmatpush3.bf16.msra.mxu1 %v1571_v3  ;;  %1380 = vmatprep.subr.bf16.mxu0 %v1572_v4  ;;  %v1580_v12 = vld [vmem:[%s1732_s19 + $0x58] sm:$0xff]   ;;  %v1584_v16 = vld [vmem:[%s1732_s19 + $0x60] sm:$0xff]   ;;  %v1588_v20 = vld [vmem:[%s1732_s19 + $0x68] sm:$0xff]  }
  0x16   : > { %1462 = vmatprep.subr.bf16.mxu1 %v1573_v5  ;;  %v1581_v13 = vld [vmem:[%s1732_s19 + $0xd8] sm:$0xff]   ;;  %v1585_v17 = vld [vmem:[%s1732_s19 + $0xe0] sm:$0xff]   ;;  %v1589_v21 = vld [vmem:[%s1732_s19 + $0xe8] sm:$0xff]  }
  0x17   : > { %v1582_v14 = vld [vmem:[%s1732_s19 + $0x18] sm:$0xff]   ;;  %v1586_v18 = vld [vmem:[%s1732_s19 + $0x20] sm:$0xff]   ;;  %v1590_v22 = vld [vmem:[%s1732_s19 + $0x28] sm:$0xff]  }
  0x18   : > { %1381 = vmatpush3.bf16.msra.mxu0 %v1574_v6  ;;  %v1583_v15 = vld [vmem:[%s1732_s19 + $0x98] sm:$0xff]   ;;  %v1587_v19 = vld [vmem:[%s1732_s19 + $0xa0] sm:$0xff]   ;;  %v1591_v23 = vld [vmem:[%s1732_s19 + $0xa8] sm:$0xff]  }
  0x19   : > { %1463 = vmatpush3.bf16.msra.mxu1 %v1575_v7  ;;  %1382 = vmatprep.subr.bf16.mxu0 %v1576_v8  ;;  %v1592_v24 = vld [vmem:[%s1732_s19 + $0x70] sm:$0xff]   ;;  %v1596_v28 = vld [vmem:[%s1732_s19 + $0x78] sm:$0xff]   ;;  %v288_v6 = vld [vmem:[%s1768_s23 + $0x140] sm:$0x11] }
  0x1a   : > { %1464 = vmatprep.subr.bf16.mxu1 %v1577_v9  ;;  %v1593_v25 = vld [vmem:[%s1732_s19 + $0xf0] sm:$0xff]   ;;  %v1597_v29 = vld [vmem:[%s1732_s19 + $0xf8] sm:$0xff]   ;;  %v289_v7 = vld [vmem:[%s1768_s23 + $0x148] sm:$0x11] }
  0x1b   : > { %v1594_v26 = vld [vmem:[%s1732_s19 + $0x30] sm:$0xff]   ;;  %v1598_v30 = vld [vmem:[%s1732_s19 + $0x38] sm:$0xff]  }
  0x1c   : > { %1383 = vmatpush3.bf16.msra.mxu0 %v1578_v10  ;;  %v1595_v27 = vld [vmem:[%s1732_s19 + $0xb0] sm:$0xff]   ;;  %v1599_v31 = vld [vmem:[%s1732_s19 + $0xb8] sm:$0xff]   ;;  %v1298_v10 = vcombine.high %v288_v6, %v288_v6 }
  0x1d   : > { %1465 = vmatpush3.bf16.msra.mxu1 %v1579_v11  ;;  %1384 = vmatprep.subr.bf16.mxu0 %v1580_v12  ;;  %v1600_v32 = vld [vmem:[%s1768_s23] ss:$16 sps:$4 sm:$0xff]   ;;  %v1602_v33 = vld [vmem:[%s1768_s23 + $0x4] ss:$16 sps:$4 sm:$0xff]   ;;  %v1603_v34 = vld [vmem:[%s1768_s23 + $0x8] ss:$16 sps:$4 sm:$0xff]   ;;  %v1300_v11 = vcombine.high %v289_v7, %v289_v7  ;;  %v1297_v12 = vcombine.low %v288_v6, %v288_v6 }
  0x1e   : > { %1466 = vmatprep.subr.bf16.mxu1 %v1581_v13  ;;  %v1605_v35 = vld [vmem:[%s1768_s23 + $0xc] ss:$16 sps:$4 sm:$0xff]   ;;  %799 = vmatprep.mubr.bf16.mxu0 %v1602_v33  ;;  %v1606_v36 = vld [vmem:[%s1768_s23 + $0x24] ss:$16 sps:$4 sm:$0xff]   ;;  %v1610_v38 = vld [vmem:[%s1768_s23 + $0x20] ss:$16 sps:$4 sm:$0xff]   ;;  %v1299_v13 = vcombine.low %v289_v7, %v289_v7 }
  0x1f   : > { %919 = vmatprep.mubr.bf16.mxu1 %v1605_v35  ;;  %v1608_v37 = vld [vmem:[%s1768_s23 + $0x2c] ss:$16 sps:$4 sm:$0xff]   ;;  %v1611_v39 = vld [vmem:[%s1768_s23 + $0x28] ss:$16 sps:$4 sm:$0xff]   ;;  %v1612_v40 = vld [vmem:[%s1768_s23 + $0x44] ss:$16 sps:$4 sm:$0xff]  }
  0x20   : > { %1385 = vmatpush3.bf16.msra.mxu0 %v1582_v14  ;;  %v1614_v41 = vld [vmem:[%s1768_s23 + $0x4c] ss:$16 sps:$4 sm:$0xff]   ;;  %v1616_v42 = vld [vmem:[%s1768_s23 + $0x40] ss:$16 sps:$4 sm:$0xff]   ;;  %v1617_v43 = vld [vmem:[%s1768_s23 + $0x48] ss:$16 sps:$4 sm:$0xff]  }
  0x21   : > { %1467 = vmatpush3.bf16.msra.mxu1 %v1583_v15  ;;  %1386 = vmatprep.subr.bf16.mxu0 %v1584_v16  ;;  %v1618_v44 = vld [vmem:[%s1768_s23 + $0x64] ss:$16 sps:$4 sm:$0xff]   ;;  %v1620_v45 = vld [vmem:[%s1768_s23 + $0x6c] ss:$16 sps:$4 sm:$0xff]   ;;  %v1622_v46 = vld [vmem:[%s1768_s23 + $0x60] ss:$16 sps:$4 sm:$0xff]  }
  0x22   : > { %1468 = vmatprep.subr.bf16.mxu1 %v1585_v17  ;;  %v1623_v47 = vld [vmem:[%s1768_s23 + $0x68] ss:$16 sps:$4 sm:$0xff]   ;;  %v1624_v48 = vld [vmem:[%s1768_s23 + $0x84] ss:$16 sps:$4 sm:$0xff]   ;;  %v1626_v49 = vld [vmem:[%s1768_s23 + $0x8c] ss:$16 sps:$4 sm:$0xff]  }
  0x23   : > { %v1628_v50 = vld [vmem:[%s1768_s23 + $0x80] ss:$16 sps:$4 sm:$0xff]   ;;  %v1629_v51 = vld [vmem:[%s1768_s23 + $0x88] ss:$16 sps:$4 sm:$0xff]   ;;  %v1630_v52 = vld [vmem:[%s1768_s23 + $0xa4] ss:$16 sps:$4 sm:$0xff]  }
  0x24   : > { %1387 = vmatpush3.bf16.msra.mxu0 %v1586_v18  ;;  %v1632_v53 = vld [vmem:[%s1768_s23 + $0xac] ss:$16 sps:$4 sm:$0xff]   ;;  %v1634_v54 = vld [vmem:[%s1768_s23 + $0xa0] ss:$16 sps:$4 sm:$0xff]   ;;  %v1635_v55 = vld [vmem:[%s1768_s23 + $0xa8] ss:$16 sps:$4 sm:$0xff]  }
  0x25   : > { %1469 = vmatpush3.bf16.msra.mxu1 %v1587_v19  ;;  %1388 = vmatprep.subr.bf16.mxu0 %v1588_v20  ;;  %v1636_v56 = vld [vmem:[%s1768_s23 + $0xc4] ss:$16 sps:$4 sm:$0xff]   ;;  %v1638_v57 = vld [vmem:[%s1768_s23 + $0xcc] ss:$16 sps:$4 sm:$0xff]   ;;  %v1640_v58 = vld [vmem:[%s1768_s23 + $0xc0] ss:$16 sps:$4 sm:$0xff]  }
  0x26   : > { %1470 = vmatprep.subr.bf16.mxu1 %v1589_v21  ;;  %v1641_v59 = vld [vmem:[%s1768_s23 + $0xc8] ss:$16 sps:$4 sm:$0xff]   ;;  %v1642_v60 = vld [vmem:[%s1768_s23 + $0xe4] ss:$16 sps:$4 sm:$0xff]   ;;  %v1644_v61 = vld [vmem:[%s1768_s23 + $0xec] ss:$16 sps:$4 sm:$0xff]  }
  0x27   : > { %v1646_v62 = vld [vmem:[%s1768_s23 + $0xe0] ss:$16 sps:$4 sm:$0xff]   ;;  %v1647_v63 = vld [vmem:[%s1768_s23 + $0xe8] ss:$16 sps:$4 sm:$0xff]   ;;  %v1648_v0 = vld [vmem:[%s1768_s23 + $0x104] ss:$16 sps:$4 sm:$0xff]  }
  0x28   : > { %1389 = vmatpush3.bf16.msra.mxu0 %v1590_v22  ;;  %v1650_v1 = vld [vmem:[%s1768_s23 + $0x10c] ss:$16 sps:$4 sm:$0xff]   ;;  %v1652_v2 = vld [vmem:[%s1768_s23 + $0x100] ss:$16 sps:$4 sm:$0xff]   ;;  %v1653_v3 = vld [vmem:[%s1768_s23 + $0x108] ss:$16 sps:$4 sm:$0xff]  }
  0x29   : > { %1471 = vmatpush3.bf16.msra.mxu1 %v1591_v23  ;;  %1390 = vmatprep.subr.bf16.mxu0 %v1592_v24  ;;  %v1654_v4 = vld [vmem:[%s1768_s23 + $0x124] ss:$16 sps:$4 sm:$0xff]   ;;  %v1656_v5 = vld [vmem:[%s1768_s23 + $0x12c] ss:$16 sps:$4 sm:$0xff]   ;;  %v1658_v8 = vld [vmem:[%s1768_s23 + $0x120] ss:$16 sps:$4 sm:$0xff]  }
  0x2a   : > { %1472 = vmatprep.subr.bf16.mxu1 %v1593_v25  ;;  %v1659_v9 = vld [vmem:[%s1768_s23 + $0x128] ss:$16 sps:$4 sm:$0xff]   ;;  %v1818_v16 = vld [vmem:[%s236_s26] ss:$0 sm:$0xff] }
  0x2c   : > { %1391 = vmatpush3.bf16.msra.mxu0 %v1594_v26 }
  0x2d   : > { %1473 = vmatpush3.bf16.msra.mxu1 %v1595_v27  ;;  %1392 = vmatprep.subr.bf16.mxu0 %v1596_v28 }
  0x2e   : > { %1474 = vmatprep.subr.bf16.mxu1 %v1597_v29 }
  0x30   : > { %1393 = vmatpush3.bf16.msra.mxu0 %v1598_v30 }
  0x31   : > { %1475 = vmatpush3.bf16.msra.mxu1 %v1599_v31 }
  0x33   : > { %800 = vmatmul.mubr.bf16.vlgmr.msra.gmra.mrb[0].mxu0 %v1600_v32 }
  0x34   : > { %920 = vmatmul.mubr.bf16.vlgmr.msra.gmra.mrb[0].mxu1 %v1603_v34  ;;  %807 = vmatprep.mubr.bf16.mxu0 %v1606_v36 }
  0x35   : > { %927 = vmatprep.mubr.bf16.mxu1 %v1608_v37 }
  0x3b   : > { %808 = vmatmul.mubr.bf16.gmra.mrb[4].mxu0 %v1610_v38 }
  0x3c   : > { %928 = vmatmul.mubr.bf16.gmra.mrb[4].mxu1 %v1611_v39  ;;  %815 = vmatprep.mubr.bf16.mxu0 %v1612_v40 }
  0x3d   : > { %935 = vmatprep.mubr.bf16.mxu1 %v1614_v41 }
  0x43   : > { %816 = vmatmul.mubr.bf16.gmra.mrb[8].mxu0 %v1616_v42 }
  0x44   : > { %936 = vmatmul.mubr.bf16.gmra.mrb[8].mxu1 %v1617_v43  ;;  %823 = vmatprep.mubr.bf16.mxu0 %v1618_v44 }
  0x45   : > { %943 = vmatprep.mubr.bf16.mxu1 %v1620_v45 }
  0x4b   : > { %824 = vmatmul.mubr.bf16.gmra.mrb[12].mxu0 %v1622_v46 }
  0x4c   : > { %944 = vmatmul.mubr.bf16.gmra.mrb[12].mxu1 %v1623_v47  ;;  %831 = vmatprep.mubr.bf16.mxu0 %v1624_v48 }
  0x4d   : > { %951 = vmatprep.mubr.bf16.mxu1 %v1626_v49 }
  0x53   : > { %832 = vmatmul.mubr.bf16.gmra.mrb[16].mxu0 %v1628_v50 }
  0x54   : > { %952 = vmatmul.mubr.bf16.gmra.mrb[16].mxu1 %v1629_v51  ;;  %839 = vmatprep.mubr.bf16.mxu0 %v1630_v52 }
  0x55   : > { %959 = vmatprep.mubr.bf16.mxu1 %v1632_v53 }
  0x5b   : > { %840 = vmatmul.mubr.bf16.gmra.mrb[20].mxu0 %v1634_v54 }
  0x5c   : > { %960 = vmatmul.mubr.bf16.gmra.mrb[20].mxu1 %v1635_v55  ;;  %847 = vmatprep.mubr.bf16.mxu0 %v1636_v56 }
  0x5d   : > { %967 = vmatprep.mubr.bf16.mxu1 %v1638_v57 }
  0x63   : > { %848 = vmatmul.mubr.bf16.gmra.mrb[24].mxu0 %v1640_v58 }
  0x64   : > { %968 = vmatmul.mubr.bf16.gmra.mrb[24].mxu1 %v1641_v59  ;;  %855 = vmatprep.mubr.bf16.mxu0 %v1642_v60 }
  0x65   : > { %975 = vmatprep.mubr.bf16.mxu1 %v1644_v61 }
  0x6b   : > { %856 = vmatmul.mubr.bf16.gmra.mrb[28].mxu0 %v1646_v62 }
  0x6c   : > { %976 = vmatmul.mubr.bf16.gmra.mrb[28].mxu1 %v1647_v63  ;;  %863 = vmatprep.mubr.bf16.mxu0 %v1648_v0 }
  0x6d   : > { %983 = vmatprep.mubr.bf16.mxu1 %v1650_v1 }
  0x73   : > { %864 = vmatmul.mubr.bf16.gmra.mrb[32].mxu0 %v1652_v2 }
  0x74   : > { %984 = vmatmul.mubr.bf16.gmra.mrb[32].mxu1 %v1653_v3  ;;  %871 = vmatprep.mubr.bf16.mxu0 %v1654_v4 }
  0x75   : > { %991 = vmatprep.mubr.bf16.mxu1 %v1656_v5 }
  0x7b   : > { %872 = vmatmul.mubr.bf16.gmra.mrb[36].mxu0 %v1658_v8 }
  0x7c   : > { %992 = vmatmul.mubr.bf16.gmra.mrb[36].mxu1 %v1659_v9  ;;  %879 = vmatprep.mubr.bf16.mxu0 %v1298_v10 }
  0x7d   : > { %999 = vmatprep.mubr.bf16.mxu1 %v1300_v11 }
  0x83   : > { %880 = vmatmul.mubr.bf16.gmra.mrb[40].mxu0 %v1297_v12 }
  0x84   : > { %1000 = vmatmul.mubr.bf16.gmra.mrb[40].mxu1 %v1299_v13 }
 0x106   : > { %v1394_v14 = vpop.f32.mrb[0].mxu0 }
 0x107   : > { %v1476_v15 = vpop.f32.mrb[0].mxu1  ;;  %v1395_v17 = vpop.f32.mrb[1].mxu0 }
 0x108   : > { %v1396_v18 = vadd.f32 %v1395_v17, %v1394_v14  ;;  %v1477_v19 = vpop.f32.mrb[1].mxu1  ;;  %v1397_v20 = vpop.f32.mrb[2].mxu0 }
 0x109   : > { %v1478_v21 = vadd.f32 %v1477_v19, %v1476_v15  ;;  %v1479_v22 = vpop.f32.mrb[2].mxu1  ;;  %v1398_v23 = vpop.f32.mrb[3].mxu0 }
 0x10a   : > { %v802_v24 = vadd.f32 %v1396_v18, %v1818_v16  ;;  %v1399_v25 = vadd.f32 %v1398_v23, %v1397_v20  ;;  %v1480_v26 = vpop.f32.mrb[3].mxu1 }
 0x10b   : > { %v1481_v27 = vadd.f32 %v1480_v26, %v1479_v22 }
 0x10c   : > { %v922_v28 = vadd.f32 %v1478_v21, %v802_v24  ;;  %v805_v29 = vadd.f32 %v1399_v25, %v1818_v16 }
 0x10e   : > { %v1007_v30 = vmax.f32 %v922_v28, 0.0  ;;  %v925_v31 = vadd.f32 %v1481_v27, %v805_v29  ;;  %v1400_v32 = vpop.f32.mrb[4].mxu0 }
 0x10f   : > { %v1482_v33 = vpop.f32.mrb[4].mxu1  ;;  %v1401_v34 = vpop.f32.mrb[5].mxu0 }
 0x110   : > { %v1357_v35 = vpack.c.bf16 %v1007_v30, %v1007_v30  ;;  %v1008_v36 = vmax.f32 %v925_v31, 0.0  ;;  %v1402_v37 = vadd.f32 %v1401_v34, %v1400_v32  ;;  %v1483_v38 = vpop.f32.mrb[5].mxu1  ;;  %v1403_v39 = vpop.f32.mrb[6].mxu0 }
 0x111   : > { %v1484_v40 = vadd.f32 %v1483_v38, %v1482_v33  ;;  %v1485_v41 = vpop.f32.mrb[6].mxu1  ;;  %v1404_v42 = vpop.f32.mrb[7].mxu0 }
 0x112   : > { %1114 = vst.msk [vmem:[%s1826_s30] sm:$0xf] %vm1113_vm0, %v1357_v35  ;;  %v1358_v43 = vpack.c.bf16 %v1008_v36, %v1008_v36  ;;  %v810_v44 = vadd.f32 %v1402_v37, %v1818_v16  ;;  %v1405_v45 = vadd.f32 %v1404_v42, %v1403_v39  ;;  %v1486_v46 = vpop.f32.mrb[7].mxu1 }
 0x113   : > { %v1487_v47 = vadd.f32 %v1486_v46, %v1485_v41 }
 0x114   : > { %1115 = vst.msk [vmem:[%s1826_s30 + $0x4] sm:$0xf] %vm1113_vm0, %v1358_v43  ;;  %v930_v48 = vadd.f32 %v1484_v40, %v810_v44  ;;  %v813_v49 = vadd.f32 %v1405_v45, %v1818_v16 }
 0x116   : > { %v1009_v50 = vmax.f32 %v930_v48, 0.0  ;;  %v933_v51 = vadd.f32 %v1487_v47, %v813_v49  ;;  %v1406_v52 = vpop.f32.mrb[8].mxu0 }
 0x117   : > { %v1488_v53 = vpop.f32.mrb[8].mxu1  ;;  %v1407_v54 = vpop.f32.mrb[9].mxu0 }
 0x118   : > { %v1359_v55 = vpack.c.bf16 %v1009_v50, %v1009_v50  ;;  %v1010_v56 = vmax.f32 %v933_v51, 0.0  ;;  %v1408_v57 = vadd.f32 %v1407_v54, %v1406_v52  ;;  %v1489_v58 = vpop.f32.mrb[9].mxu1  ;;  %v1409_v59 = vpop.f32.mrb[10].mxu0 }
 0x119   : > { %v1490_v60 = vadd.f32 %v1489_v58, %v1488_v53  ;;  %v1491_v61 = vpop.f32.mrb[10].mxu1  ;;  %v1410_v62 = vpop.f32.mrb[11].mxu0 }
 0x11a   : > { %1116 = vst.msk [vmem:[%s1826_s30 + $0x8] sm:$0xf] %vm1113_vm0, %v1359_v55  ;;  %v1360_v63 = vpack.c.bf16 %v1010_v56, %v1010_v56  ;;  %v818_v0 = vadd.f32 %v1408_v57, %v1818_v16  ;;  %v1411_v1 = vadd.f32 %v1410_v62, %v1409_v59  ;;  %v1492_v2 = vpop.f32.mrb[11].mxu1 }
 0x11b   : > { %v1493_v3 = vadd.f32 %v1492_v2, %v1491_v61 }
 0x11c   : > { %1117 = vst.msk [vmem:[%s1826_s30 + $0xc] sm:$0xf] %vm1113_vm0, %v1360_v63  ;;  %v938_v4 = vadd.f32 %v1490_v60, %v818_v0  ;;  %v821_v5 = vadd.f32 %v1411_v1, %v1818_v16 }
 0x11e   : > { %v1011_v6 = vmax.f32 %v938_v4, 0.0  ;;  %v941_v7 = vadd.f32 %v1493_v3, %v821_v5  ;;  %v1412_v8 = vpop.f32.mrb[12].mxu0 }
 0x11f   : > { %v1494_v9 = vpop.f32.mrb[12].mxu1  ;;  %v1413_v10 = vpop.f32.mrb[13].mxu0 }
 0x120   : > { %v1361_v11 = vpack.c.bf16 %v1011_v6, %v1011_v6  ;;  %v1012_v12 = vmax.f32 %v941_v7, 0.0  ;;  %v1414_v13 = vadd.f32 %v1413_v10, %v1412_v8  ;;  %v1495_v14 = vpop.f32.mrb[13].mxu1  ;;  %v1415_v15 = vpop.f32.mrb[14].mxu0 }
 0x121   : > { %v1496_v17 = vadd.f32 %v1495_v14, %v1494_v9  ;;  %v1497_v18 = vpop.f32.mrb[14].mxu1  ;;  %v1416_v19 = vpop.f32.mrb[15].mxu0 }
 0x122   : > { %1118 = vst.msk [vmem:[%s1826_s30 + $0x10] sm:$0xf] %vm1113_vm0, %v1361_v11  ;;  %v1362_v20 = vpack.c.bf16 %v1012_v12, %v1012_v12  ;;  %v826_v21 = vadd.f32 %v1414_v13, %v1818_v16  ;;  %v1417_v22 = vadd.f32 %v1416_v19, %v1415_v15  ;;  %v1498_v23 = vpop.f32.mrb[15].mxu1 }
 0x123   : > { %v1499_v24 = vadd.f32 %v1498_v23, %v1497_v18 }
 0x124   : > { %1119 = vst.msk [vmem:[%s1826_s30 + $0x14] sm:$0xf] %vm1113_vm0, %v1362_v20  ;;  %v946_v25 = vadd.f32 %v1496_v17, %v826_v21  ;;  %v829_v26 = vadd.f32 %v1417_v22, %v1818_v16 }
 0x126   : > { %v1013_v27 = vmax.f32 %v946_v25, 0.0  ;;  %v949_v28 = vadd.f32 %v1499_v24, %v829_v26  ;;  %v1418_v29 = vpop.f32.mrb[16].mxu0 }
 0x127   : > { %v1500_v30 = vpop.f32.mrb[16].mxu1  ;;  %v1419_v31 = vpop.f32.mrb[17].mxu0 }
 0x128   : > { %v1363_v32 = vpack.c.bf16 %v1013_v27, %v1013_v27  ;;  %v1014_v33 = vmax.f32 %v949_v28, 0.0  ;;  %v1420_v34 = vadd.f32 %v1419_v31, %v1418_v29  ;;  %v1501_v35 = vpop.f32.mrb[17].mxu1  ;;  %v1421_v36 = vpop.f32.mrb[18].mxu0 }
 0x129   : > { %v1502_v37 = vadd.f32 %v1501_v35, %v1500_v30  ;;  %v1503_v38 = vpop.f32.mrb[18].mxu1  ;;  %v1422_v39 = vpop.f32.mrb[19].mxu0 }
 0x12a   : > { %1120 = vst.msk [vmem:[%s1826_s30 + $0x18] sm:$0xf] %vm1113_vm0, %v1363_v32  ;;  %v1364_v40 = vpack.c.bf16 %v1014_v33, %v1014_v33  ;;  %v834_v41 = vadd.f32 %v1420_v34, %v1818_v16  ;;  %v1423_v42 = vadd.f32 %v1422_v39, %v1421_v36  ;;  %v1504_v43 = vpop.f32.mrb[19].mxu1 }
 0x12b   : > { %v1505_v44 = vadd.f32 %v1504_v43, %v1503_v38 }
 0x12c   : > { %1121 = vst.msk [vmem:[%s1826_s30 + $0x1c] sm:$0xf] %vm1113_vm0, %v1364_v40  ;;  %v954_v45 = vadd.f32 %v1502_v37, %v834_v41  ;;  %v837_v46 = vadd.f32 %v1423_v42, %v1818_v16 }
 0x12e   : > { %v1015_v47 = vmax.f32 %v954_v45, 0.0  ;;  %v957_v48 = vadd.f32 %v1505_v44, %v837_v46  ;;  %v1424_v49 = vpop.f32.mrb[20].mxu0 }
 0x12f   : > { %v1506_v50 = vpop.f32.mrb[20].mxu1  ;;  %v1425_v51 = vpop.f32.mrb[21].mxu0 }
 0x130   : > { %v1365_v52 = vpack.c.bf16 %v1015_v47, %v1015_v47  ;;  %v1016_v53 = vmax.f32 %v957_v48, 0.0  ;;  %v1426_v54 = vadd.f32 %v1425_v51, %v1424_v49  ;;  %v1507_v55 = vpop.f32.mrb[21].mxu1  ;;  %v1427_v56 = vpop.f32.mrb[22].mxu0 }
 0x131   : > { %v1508_v57 = vadd.f32 %v1507_v55, %v1506_v50  ;;  %v1509_v58 = vpop.f32.mrb[22].mxu1  ;;  %v1428_v59 = vpop.f32.mrb[23].mxu0 }
 0x132   : > { %1122 = vst.msk [vmem:[%s1826_s30 + $0x20] sm:$0xf] %vm1113_vm0, %v1365_v52  ;;  %v1366_v60 = vpack.c.bf16 %v1016_v53, %v1016_v53  ;;  %v842_v61 = vadd.f32 %v1426_v54, %v1818_v16  ;;  %v1429_v62 = vadd.f32 %v1428_v59, %v1427_v56  ;;  %v1510_v63 = vpop.f32.mrb[23].mxu1 }
 0x133   : > { %v1511_v0 = vadd.f32 %v1510_v63, %v1509_v58 }
 0x134   : > { %1123 = vst.msk [vmem:[%s1826_s30 + $0x24] sm:$0xf] %vm1113_vm0, %v1366_v60  ;;  %v962_v1 = vadd.f32 %v1508_v57, %v842_v61  ;;  %v845_v2 = vadd.f32 %v1429_v62, %v1818_v16 }
 0x136   : > { %v1017_v3 = vmax.f32 %v962_v1, 0.0  ;;  %v965_v4 = vadd.f32 %v1511_v0, %v845_v2  ;;  %v1430_v5 = vpop.f32.mrb[24].mxu0 }
 0x137   : > { %v1512_v6 = vpop.f32.mrb[24].mxu1  ;;  %v1431_v7 = vpop.f32.mrb[25].mxu0 }
 0x138   : > { %v1367_v8 = vpack.c.bf16 %v1017_v3, %v1017_v3  ;;  %v1018_v9 = vmax.f32 %v965_v4, 0.0  ;;  %v1432_v10 = vadd.f32 %v1431_v7, %v1430_v5  ;;  %v1513_v11 = vpop.f32.mrb[25].mxu1  ;;  %v1433_v12 = vpop.f32.mrb[26].mxu0 }
 0x139   : > { %v1514_v13 = vadd.f32 %v1513_v11, %v1512_v6  ;;  %v1515_v14 = vpop.f32.mrb[26].mxu1  ;;  %v1434_v15 = vpop.f32.mrb[27].mxu0 }
 0x13a   : > { %1124 = vst.msk [vmem:[%s1826_s30 + $0x28] sm:$0xf] %vm1113_vm0, %v1367_v8  ;;  %v1368_v17 = vpack.c.bf16 %v1018_v9, %v1018_v9  ;;  %v850_v18 = vadd.f32 %v1432_v10, %v1818_v16  ;;  %v1435_v19 = vadd.f32 %v1434_v15, %v1433_v12  ;;  %v1516_v20 = vpop.f32.mrb[27].mxu1 }
 0x13b   : > { %v1517_v21 = vadd.f32 %v1516_v20, %v1515_v14 }
 0x13c   : > { %1125 = vst.msk [vmem:[%s1826_s30 + $0x2c] sm:$0xf] %vm1113_vm0, %v1368_v17  ;;  %v970_v22 = vadd.f32 %v1514_v13, %v850_v18  ;;  %v853_v23 = vadd.f32 %v1435_v19, %v1818_v16 }
 0x13e   : > { %v1019_v24 = vmax.f32 %v970_v22, 0.0  ;;  %v973_v25 = vadd.f32 %v1517_v21, %v853_v23  ;;  %v1436_v26 = vpop.f32.mrb[28].mxu0 }
 0x13f   : > { %v1518_v27 = vpop.f32.mrb[28].mxu1  ;;  %v1437_v28 = vpop.f32.mrb[29].mxu0 }
 0x140   : > { %v1369_v29 = vpack.c.bf16 %v1019_v24, %v1019_v24  ;;  %v1020_v30 = vmax.f32 %v973_v25, 0.0  ;;  %v1438_v31 = vadd.f32 %v1437_v28, %v1436_v26  ;;  %v1519_v32 = vpop.f32.mrb[29].mxu1  ;;  %v1439_v33 = vpop.f32.mrb[30].mxu0 }
 0x141   : > { %v1520_v34 = vadd.f32 %v1519_v32, %v1518_v27  ;;  %v1521_v35 = vpop.f32.mrb[30].mxu1  ;;  %v1440_v36 = vpop.f32.mrb[31].mxu0 }
 0x142   : > { %1126 = vst.msk [vmem:[%s1826_s30 + $0x30] sm:$0xf] %vm1113_vm0, %v1369_v29  ;;  %v1370_v37 = vpack.c.bf16 %v1020_v30, %v1020_v30  ;;  %v858_v38 = vadd.f32 %v1438_v31, %v1818_v16  ;;  %v1441_v39 = vadd.f32 %v1440_v36, %v1439_v33  ;;  %v1522_v40 = vpop.f32.mrb[31].mxu1 }
 0x143   : > { %v1523_v41 = vadd.f32 %v1522_v40, %v1521_v35 }
 0x144   : > { %1127 = vst.msk [vmem:[%s1826_s30 + $0x34] sm:$0xf] %vm1113_vm0, %v1370_v37  ;;  %v978_v42 = vadd.f32 %v1520_v34, %v858_v38  ;;  %v861_v43 = vadd.f32 %v1441_v39, %v1818_v16 }
 0x146   : > { %v1021_v44 = vmax.f32 %v978_v42, 0.0  ;;  %v981_v45 = vadd.f32 %v1523_v41, %v861_v43  ;;  %v1442_v46 = vpop.f32.mrb[32].mxu0 }
 0x147   : > { %v1524_v47 = vpop.f32.mrb[32].mxu1  ;;  %v1443_v48 = vpop.f32.mrb[33].mxu0 }
 0x148   : > { %v1371_v49 = vpack.c.bf16 %v1021_v44, %v1021_v44  ;;  %v1022_v50 = vmax.f32 %v981_v45, 0.0  ;;  %v1444_v51 = vadd.f32 %v1443_v48, %v1442_v46  ;;  %v1525_v52 = vpop.f32.mrb[33].mxu1  ;;  %v1445_v53 = vpop.f32.mrb[34].mxu0 }
 0x149   : > { %v1526_v54 = vadd.f32 %v1525_v52, %v1524_v47  ;;  %v1527_v55 = vpop.f32.mrb[34].mxu1  ;;  %v1446_v56 = vpop.f32.mrb[35].mxu0 }
 0x14a   : > { %1128 = vst.msk [vmem:[%s1826_s30 + $0x38] sm:$0xf] %vm1113_vm0, %v1371_v49  ;;  %v1372_v57 = vpack.c.bf16 %v1022_v50, %v1022_v50  ;;  %v866_v58 = vadd.f32 %v1444_v51, %v1818_v16  ;;  %v1447_v59 = vadd.f32 %v1446_v56, %v1445_v53  ;;  %v1528_v60 = vpop.f32.mrb[35].mxu1 }
 0x14b   : > { %v1529_v61 = vadd.f32 %v1528_v60, %v1527_v55 }
 0x14c   : > { %1129 = vst.msk [vmem:[%s1826_s30 + $0x3c] sm:$0xf] %vm1113_vm0, %v1372_v57  ;;  %v986_v62 = vadd.f32 %v1526_v54, %v866_v58  ;;  %v869_v63 = vadd.f32 %v1447_v59, %v1818_v16 }
 0x14e   : > { %v1023_v0 = vmax.f32 %v986_v62, 0.0  ;;  %v989_v1 = vadd.f32 %v1529_v61, %v869_v63  ;;  %v1448_v2 = vpop.f32.mrb[36].mxu0 }
 0x14f   : > { %v1530_v3 = vpop.f32.mrb[36].mxu1  ;;  %v1449_v4 = vpop.f32.mrb[37].mxu0 }
 0x150   : > { %v1373_v5 = vpack.c.bf16 %v1023_v0, %v1023_v0  ;;  %v1024_v6 = vmax.f32 %v989_v1, 0.0  ;;  %v1450_v7 = vadd.f32 %v1449_v4, %v1448_v2  ;;  %v1531_v8 = vpop.f32.mrb[37].mxu1  ;;  %v1451_v9 = vpop.f32.mrb[38].mxu0 }
 0x151   : > { %v1532_v10 = vadd.f32 %v1531_v8, %v1530_v3  ;;  %v1533_v11 = vpop.f32.mrb[38].mxu1  ;;  %v1452_v12 = vpop.f32.mrb[39].mxu0 }
 0x152   : > { %1130 = vst.msk [vmem:[%s1826_s30 + $0x40] sm:$0xf] %vm1113_vm0, %v1373_v5  ;;  %v1374_v13 = vpack.c.bf16 %v1024_v6, %v1024_v6  ;;  %v874_v14 = vadd.f32 %v1450_v7, %v1818_v16  ;;  %v1453_v15 = vadd.f32 %v1452_v12, %v1451_v9  ;;  %v1534_v17 = vpop.f32.mrb[39].mxu1 }
 0x153   : > { %v1535_v18 = vadd.f32 %v1534_v17, %v1533_v11 }
 0x154   : > { %1131 = vst.msk [vmem:[%s1826_s30 + $0x44] sm:$0xf] %vm1113_vm0, %v1374_v13  ;;  %v994_v19 = vadd.f32 %v1532_v10, %v874_v14  ;;  %v877_v20 = vadd.f32 %v1453_v15, %v1818_v16 }
 0x156   : > { %v1025_v21 = vmax.f32 %v994_v19, 0.0  ;;  %v997_v22 = vadd.f32 %v1535_v18, %v877_v20  ;;  %v1454_v23 = vpop.f32.mrb[40].mxu0 }
 0x157   : > { %v1536_v24 = vpop.f32.mrb[40].mxu1  ;;  %v1455_v25 = vpop.f32.mrb[41].mxu0 }
 0x158   : > { %v1375_v26 = vpack.c.bf16 %v1025_v21, %v1025_v21  ;;  %v1026_v27 = vmax.f32 %v997_v22, 0.0  ;;  %v1456_v28 = vadd.f32 %v1455_v25, %v1454_v23  ;;  %v1537_v29 = vpop.f32.mrb[41].mxu1  ;;  %v1457_v30 = vpop.f32.mrb[42].mxu0 }
 0x159   : > { %v1538_v31 = vadd.f32 %v1537_v29, %v1536_v24  ;;  %v1539_v32 = vpop.f32.mrb[42].mxu1  ;;  %v1458_v33 = vpop.f32.mrb[43].mxu0 }
 0x15a   : > { %1132 = vst.msk [vmem:[%s1826_s30 + $0x48] sm:$0xf] %vm1113_vm0, %v1375_v26  ;;  %v1376_v34 = vpack.c.bf16 %v1026_v27, %v1026_v27  ;;  %v882_v35 = vadd.f32 %v1456_v28, %v1818_v16  ;;  %v1540_v36 = vpop.f32.mrb[43].mxu1 }
 0x15c   : > { %1133 = vst.msk [vmem:[%s1826_s30 + $0x4c] sm:$0xf] %vm1113_vm0, %v1376_v34  ;;  %v1002_v37 = vadd.f32 %v1538_v31, %v882_v35 }
 0x15e   : > { %v1027_v38 = vmax.f32 %v1002_v37, 0.0 }
 0x160   : > { %v1377_v39 = vpack.c.bf16 %v1027_v38, %v1027_v38 }
 0x162   : > { %1135 = vst.msk [vmem:[%s1826_s30 + $0x50] sm:$0x1] %vm1134_vm1, %v1377_v39 }
 0x163 PF: > { %s13_s14 = sadd.s32 1, %s1686_s14   ;;  %s1901_s12 = smov %s1682_s13 }
 0x164   : > { %p10_p5 = scmp.ge.s32.totalorder %s13_s14, 4   ;;  %s1902_s13 = smov %s1904_s15 }
 0x166   :  { %12 = sbr.rel (!%p10_p5) target bundleno = 2 (0x2), region = 68 }

// kernel: conv_actor_critic_forward.6
= control target key start
LH: loop header
LB: loop body
LE: loop exit
PB: predicated region body
PF: predicated region fallthrough
CT: control target
= control target key end

     0   :  { %s1671_s12 = smov 0   ;;  %s1673_s13 = smov 0   ;;  %s1884_s0 = inlined_call_operand.vmem [shape: bf16[2,98,576], index: 0, kind: input, shape index: {}]   ;;  %s1885_s1 = inlined_call_operand.vmem [shape: bf16[2,576,64], index: 1, kind: input, shape index: {}]   ;;  %s1886_s2 = inlined_call_operand.vmem [shape: f32[2,1,64], index: 2, kind: input, shape index: {}]   ;;  %s1887_s3 = inlined_call_operand.vmem [shape: bf16[2,98,64], index: 3, kind: output, shape index: {}]  }
   0x1   :  { %s1675_s14 = smov 0  }
   0x2 LB: > { %s25_s15 = sadd.s32 1, %s1643_s13  ;;  %p1231_p0 = scmp.ge.s32.totalorder %s1647_s14, 1  ;;  %s1647_s14 = sphi %s1675_s14, %s13_s14   ;;  %s1643_s13 = sphi %s1673_s13, %s1889_s13   ;;  %s1639_s12 = sphi %s1671_s12, %s1888_s12  }
   0x3   : > { %p27_p1 = scmp.ge.s32.totalorder %s25_s15, 2  ;;  %p177_p2 = scmp.lt.s32.totalorder %s1647_s14, 3 }
   0x5   : > { %s1891_s15 = smov (%p27_p1, %s25_s15), 0  ;;  %p178_p3 = pnand %p1231_p0, %p177_p2 }
   0x6   : > { %p219_p4 = scmp.lt.s32.totalorder (!%p178_p3), %s1639_s12, 1  ;;  %v1649_v34 = vmov (!%p178_p3), 0.0   ;;  %vm1650_vm0 = vmmov (!%p178_p3), 0   ;;  %vm749_vm1 = vcmask (!%p178_p3), 523264   ;;  %vm1101_vm2 = vcmask (!%p178_p3), 519168  }
   0x7   : > { %181 = sbr.rel (%p178_p3) target bundleno = 353 (0x161), region = 32  ;;  %vm1114_vm3 = vcmask (!%p178_p3), 516096  }
   0xe   : > { %s1893_s12 = smov (!%p219_p4, %s1639_s12), 1 }
   0xf   : > { %s1514_s16 = smul.u32 288, %s1893_s12  ;;  %s236_s26 = scalar_lea.vmem %s1886_s2, %s1893_s12 }
  0x10   : > { %s1513_s20 = smul.u32 260, %s1893_s12 }
  0x11   : > { %s1695_s19 = scalar_lea.vmem %s1885_s1, %s1514_s16  ;;  %s1515_s27 = smul.u32 52, %s1893_s12 }
  0x12   : > { %v1542_v0 = vld [vmem:[%s1695_s19 + $0x40] sm:$0xff]   ;;  %v1546_v4 = vld [vmem:[%s1695_s19 + $0x48] sm:$0xff]   ;;  %v1550_v8 = vld [vmem:[%s1695_s19 + $0x50] sm:$0xff]   ;;  %s1731_s23 = scalar_lea.vmem %s1884_s0, %s1513_s20 }
  0x13   : > { %v1543_v1 = vld [vmem:[%s1695_s19 + $0xc0] sm:$0xff]   ;;  %1342 = vmatprep.subr.bf16.mxu0 %v1542_v0  ;;  %v1547_v5 = vld [vmem:[%s1695_s19 + $0xc8] sm:$0xff]   ;;  %v1551_v9 = vld [vmem:[%s1695_s19 + $0xd0] sm:$0xff]   ;;  %s1842_s30 = scalar_lea.vmem %s1887_s3, %s1515_s27 }
  0x14   : > { %v1544_v2 = vld [vmem:[%s1695_s19] sm:$0xff]   ;;  %1400 = vmatprep.subr.bf16.mxu1 %v1543_v1  ;;  %v1548_v6 = vld [vmem:[%s1695_s19 + $0x8] sm:$0xff]   ;;  %v1552_v10 = vld [vmem:[%s1695_s19 + $0x10] sm:$0xff]  }
  0x15   : > { %v1545_v3 = vld [vmem:[%s1695_s19 + $0x80] sm:$0xff]   ;;  %1343 = vmatpush3.bf16.msra.mxu0 %v1544_v2  ;;  %v1549_v7 = vld [vmem:[%s1695_s19 + $0x88] sm:$0xff]   ;;  %v1553_v11 = vld [vmem:[%s1695_s19 + $0x90] sm:$0xff]  }
  0x16   : > { %1401 = vmatpush3.bf16.msra.mxu1 %v1545_v3  ;;  %1344 = vmatprep.subr.bf16.mxu0 %v1546_v4  ;;  %v1554_v12 = vld [vmem:[%s1695_s19 + $0x58] sm:$0xff]   ;;  %v1558_v16 = vld [vmem:[%s1695_s19 + $0x60] sm:$0xff]   ;;  %v1562_v20 = vld [vmem:[%s1695_s19 + $0x68] sm:$0xff]  }
  0x17   : > { %1402 = vmatprep.subr.bf16.mxu1 %v1547_v5  ;;  %v1555_v13 = vld [vmem:[%s1695_s19 + $0xd8] sm:$0xff]   ;;  %v1559_v17 = vld [vmem:[%s1695_s19 + $0xe0] sm:$0xff]   ;;  %v1563_v21 = vld [vmem:[%s1695_s19 + $0xe8] sm:$0xff]  }
  0x18   : > { %v1556_v14 = vld [vmem:[%s1695_s19 + $0x18] sm:$0xff]   ;;  %v1560_v18 = vld [vmem:[%s1695_s19 + $0x20] sm:$0xff]   ;;  %v1564_v22 = vld [vmem:[%s1695_s19 + $0x28] sm:$0xff]  }
  0x19   : > { %1345 = vmatpush3.bf16.msra.mxu0 %v1548_v6  ;;  %v1557_v15 = vld [vmem:[%s1695_s19 + $0x98] sm:$0xff]   ;;  %v1561_v19 = vld [vmem:[%s1695_s19 + $0xa0] sm:$0xff]   ;;  %v1565_v23 = vld [vmem:[%s1695_s19 + $0xa8] sm:$0xff]  }
  0x1a   : > { %1403 = vmatpush3.bf16.msra.mxu1 %v1549_v7  ;;  %1346 = vmatprep.subr.bf16.mxu0 %v1550_v8  ;;  %v1566_v24 = vld [vmem:[%s1695_s19 + $0x70] sm:$0xff]   ;;  %v1570_v28 = vld [vmem:[%s1695_s19 + $0x78] sm:$0xff]   ;;  %v1579_v36 = vld [vmem:[%s1731_s23 + $0xc] ss:$20 sps:$4 sm:$0xff]  }
  0x1b   : > { %1404 = vmatprep.subr.bf16.mxu1 %v1551_v9  ;;  %v1567_v25 = vld [vmem:[%s1695_s19 + $0xf0] sm:$0xff]   ;;  %v1571_v29 = vld [vmem:[%s1695_s19 + $0xf8] sm:$0xff]   ;;  %v1580_v37 = vld [vmem:[%s1695_s19 + $0x100] sm:$0xff]   ;;  %891 = vmatprep.mubr.bf16.mxu1 %v1579_v36 }
  0x1c   : > { %v1568_v26 = vld [vmem:[%s1695_s19 + $0x30] sm:$0xff]   ;;  %v1572_v30 = vld [vmem:[%s1695_s19 + $0x38] sm:$0xff]   ;;  %v1581_v38 = vld [vmem:[%s1731_s23 + $0x2c] ss:$20 sps:$4 sm:$0xff]  }
  0x1d   : > { %1347 = vmatpush3.bf16.msra.mxu0 %v1552_v10  ;;  %v1569_v27 = vld [vmem:[%s1695_s19 + $0xb0] sm:$0xff]   ;;  %v1573_v31 = vld [vmem:[%s1695_s19 + $0xb8] sm:$0xff]   ;;  %v1591_v43 = vld [vmem:[%s1695_s19 + $0x108] sm:$0xff]  }
  0x1e   : > { %1405 = vmatpush3.bf16.msra.mxu1 %v1553_v11  ;;  %1348 = vmatprep.subr.bf16.mxu0 %v1554_v12  ;;  %v1574_v32 = vld [vmem:[%s1731_s23] ss:$20 sps:$4 sm:$0xff]   ;;  %v1576_v33 = vld [vmem:[%s1731_s23 + $0x4] ss:$20 sps:$4 sm:$0xff]   ;;  %v1577_v35 = vld [vmem:[%s1731_s23 + $0x8] ss:$20 sps:$4 sm:$0xff]  }
  0x1f   : > { %1406 = vmatprep.subr.bf16.mxu1 %v1555_v13  ;;  %803 = vmatprep.mubr.bf16.mxu0 %v1576_v33  ;;  %v1583_v39 = vld [vmem:[%s1731_s23 + $0x34] ss:$20 sps:$4 sm:$0xff]   ;;  %v1586_v41 = vld [vmem:[%s1731_s23 + $0x30] ss:$20 sps:$4 sm:$0xff]   ;;  %v1593_v47 = vld [vmem:[%s1731_s23 + $0x58] ss:$20 sps:$4 sm:$0xff]  }
  0x20   : > { %v1585_v40 = vld [vmem:[%s1731_s23 + $0x28] ss:$20 sps:$4 sm:$0xff]   ;;  %v1600_v45 = vld [vmem:[%s1695_s19 + $0x110] sm:$0xff]   ;;  %v1596_v49 = vld [vmem:[%s1731_s23 + $0x84] ss:$20 sps:$4 sm:$0xff]  }
  0x21   : > { %1349 = vmatpush3.bf16.msra.mxu0 %v1556_v14  ;;  %v1587_v42 = vld [vmem:[%s1731_s23 + $0x54] ss:$20 sps:$4 sm:$0xff]   ;;  %v1589_v44 = vld [vmem:[%s1731_s23 + $0x5c] ss:$20 sps:$4 sm:$0xff]   ;;  %v1598_v51 = vld [vmem:[%s1731_s23 + $0x78] ss:$20 sps:$4 sm:$0xff]  }
  0x22   : > { %1407 = vmatpush3.bf16.msra.mxu1 %v1557_v15  ;;  %1350 = vmatprep.subr.bf16.mxu0 %v1558_v16  ;;  %v1592_v46 = vld [vmem:[%s1731_s23 + $0x50] ss:$20 sps:$4 sm:$0xff]   ;;  %v1613_v50 = vld [vmem:[%s1695_s19 + $0x118] sm:$0xff]   ;;  %v1599_v52 = vld [vmem:[%s1731_s23 + $0x80] ss:$20 sps:$4 sm:$0xff]  }
  0x23   : > { %1408 = vmatprep.subr.bf16.mxu1 %v1559_v17  ;;  %v1594_v48 = vld [vmem:[%s1731_s23 + $0x7c] ss:$20 sps:$4 sm:$0xff]   ;;  %v1601_v53 = vld [vmem:[%s1731_s23 + $0xa4] ss:$20 sps:$4 sm:$0xff]   ;;  %v1603_v54 = vld [vmem:[%s1731_s23 + $0xac] ss:$20 sps:$4 sm:$0xff]  }
  0x24   : > { %v1605_v55 = vld [vmem:[%s1731_s23 + $0xa0] ss:$20 sps:$4 sm:$0xff]   ;;  %v1606_v56 = vld [vmem:[%s1731_s23 + $0xa8] ss:$20 sps:$4 sm:$0xff]   ;;  %v1612_v62 = vld [vmem:[%s1731_s23 + $0xd0] ss:$20 sps:$4 sm:$0xff]  }
  0x25   : > { %1351 = vmatpush3.bf16.msra.mxu0 %v1560_v18  ;;  %v1607_v57 = vld [vmem:[%s1731_s23 + $0xcc] ss:$20 sps:$4 sm:$0xff]   ;;  %v1609_v58 = vld [vmem:[%s1731_s23 + $0xd4] ss:$20 sps:$4 sm:$0xff]   ;;  %v285_v60 = vld [vmem:[%s1731_s23 + $0xf8] sm:$0x11] }
  0x26   : > { %1409 = vmatpush3.bf16.msra.mxu1 %v1561_v19  ;;  %1352 = vmatprep.subr.bf16.mxu0 %v1562_v20  ;;  %v284_v59 = vld [vmem:[%s1731_s23 + $0xf0] sm:$0x11]  ;;  %v1611_v61 = vld [vmem:[%s1731_s23 + $0xc8] ss:$20 sps:$4 sm:$0xff]   ;;  %v1269_v0 = vcombine.high %v285_v60, %v285_v60  ;;  %v1268_v2 = vcombine.low %v285_v60, %v285_v60  ;;  %v1620_v5 = vld [vmem:[%s1731_s23 + $0x38] ss:$20 sps:$4 sm:$0xff]  }
  0x27   : > { %1410 = vmatprep.subr.bf16.mxu1 %v1563_v21  ;;  %v1267_v63 = vcombine.high %v284_v59, %v284_v59  ;;  %v1266_v1 = vcombine.low %v284_v59, %v284_v59  ;;  %v1618_v3 = vld [vmem:[%s1731_s23 + $0x10] ss:$20 sps:$4 sm:$0xff]   ;;  %v1621_v6 = vld [vmem:[%s1731_s23 + $0xd8] ss:$20 sps:$4 sm:$0xff]   ;;  %v1622_v7 = vld [vmem:[%s1731_s23 + $0x60] ss:$20 sps:$4 sm:$0xff]  }
  0x28   : > { %v1619_v4 = vld [vmem:[%s1731_s23 + $0xb0] ss:$20 sps:$4 sm:$0xff]   ;;  %v1623_v8 = vld [vmem:[%s1731_s23 + $0x100] ss:$0 sps:$4 sm:$0x11]  }
  0x29   : > { %1353 = vmatpush3.bf16.msra.mxu0 %v1564_v22  ;;  %v1624_v9 = vld [vmem:[%s1731_s23 + $0x88] ss:$20 sps:$4 sm:$0xff]   ;;  %v1805_v11 = vld [vmem:[%s236_s26] ss:$0 sm:$0xff] }
  0x2a   : > { %1411 = vmatpush3.bf16.msra.mxu1 %v1565_v23  ;;  %1354 = vmatprep.subr.bf16.mxu0 %v1566_v24 }
  0x2b   : > { %1412 = vmatprep.subr.bf16.mxu1 %v1567_v25 }
  0x2d   : > { %1355 = vmatpush3.bf16.msra.mxu0 %v1568_v26 }
  0x2e   : > { %1413 = vmatpush3.bf16.msra.mxu1 %v1569_v27  ;;  %1356 = vmatprep.subr.bf16.mxu0 %v1570_v28 }
  0x2f   : > { %1414 = vmatprep.subr.bf16.mxu1 %v1571_v29 }
  0x31   : > { %1357 = vmatpush3.bf16.msra.mxu0 %v1572_v30 }
  0x32   : > { %1415 = vmatpush3.bf16.msra.mxu1 %v1573_v31  ;;  %1469 = vmatprep.subr.bf16.mxu0 %v1649_v34 }
  0x33   : > { %1505 = vmatprep.subr.bf16.mxu1 %v1649_v34 }
  0x34   : > { %804 = vmatmul.mubr.bf16.vlgmr.msra.gmra.mrb[0].mxu0 %v1574_v32 }
  0x35   : > { %892 = vmatmul.mubr.bf16.vlgmr.msra.gmra.mrb[0].mxu1 %v1577_v35  ;;  %1470 = vmatpush3.bf16.msra.mxu0 %v1580_v37 }
  0x36   : > { %811 = vmatprep.mubr.bf16.mxu0 %v1581_v38  ;;  %1509 = vmatpush3.bf16.msra.mxu1 %v1580_v37 }
  0x37   : > { %899 = vmatprep.mubr.bf16.mxu1 %v1583_v39  ;;  %1471 = vmatprep.subr.bf16.mxu0 %v1649_v34 }
  0x38   : > { %1506 = vmatprep.subr.bf16.mxu1 %v1649_v34 }
  0x39   : > { %1472 = vmatpush3.bf16.msra.mxu0 %v1591_v43 }
  0x3a   : > { %1510 = vmatpush3.bf16.msra.mxu1 %v1591_v43  ;;  %1473 = vmatprep.subr.bf16.mxu0 %v1649_v34 }
  0x3b   : > { %1507 = vmatprep.subr.bf16.mxu1 %v1649_v34 }
  0x3c   : > { %812 = vmatmul.mubr.bf16.gmra.mrb[4].mxu0 %v1585_v40 }
  0x3d   : > { %900 = vmatmul.mubr.bf16.gmra.mrb[4].mxu1 %v1586_v41  ;;  %819 = vmatprep.mubr.bf16.mxu0 %v1587_v42 }
  0x3e   : > { %907 = vmatprep.mubr.bf16.mxu1 %v1589_v44  ;;  %1474 = vmatpush3.bf16.msra.mxu0 %v1600_v45 }
  0x3f   : > { %1511 = vmatpush3.bf16.msra.mxu1 %v1600_v45  ;;  %1475 = vmatprep.subr.bf16.mxu0 %v1649_v34 }
  0x40   : > { %1508 = vmatprep.subr.bf16.mxu1 %v1649_v34 }
  0x42   : > { %1476 = vmatpush3.bf16.msra.mxu0 %v1613_v50 }
  0x43   : > { %1512 = vmatpush3.bf16.msra.mxu1 %v1613_v50 }
  0x44   : > { %820 = vmatmul.mubr.bf16.gmra.mrb[8].mxu0 %v1592_v46 }
  0x45   : > { %908 = vmatmul.mubr.bf16.gmra.mrb[8].mxu1 %v1593_v47  ;;  %827 = vmatprep.mubr.bf16.mxu0 %v1594_v48 }
  0x46   : > { %915 = vmatprep.mubr.bf16.mxu1 %v1596_v49 }
  0x4c   : > { %828 = vmatmul.mubr.bf16.gmra.mrb[12].mxu0 %v1598_v51 }
  0x4d   : > { %916 = vmatmul.mubr.bf16.gmra.mrb[12].mxu1 %v1599_v52  ;;  %835 = vmatprep.mubr.bf16.mxu0 %v1601_v53 }
  0x4e   : > { %923 = vmatprep.mubr.bf16.mxu1 %v1603_v54 }
  0x54   : > { %836 = vmatmul.mubr.bf16.gmra.mrb[16].mxu0 %v1605_v55 }
  0x55   : > { %924 = vmatmul.mubr.bf16.gmra.mrb[16].mxu1 %v1606_v56  ;;  %843 = vmatprep.mubr.bf16.mxu0 %v1607_v57 }
  0x56   : > { %931 = vmatprep.mubr.bf16.mxu1 %v1609_v58 }
  0x5c   : > { %844 = vmatmul.mubr.bf16.gmra.mrb[20].mxu0 %v1611_v61 }
  0x5d   : > { %932 = vmatmul.mubr.bf16.gmra.mrb[20].mxu1 %v1612_v62  ;;  %851 = vmatprep.mubr.bf16.mxu0 %v1267_v63 }
  0x5e   : > { %939 = vmatprep.mubr.bf16.mxu1 %v1269_v0 }
  0x64   : > { %852 = vmatmul.mubr.bf16.gmra.mrb[24].mxu0 %v1266_v1 }
  0x65   : > { %940 = vmatmul.mubr.bf16.gmra.mrb[24].mxu1 %v1268_v2  ;;  %1477 = vmatprep.mubr.msk.bf16.mxu0 %vm1650_vm0, %v1649_v34 }
  0x66   : > { %1493 = vmatprep.mubr.msk.bf16.mxu1 %vm1650_vm0, %v1649_v34 }
  0x6c   : > { %1478 = vmatmul.mubr.msk.bf16.vlgmr.msra.gmra.mrb[28].mxu0 %vm749_vm1, %v1618_v3 }
  0x6d   : > { %1494 = vmatmul.mubr.msk.bf16.vlgmr.msra.gmra.mrb[28].mxu1 %vm749_vm1, %v1619_v4  ;;  %1481 = vmatprep.mubr.msk.bf16.mxu0 %vm1650_vm0, %v1649_v34 }
  0x6e   : > { %1497 = vmatprep.mubr.msk.bf16.mxu1 %vm1650_vm0, %v1649_v34 }
  0x74   : > { %1482 = vmatmul.mubr.msk.bf16.gmra.mrb[32].mxu0 %vm749_vm1, %v1620_v5 }
  0x75   : > { %1498 = vmatmul.mubr.msk.bf16.gmra.mrb[32].mxu1 %vm749_vm1, %v1621_v6  ;;  %1485 = vmatprep.mubr.msk.bf16.mxu0 %vm1650_vm0, %v1649_v34 }
  0x76   : > { %1501 = vmatprep.mubr.msk.bf16.mxu1 %vm1650_vm0, %v1649_v34 }
  0x7c   : > { %1486 = vmatmul.mubr.msk.bf16.gmra.mrb[36].mxu0 %vm749_vm1, %v1622_v7 }
  0x7d   : > { %1502 = vmatmul.mubr.msk.bf16.gmra.mrb[36].mxu1 %vm749_vm1, %v1623_v8  ;;  %1489 = vmatprep.mubr.msk.bf16.mxu0 %vm1650_vm0, %v1649_v34 }
  0x84   : > { %1490 = vmatmul.mubr.msk.bf16.gmra.mrb[40].mxu0 %vm749_vm1, %v1624_v9 }
 0x107   : > { %v1358_v10 = vpop.f32.mrb[0].mxu0 }
 0x108   : > { %v1359_v12 = vpop.f32.mrb[1].mxu0  ;;  %v1416_v13 = vpop.f32.mrb[0].mxu1 }
 0x109   : > { %v1360_v14 = vadd.f32 %v1359_v12, %v1358_v10  ;;  %v1361_v15 = vpop.f32.mrb[2].mxu0  ;;  %v1417_v16 = vpop.f32.mrb[1].mxu1 }
 0x10a   : > { %v1362_v17 = vpop.f32.mrb[3].mxu0  ;;  %v1418_v18 = vadd.f32 %v1417_v16, %v1416_v13  ;;  %v1419_v19 = vpop.f32.mrb[2].mxu1 }
 0x10b   : > { %v806_v20 = vadd.f32 %v1360_v14, %v1805_v11  ;;  %v1363_v21 = vadd.f32 %v1362_v17, %v1361_v15  ;;  %v1420_v22 = vpop.f32.mrb[3].mxu1 }
 0x10c   : > { %v1421_v23 = vadd.f32 %v1420_v22, %v1419_v19 }
 0x10d   : > { %v809_v24 = vadd.f32 %v1363_v21, %v1805_v11  ;;  %v1809_v25 = vadd.f32 %v1418_v18, %v806_v20 }
 0x10f   : > { %v1364_v26 = vpop.f32.mrb[4].mxu0  ;;  %v1811_v27 = vadd.f32 %v1421_v23, %v809_v24 }
 0x110   : > { %v1365_v28 = vpop.f32.mrb[5].mxu0  ;;  %v1422_v29 = vpop.f32.mrb[4].mxu1 }
 0x111   : > { %v1366_v30 = vadd.f32 %v1365_v28, %v1364_v26  ;;  %v1367_v31 = vpop.f32.mrb[6].mxu0  ;;  %v1423_v32 = vpop.f32.mrb[5].mxu1 }
 0x112   : > { %v1368_v33 = vpop.f32.mrb[7].mxu0  ;;  %v1424_v34 = vadd.f32 %v1423_v32, %v1422_v29  ;;  %v1425_v35 = vpop.f32.mrb[6].mxu1 }
 0x113   : > { %v814_v36 = vadd.f32 %v1366_v30, %v1805_v11  ;;  %v1369_v37 = vadd.f32 %v1368_v33, %v1367_v31  ;;  %v1426_v38 = vpop.f32.mrb[7].mxu1 }
 0x114   : > { %v1427_v39 = vadd.f32 %v1426_v38, %v1425_v35 }
 0x115   : > { %v817_v40 = vadd.f32 %v1369_v37, %v1805_v11  ;;  %v1815_v41 = vadd.f32 %v1424_v34, %v814_v36 }
 0x117   : > { %v1370_v42 = vpop.f32.mrb[8].mxu0  ;;  %v1817_v43 = vadd.f32 %v1427_v39, %v817_v40 }
 0x118   : > { %v1371_v44 = vpop.f32.mrb[9].mxu0  ;;  %v1428_v45 = vpop.f32.mrb[8].mxu1 }
 0x119   : > { %v1372_v46 = vadd.f32 %v1371_v44, %v1370_v42  ;;  %v1373_v47 = vpop.f32.mrb[10].mxu0  ;;  %v1429_v48 = vpop.f32.mrb[9].mxu1 }
 0x11a   : > { %v1374_v49 = vpop.f32.mrb[11].mxu0  ;;  %v1430_v50 = vadd.f32 %v1429_v48, %v1428_v45  ;;  %v1431_v51 = vpop.f32.mrb[10].mxu1 }
 0x11b   : > { %v822_v52 = vadd.f32 %v1372_v46, %v1805_v11  ;;  %v1375_v53 = vadd.f32 %v1374_v49, %v1373_v47  ;;  %v1432_v54 = vpop.f32.mrb[11].mxu1 }
 0x11c   : > { %v1433_v55 = vadd.f32 %v1432_v54, %v1431_v51 }
 0x11d   : > { %v825_v56 = vadd.f32 %v1375_v53, %v1805_v11  ;;  %v1821_v57 = vadd.f32 %v1430_v50, %v822_v52 }
 0x11f   : > { %v1376_v58 = vpop.f32.mrb[12].mxu0  ;;  %v1823_v59 = vadd.f32 %v1433_v55, %v825_v56 }
 0x120   : > { %v1377_v60 = vpop.f32.mrb[13].mxu0  ;;  %v1434_v61 = vpop.f32.mrb[12].mxu1 }
 0x121   : > { %v1378_v62 = vadd.f32 %v1377_v60, %v1376_v58  ;;  %v1379_v63 = vpop.f32.mrb[14].mxu0  ;;  %v1435_v0 = vpop.f32.mrb[13].mxu1 }
 0x122   : > { %v1380_v1 = vpop.f32.mrb[15].mxu0  ;;  %v1436_v2 = vadd.f32 %v1435_v0, %v1434_v61  ;;  %v1437_v3 = vpop.f32.mrb[14].mxu1 }
 0x123   : > { %v830_v4 = vadd.f32 %v1378_v62, %v1805_v11  ;;  %v1381_v5 = vadd.f32 %v1380_v1, %v1379_v63  ;;  %v1438_v6 = vpop.f32.mrb[15].mxu1 }
 0x124   : > { %v1439_v7 = vadd.f32 %v1438_v6, %v1437_v3 }
 0x125   : > { %v833_v8 = vadd.f32 %v1381_v5, %v1805_v11  ;;  %v1827_v9 = vadd.f32 %v1436_v2, %v830_v4 }
 0x127   : > { %v1382_v10 = vpop.f32.mrb[16].mxu0  ;;  %v1829_v12 = vadd.f32 %v1439_v7, %v833_v8 }
 0x128   : > { %v1383_v13 = vpop.f32.mrb[17].mxu0  ;;  %v1440_v14 = vpop.f32.mrb[16].mxu1 }
 0x129   : > { %v1384_v15 = vadd.f32 %v1383_v13, %v1382_v10  ;;  %v1385_v16 = vpop.f32.mrb[18].mxu0  ;;  %v1441_v17 = vpop.f32.mrb[17].mxu1 }
 0x12a   : > { %v1386_v18 = vpop.f32.mrb[19].mxu0  ;;  %v1442_v19 = vadd.f32 %v1441_v17, %v1440_v14  ;;  %v1443_v20 = vpop.f32.mrb[18].mxu1 }
 0x12b   : > { %v838_v21 = vadd.f32 %v1384_v15, %v1805_v11  ;;  %v1387_v22 = vadd.f32 %v1386_v18, %v1385_v16  ;;  %v1444_v23 = vpop.f32.mrb[19].mxu1 }
 0x12c   : > { %v1445_v24 = vadd.f32 %v1444_v23, %v1443_v20 }
 0x12d   : > { %v841_v26 = vadd.f32 %v1387_v22, %v1805_v11  ;;  %v926_v28 = vadd.f32 %v1442_v19, %v838_v21 }
 0x12f   : > { %v1388_v29 = vpop.f32.mrb[20].mxu0  ;;  %v929_v30 = vadd.f32 %v1445_v24, %v841_v26 }
 0x130   : > { %v1389_v31 = vpop.f32.mrb[21].mxu0  ;;  %v1446_v32 = vpop.f32.mrb[20].mxu1 }
 0x131   : > { %v1390_v33 = vadd.f32 %v1389_v31, %v1388_v29  ;;  %v1391_v34 = vpop.f32.mrb[22].mxu0  ;;  %v1447_v35 = vpop.f32.mrb[21].mxu1 }
 0x132   : > { %v1392_v36 = vpop.f32.mrb[23].mxu0  ;;  %v1448_v37 = vadd.f32 %v1447_v35, %v1446_v32  ;;  %v1449_v38 = vpop.f32.mrb[22].mxu1 }
 0x133   : > { %v846_v39 = vadd.f32 %v1390_v33, %v1805_v11  ;;  %v1393_v40 = vadd.f32 %v1392_v36, %v1391_v34  ;;  %v1450_v42 = vpop.f32.mrb[23].mxu1 }
 0x134   : > { %v1451_v44 = vadd.f32 %v1450_v42, %v1449_v38 }
 0x135   : > { %v849_v45 = vadd.f32 %v1393_v40, %v1805_v11  ;;  %v934_v46 = vadd.f32 %v1448_v37, %v846_v39 }
 0x137   : > { %v1394_v47 = vpop.f32.mrb[24].mxu0  ;;  %v937_v48 = vadd.f32 %v1451_v44, %v849_v45 }
 0x138   : > { %v1395_v49 = vpop.f32.mrb[25].mxu0  ;;  %v1452_v50 = vpop.f32.mrb[24].mxu1 }
 0x139   : > { %v1396_v51 = vadd.f32 %v1395_v49, %v1394_v47  ;;  %v1397_v52 = vpop.f32.mrb[26].mxu0  ;;  %v1453_v53 = vpop.f32.mrb[25].mxu1 }
 0x13a   : > { %v1398_v54 = vpop.f32.mrb[27].mxu0  ;;  %v1454_v55 = vadd.f32 %v1453_v53, %v1452_v50  ;;  %v1455_v56 = vpop.f32.mrb[26].mxu1 }
 0x13b   : > { %v854_v58 = vadd.f32 %v1396_v51, %v1805_v11  ;;  %v1456_v60 = vpop.f32.mrb[27].mxu1 }
 0x13d   : > { %v942_v61 = vadd.f32 %v1454_v55, %v854_v58 }
 0x13f   : > { %v981_v62 = vpop.f32.mrb[28].mxu0 }
 0x140   : > { %v982_v63 = vadd.f32 %v981_v62, %v1809_v25  ;;  %v1013_v0 = vpop.f32.mrb[28].mxu1  ;;  %v1479_v1 = vpop.f32.mrb[29].mxu0 }
 0x141   : > { %v1014_v2 = vadd.f32 %v1013_v0, %v926_v28  ;;  %v1495_v3 = vpop.f32.mrb[29].mxu1  ;;  %v984_v4 = vpop.f32.mrb[30].mxu0 }
 0x142   : > { %v1035_v5 = vmax.f32 %v982_v63, 0.0  ;;  %v985_v6 = vadd.f32 %v984_v4, %v1811_v27  ;;  %v1016_v7 = vpop.f32.mrb[30].mxu1  ;;  %v1480_v8 = vpop.f32.mrb[31].mxu0 }
 0x143   : > { %v1043_v11 = vmax.f32 %v1014_v2, 0.0  ;;  %v1017_v25 = vadd.f32 %v1016_v7, %v929_v30  ;;  %v1496_v10 = vpop.f32.mrb[31].mxu1 }
 0x144   : > { %v1329_v13 = vpack.c.bf16 %v1035_v5, %v1035_v5  ;;  %v1036_v14 = vmax.f32 %v985_v6, 0.0 }
 0x145   : > { %v1337_v15 = vpack.c.bf16 %v1043_v11, %v1043_v11  ;;  %v1044_v16 = vmax.f32 %v1017_v25, 0.0 }
 0x146   : > { %1102 = vst.msk [vmem:[%s1842_s30] sm:$0xf] %vm1101_vm2, %v1329_v13  ;;  %v1330_v27 = vpack.c.bf16 %v1036_v14, %v1036_v14 }
 0x147   : > { %1110 = vst.msk [vmem:[%s1842_s30 + $0x20] sm:$0xf] %vm1101_vm2, %v1337_v15  ;;  %v1338_v17 = vpack.c.bf16 %v1044_v16, %v1044_v16  ;;  %v989_v18 = vpop.f32.mrb[32].mxu0 }
 0x148   : > { %1103 = vst.msk [vmem:[%s1842_s30 + $0x4] sm:$0xf] %vm1101_vm2, %v1330_v27  ;;  %v990_v19 = vadd.f32 %v989_v18, %v1815_v41  ;;  %v1021_v20 = vpop.f32.mrb[32].mxu1  ;;  %v1483_v21 = vpop.f32.mrb[33].mxu0 }
 0x149   : > { %1111 = vst.msk [vmem:[%s1842_s30 + $0x24] sm:$0xf] %vm1101_vm2, %v1338_v17  ;;  %v1022_v22 = vadd.f32 %v1021_v20, %v934_v46  ;;  %v1499_v23 = vpop.f32.mrb[33].mxu1  ;;  %v992_v24 = vpop.f32.mrb[34].mxu0 }
 0x14a   : > { %v1037_v26 = vmax.f32 %v990_v19, 0.0  ;;  %v993_v28 = vadd.f32 %v992_v24, %v1817_v43  ;;  %v1024_v29 = vpop.f32.mrb[34].mxu1  ;;  %v1484_v30 = vpop.f32.mrb[35].mxu0 }
 0x14b   : > { %v1045_v31 = vmax.f32 %v1022_v22, 0.0  ;;  %v1025_v32 = vadd.f32 %v1024_v29, %v937_v48  ;;  %v1500_v33 = vpop.f32.mrb[35].mxu1 }
 0x14c   : > { %v1331_v41 = vpack.c.bf16 %v1037_v26, %v1037_v26  ;;  %v1038_v34 = vmax.f32 %v993_v28, 0.0 }
 0x14d   : > { %v1339_v35 = vpack.c.bf16 %v1045_v31, %v1045_v31  ;;  %v1046_v36 = vmax.f32 %v1025_v32, 0.0 }
 0x14e   : > { %1104 = vst.msk [vmem:[%s1842_s30 + $0x8] sm:$0xf] %vm1101_vm2, %v1331_v41  ;;  %v1332_v37 = vpack.c.bf16 %v1038_v34, %v1038_v34 }
 0x14f   : > { %1112 = vst.msk [vmem:[%s1842_s30 + $0x28] sm:$0xf] %vm1101_vm2, %v1339_v35  ;;  %v1340_v38 = vpack.c.bf16 %v1046_v36, %v1046_v36  ;;  %v997_v39 = vpop.f32.mrb[36].mxu0 }
 0x150   : > { %1105 = vst.msk [vmem:[%s1842_s30 + $0xc] sm:$0xf] %vm1101_vm2, %v1332_v37  ;;  %v998_v43 = vadd.f32 %v997_v39, %v1821_v57  ;;  %v1029_v40 = vpop.f32.mrb[36].mxu1  ;;  %v1487_v42 = vpop.f32.mrb[37].mxu0 }
 0x151   : > { %1113 = vst.msk [vmem:[%s1842_s30 + $0x2c] sm:$0xf] %vm1101_vm2, %v1340_v38  ;;  %v1030_v44 = vadd.f32 %v1029_v40, %v942_v61  ;;  %v1000_v45 = vpop.f32.mrb[38].mxu0  ;;  %v1503_v46 = vpop.f32.mrb[37].mxu1 }
 0x152   : > { %v1039_v47 = vmax.f32 %v998_v43, 0.0  ;;  %v1001_v48 = vadd.f32 %v1000_v45, %v1823_v59  ;;  %v1488_v49 = vpop.f32.mrb[39].mxu0  ;;  %v1032_v50 = vpop.f32.mrb[38].mxu1 }
 0x153   : > { %v1047_v51 = vmax.f32 %v1030_v44, 0.0  ;;  %v1504_v52 = vpop.f32.mrb[39].mxu1 }
 0x154   : > { %v1333_v53 = vpack.c.bf16 %v1039_v47, %v1039_v47  ;;  %v1040_v57 = vmax.f32 %v1001_v48, 0.0 }
 0x155   : > { %v1341_v54 = vpack.c.bf16 %v1047_v51, %v1047_v51 }
 0x156   : > { %1106 = vst.msk [vmem:[%s1842_s30 + $0x10] sm:$0xf] %vm1101_vm2, %v1333_v53  ;;  %v1334_v55 = vpack.c.bf16 %v1040_v57, %v1040_v57 }
 0x157   : > { %1115 = vst.msk [vmem:[%s1842_s30 + $0x30] sm:$0x1] %vm1114_vm3, %v1341_v54  ;;  %v1005_v56 = vpop.f32.mrb[40].mxu0 }
 0x158   : > { %1107 = vst.msk [vmem:[%s1842_s30 + $0x14] sm:$0xf] %vm1101_vm2, %v1334_v55  ;;  %v1006_v58 = vadd.f32 %v1005_v56, %v1827_v9  ;;  %v1491_v59 = vpop.f32.mrb[41].mxu0 }
 0x159   : > { %v1008_v60 = vpop.f32.mrb[42].mxu0 }
 0x15a   : > { %v1041_v61 = vmax.f32 %v1006_v58, 0.0  ;;  %v1009_v62 = vadd.f32 %v1008_v60, %v1829_v12  ;;  %v1492_v63 = vpop.f32.mrb[43].mxu0 }
 0x15c   : > { %v1335_v0 = vpack.c.bf16 %v1041_v61, %v1041_v61  ;;  %v1042_v1 = vmax.f32 %v1009_v62, 0.0 }
 0x15e   : > { %1108 = vst.msk [vmem:[%s1842_s30 + $0x18] sm:$0xf] %vm1101_vm2, %v1335_v0  ;;  %v1336_v2 = vpack.c.bf16 %v1042_v1, %v1042_v1 }
 0x160   : > { %1109 = vst.msk [vmem:[%s1842_s30 + $0x1c] sm:$0xf] %vm1101_vm2, %v1336_v2 }
 0x161 PF: > { %s13_s14 = sadd.s32 1, %s1647_s14   ;;  %s1888_s12 = smov %s1643_s13 }
 0x162   : > { %p10_p5 = scmp.ge.s32.totalorder %s13_s14, 4   ;;  %s1889_s13 = smov %s1891_s15 }
 0x164   :  { %12 = sbr.rel (!%p10_p5) target bundleno = 2 (0x2), region = 68 }

// kernel: conv_actor_critic_forward.7
= control target key start
LH: loop header
LB: loop body
LE: loop exit
PB: predicated region body
PF: predicated region fallthrough
CT: control target
= control target key end

     0   :  { %s9035_s21 = smov 0   ;;  %s10035_s0 = inlined_call_operand.vmem [shape: bf16[2,2,3136], index: 0, kind: input, shape index: {}]   ;;  %s10036_s1 = inlined_call_operand.vmem [shape: bf16[2,3136,512], index: 1, kind: input, shape index: {}]   ;;  %s10037_s2 = inlined_call_operand.vmem [shape: f32[2,1,512], index: 2, kind: input, shape index: {}]   ;;  %s10038_s3 = inlined_call_operand.vmem [shape: bf16[2,512,128], index: 3, kind: input, shape index: {}]   ;;  %s10039_s4 = inlined_call_operand.vmem [shape: f32[2,1,128], index: 4, kind: input, shape index: {}]   ;;  %s10040_s5 = inlined_call_operand.vmem [shape: f32[1,128], index: 5, kind: input, shape index: {}]   ;;  %s10041_s6 = inlined_call_operand.vmem [shape: f32[2,2,128], index: 6, kind: output, shape index: {}]  }
   0x1 LB: > { %s9041_s22 = sadd.s32 4294967295, %s8996_s21   ;;  %p6787_p0 = scmp.ge.s32.totalorder %s8996_s21, 1  ;;  %s8996_s21 = sphi %s9035_s21, %s16_s21  }
   0x2   : > { %p248_p1 = scmp.lt.s32.totalorder %s8996_s21, 3 }
   0x4   : > { %p249_p2 = pnand %p6787_p0, %p248_p1 }
   0x5   : > { %p293_p3 = scmp.lt.s32.totalorder (!%p249_p2), %s9041_s22, 1  ;;  %v1109_v36 = vlaneseq (!%p249_p2)  ;;  %v8998_v37 = vmov (!%p249_p2), 1966171168   ;;  %vm5238_vm0 = vcmask (!%p249_p2), 523264   ;;  %vm6667_vm1 = vcmask (!%p249_p2), 1041408   ;;  %p6679_p4 = scmp.eq.s32.totalorder (!%p249_p2), %s9041_s22, 0 }
   0x6   : > { %252 = sbr.rel (%p249_p2) target bundleno = 1560 (0x618), region = 44  ;;  %v1135_v38 = vunpack.c.l.s4 (!%p249_p2), %v8998_v37 }
   0x7   : > { %v9095_v42 = vshrl.u32 (!%p249_p2), %v1109_v36, 7 }
   0x8   : > { %v1136_v43 = vunpack.c.0.s8 (!%p249_p2), %v1135_v38 }
   0xa   : > { %v9108_v49 = vsub.s32 (!%p249_p2), %v1136_v43, %v9095_v42 }
   0xd   : > { %s9047_s23 = scalar_select %p293_p3, %s9041_s22, 1 }
   0xf   : > { %s7762_s24 = smul.u32 6272, %s9047_s23  ;;  %s7616_s8 = sshll.u32 %s9047_s23, 8 }
  0x10   : > { %s7761_s28 = smul.u32 25, %s9047_s23  ;;  %s9847_s11 = scalar_lea.vmem %s10038_s3, %s7616_s8 }
  0x11   : > { %s9053_s27 = scalar_lea.vmem %s10036_s1, %s7762_s24  ;;  %s6789_s12 = sshll.u32 %s9047_s23, 2 }
  0x12   : > { %v7773_v0 = vld [vmem:[%s9053_s27 + $0x4] ss:$16 sps:$4 sm:$0xff]   ;;  %v7775_v1 = vld [vmem:[%s9053_s27 + $0xc] ss:$16 sps:$4 sm:$0xff]   ;;  %v7777_v2 = vld [vmem:[%s9053_s27] ss:$16 sps:$4 sm:$0xff]   ;;  %s9105_s7 = scalar_lea.vmem %s10035_s0, %s7761_s28  ;;  %s305_s15 = scalar_lea.vmem %s10037_s2, %s6789_s12 }
  0x13   : > { %5242 = vmatprep.subr.bf16.mxu0 %v7773_v0  ;;  %v7778_v3 = vld [vmem:[%s9053_s27 + $0x8] ss:$16 sps:$4 sm:$0xff]   ;;  %5775 = vmatprep.subr.bf16.mxu1 %v7775_v1  ;;  %v7779_v4 = vld [vmem:[%s9053_s27 + $0x24] ss:$16 sps:$4 sm:$0xff]   ;;  %v7781_v5 = vld [vmem:[%s9053_s27 + $0x2c] ss:$16 sps:$4 sm:$0xff]   ;;  %s313_s18 = scalar_lea.vmem %s10039_s4, %s9047_s23 }
  0x14   : > { %5243 = vmatpush1.bf16.msra.mxu0 %v7777_v2  ;;  %5776 = vmatpush1.bf16.msra.mxu1 %v7778_v3  ;;  %v7783_v6 = vld [vmem:[%s9053_s27 + $0x20] ss:$16 sps:$4 sm:$0xff]   ;;  %v7784_v7 = vld [vmem:[%s9053_s27 + $0x28] ss:$16 sps:$4 sm:$0xff]   ;;  %v7785_v8 = vld [vmem:[%s9053_s27 + $0x44] ss:$16 sps:$4 sm:$0xff]  }
  0x15   : > { %5244 = vmatprep.subr.bf16.mxu0 %v7779_v4  ;;  %5777 = vmatprep.subr.bf16.mxu1 %v7781_v5  ;;  %v7787_v9 = vld [vmem:[%s9053_s27 + $0x4c] ss:$16 sps:$4 sm:$0xff]   ;;  %v7789_v10 = vld [vmem:[%s9053_s27 + $0x40] ss:$16 sps:$4 sm:$0xff]   ;;  %v7790_v11 = vld [vmem:[%s9053_s27 + $0x48] ss:$16 sps:$4 sm:$0xff]  }
  0x16   : > { %v7791_v12 = vld [vmem:[%s9053_s27 + $0x64] ss:$16 sps:$4 sm:$0xff]   ;;  %v7793_v13 = vld [vmem:[%s9053_s27 + $0x6c] ss:$16 sps:$4 sm:$0xff]   ;;  %v7795_v14 = vld [vmem:[%s9053_s27 + $0x60] ss:$16 sps:$4 sm:$0xff]  }
  0x17   : > { %v7796_v15 = vld [vmem:[%s9053_s27 + $0x68] ss:$16 sps:$4 sm:$0xff]   ;;  %v7797_v16 = vld [vmem:[%s9053_s27 + $0x84] ss:$16 sps:$4 sm:$0xff]   ;;  %v7799_v17 = vld [vmem:[%s9053_s27 + $0x8c] ss:$16 sps:$4 sm:$0xff]  }
  0x18   : > { %5245 = vmatpush1.bf16.msra.mxu0 %v7783_v6  ;;  %5778 = vmatpush1.bf16.msra.mxu1 %v7784_v7  ;;  %v7801_v18 = vld [vmem:[%s9053_s27 + $0x80] ss:$16 sps:$4 sm:$0xff]   ;;  %v7802_v19 = vld [vmem:[%s9053_s27 + $0x88] ss:$16 sps:$4 sm:$0xff]   ;;  %v7803_v20 = vld [vmem:[%s9053_s27 + $0xa4] ss:$16 sps:$4 sm:$0xff]  }
  0x19   : > { %5246 = vmatprep.subr.bf16.mxu0 %v7785_v8  ;;  %5779 = vmatprep.subr.bf16.mxu1 %v7787_v9  ;;  %v7805_v21 = vld [vmem:[%s9053_s27 + $0xac] ss:$16 sps:$4 sm:$0xff]   ;;  %v7807_v22 = vld [vmem:[%s9053_s27 + $0xa0] ss:$16 sps:$4 sm:$0xff]   ;;  %v7808_v23 = vld [vmem:[%s9053_s27 + $0xa8] ss:$16 sps:$4 sm:$0xff]  }
  0x1a   : > { %v7809_v24 = vld [vmem:[%s9053_s27 + $0xc4] ss:$16 sps:$4 sm:$0xff]   ;;  %v7811_v25 = vld [vmem:[%s9053_s27 + $0xcc] ss:$16 sps:$4 sm:$0xff]   ;;  %v7813_v26 = vld [vmem:[%s9053_s27 + $0xc0] ss:$16 sps:$4 sm:$0xff]  }
  0x1b   : > { %v7814_v27 = vld [vmem:[%s9053_s27 + $0xc8] ss:$16 sps:$4 sm:$0xff]   ;;  %v7815_v28 = vld [vmem:[%s9053_s27 + $0xe4] ss:$16 sps:$4 sm:$0xff]   ;;  %v7817_v29 = vld [vmem:[%s9053_s27 + $0xec] ss:$16 sps:$4 sm:$0xff]  }
  0x1c   : > { %5247 = vmatpush1.bf16.msra.mxu0 %v7789_v10  ;;  %5780 = vmatpush1.bf16.msra.mxu1 %v7790_v11  ;;  %v7819_v30 = vld [vmem:[%s9053_s27 + $0xe0] ss:$16 sps:$4 sm:$0xff]   ;;  %v7820_v31 = vld [vmem:[%s9053_s27 + $0xe8] ss:$16 sps:$4 sm:$0xff]   ;;  %v7821_v32 = vld [vmem:[%s9053_s27 + $0x104] ss:$16 sps:$4 sm:$0xff]  }
  0x1d   : > { %5248 = vmatprep.subr.bf16.mxu0 %v7791_v12  ;;  %5781 = vmatprep.subr.bf16.mxu1 %v7793_v13  ;;  %v7823_v33 = vld [vmem:[%s9053_s27 + $0x10c] ss:$16 sps:$4 sm:$0xff]   ;;  %v7825_v34 = vld [vmem:[%s9053_s27 + $0x100] ss:$16 sps:$4 sm:$0xff]   ;;  %v7826_v35 = vld [vmem:[%s9053_s27 + $0x108] ss:$16 sps:$4 sm:$0xff]  }
  0x1e   : > { %v7827_v39 = vld [vmem:[%s9053_s27 + $0x124] ss:$16 sps:$4 sm:$0xff]   ;;  %v7829_v40 = vld [vmem:[%s9053_s27 + $0x12c] ss:$16 sps:$4 sm:$0xff]   ;;  %v7831_v41 = vld [vmem:[%s9053_s27 + $0x120] ss:$16 sps:$4 sm:$0xff]  }
  0x1f   : > { %v7832_v44 = vld [vmem:[%s9053_s27 + $0x128] ss:$16 sps:$4 sm:$0xff]   ;;  %v7833_v45 = vld [vmem:[%s9053_s27 + $0x144] ss:$16 sps:$4 sm:$0xff]   ;;  %v7835_v46 = vld [vmem:[%s9053_s27 + $0x14c] ss:$16 sps:$4 sm:$0xff]  }
  0x20   : > { %5249 = vmatpush1.bf16.msra.mxu0 %v7795_v14  ;;  %5782 = vmatpush1.bf16.msra.mxu1 %v7796_v15  ;;  %v7837_v47 = vld [vmem:[%s9053_s27 + $0x140] ss:$16 sps:$4 sm:$0xff]   ;;  %v7838_v48 = vld [vmem:[%s9053_s27 + $0x148] ss:$16 sps:$4 sm:$0xff]   ;;  %v7839_v50 = vld [vmem:[%s9053_s27 + $0x164] ss:$16 sps:$4 sm:$0xff]  }
  0x21   : > { %5250 = vmatprep.subr.bf16.mxu0 %v7797_v16  ;;  %5783 = vmatprep.subr.bf16.mxu1 %v7799_v17  ;;  %v7841_v51 = vld [vmem:[%s9053_s27 + $0x16c] ss:$16 sps:$4 sm:$0xff]   ;;  %v9113_v52 = vld [vmem:[%s9105_s7] sm:$0xff]  ;;  %v7844_v55 = vld [vmem:[%s9053_s27 + $0x168] ss:$16 sps:$4 sm:$0xff]   ;;  %s6792_s25 = sshll.u32 %s9047_s23, 1 }
  0x22   : > { %v7843_v53 = vld [vmem:[%s9053_s27 + $0x160] ss:$16 sps:$4 sm:$0xff]   ;;  %v1140_v54 = vrot.slane %v9113_v52, %v9108_v49  ;;  %v7845_v56 = vld [vmem:[%s9053_s27 + $0x184] ss:$16 sps:$4 sm:$0xff]   ;;  %v7847_v57 = vld [vmem:[%s9053_s27 + $0x18c] ss:$16 sps:$4 sm:$0xff]   ;;  %s317_s28 = scalar_lea.vmem %s10041_s6, %s6792_s25 }
  0x23   : > { %v7849_v59 = vld [vmem:[%s9053_s27 + $0x180] ss:$16 sps:$4 sm:$0xff]   ;;  %v7850_v61 = vld [vmem:[%s9053_s27 + $0x188] ss:$16 sps:$4 sm:$0xff]   ;;  %v7851_v62 = vld [vmem:[%s9053_s27 + $0x1a4] ss:$16 sps:$4 sm:$0xff]  }
  0x24   : > { %5251 = vmatpush1.bf16.msra.mxu0 %v7801_v18  ;;  %5784 = vmatpush1.bf16.msra.mxu1 %v7802_v19  ;;  %v1148_v58 = vcombine.high %v1140_v54, %v1140_v54  ;;  %v7853_v63 = vld [vmem:[%s9053_s27 + $0x1ac] ss:$16 sps:$4 sm:$0xff]   ;;  %v7855_v0 = vld [vmem:[%s9053_s27 + $0x1a0] ss:$16 sps:$4 sm:$0xff]   ;;  %v7856_v1 = vld [vmem:[%s9053_s27 + $0x1a8] ss:$16 sps:$4 sm:$0xff]   ;;  %v9140_v13 = vrot.slane %v1140_v54, %v9108_v49 }
  0x25   : > { %5252 = vmatprep.subr.bf16.mxu0 %v7803_v20  ;;  %5785 = vmatprep.subr.bf16.mxu1 %v7805_v21  ;;  %v7857_v2 = vld [vmem:[%s9053_s27 + $0x1c4] ss:$16 sps:$4 sm:$0xff]   ;;  %v7859_v3 = vld [vmem:[%s9053_s27 + $0x1cc] ss:$16 sps:$4 sm:$0xff]   ;;  %v7861_v4 = vld [vmem:[%s9053_s27 + $0x1c0] ss:$16 sps:$4 sm:$0xff]  }
  0x26   : > { %v1170_v60 = vrot.slane %v1148_v58, %v9108_v49  ;;  %v7862_v5 = vld [vmem:[%s9053_s27 + $0x1c8] ss:$16 sps:$4 sm:$0xff]   ;;  %v7863_v6 = vld [vmem:[%s9053_s27 + $0x1e4] ss:$16 sps:$4 sm:$0xff]   ;;  %v7865_v7 = vld [vmem:[%s9053_s27 + $0x1ec] ss:$16 sps:$4 sm:$0xff]  }
  0x27   : > { %v7867_v8 = vld [vmem:[%s9053_s27 + $0x1e0] ss:$16 sps:$4 sm:$0xff]   ;;  %v7868_v9 = vld [vmem:[%s9053_s27 + $0x1e8] ss:$16 sps:$4 sm:$0xff]   ;;  %v7871_v10 = vld [vmem:[%s9053_s27 + $0x204] ss:$16 sps:$4 sm:$0xff]  }
  0x28   : > { %5253 = vmatpush1.bf16.msra.mxu0 %v7807_v22  ;;  %5786 = vmatpush1.bf16.msra.mxu1 %v7808_v23  ;;  %v7874_v11 = vld [vmem:[%s9053_s27 + $0x20c] ss:$16 sps:$4 sm:$0xff]   ;;  %v7869_v12 = vld [vmem:[%s9053_s27 + $0x200] ss:$16 sps:$4 sm:$0xff]   ;;  %v7872_v14 = vld [vmem:[%s9053_s27 + $0x208] ss:$16 sps:$4 sm:$0xff]   ;;  %v1180_v17 = vcombine.high %v1170_v60, %v1170_v60 }
  0x29   : > { %5254 = vmatprep.subr.bf16.mxu0 %v7809_v24  ;;  %5787 = vmatprep.subr.bf16.mxu1 %v7811_v25  ;;  %v7877_v15 = vld [vmem:[%s9053_s27 + $0x224] ss:$16 sps:$4 sm:$0xff]   ;;  %v7880_v16 = vld [vmem:[%s9053_s27 + $0x22c] ss:$16 sps:$4 sm:$0xff]   ;;  %v7875_v18 = vld [vmem:[%s9053_s27 + $0x220] ss:$16 sps:$4 sm:$0xff]  }
  0x2a   : > { %5274 = vmatprep.mubr.bf16.mxu0 %v1170_v60  ;;  %5807 = vmatprep.mubr.bf16.mxu1 %v1170_v60  ;;  %v7878_v19 = vld [vmem:[%s9053_s27 + $0x228] ss:$16 sps:$4 sm:$0xff]   ;;  %v7883_v20 = vld [vmem:[%s9053_s27 + $0x244] ss:$16 sps:$4 sm:$0xff]   ;;  %v7886_v21 = vld [vmem:[%s9053_s27 + $0x24c] ss:$16 sps:$4 sm:$0xff]  }
  0x2b   : > { %v7881_v22 = vld [vmem:[%s9053_s27 + $0x240] ss:$16 sps:$4 sm:$0xff]   ;;  %v7884_v23 = vld [vmem:[%s9053_s27 + $0x248] ss:$16 sps:$4 sm:$0xff]   ;;  %v7889_v24 = vld [vmem:[%s9053_s27 + $0x264] ss:$16 sps:$4 sm:$0xff]  }
  0x2c   : > { %5255 = vmatpush1.bf16.msra.mxu0 %v7813_v26  ;;  %5788 = vmatpush1.bf16.msra.mxu1 %v7814_v27  ;;  %v7892_v25 = vld [vmem:[%s9053_s27 + $0x26c] ss:$16 sps:$4 sm:$0xff]   ;;  %v7887_v26 = vld [vmem:[%s9053_s27 + $0x260] ss:$16 sps:$4 sm:$0xff]   ;;  %v7890_v27 = vld [vmem:[%s9053_s27 + $0x268] ss:$16 sps:$4 sm:$0xff]  }
  0x2d   : > { %5256 = vmatprep.subr.bf16.mxu0 %v7815_v28  ;;  %5789 = vmatprep.subr.bf16.mxu1 %v7817_v29  ;;  %v7895_v28 = vld [vmem:[%s9053_s27 + $0x284] ss:$16 sps:$4 sm:$0xff]   ;;  %v7898_v29 = vld [vmem:[%s9053_s27 + $0x28c] ss:$16 sps:$4 sm:$0xff]   ;;  %v7905_v38 = vld [vmem:[%s9053_s27 + $0x2c0] ss:$16 sps:$4 sm:$0xff]  }
  0x2e   : > { %v7907_v36 = vld [vmem:[%s9053_s27 + $0x2c4] ss:$16 sps:$4 sm:$0xff]   ;;  %v7910_v37 = vld [vmem:[%s9053_s27 + $0x2cc] ss:$16 sps:$4 sm:$0xff]   ;;  %v7911_v43 = vld [vmem:[%s9053_s27 + $0x2e0] ss:$16 sps:$4 sm:$0xff]  }
  0x2f   : > { %v7926_v54 = vld [vmem:[%s9053_s27 + $0x328] ss:$16 sps:$4 sm:$0xff]   ;;  %v7940_v60 = vld [vmem:[%s9053_s27 + $0x36c] ss:$16 sps:$4 sm:$0xff]   ;;  %s6680_s24 = scalar_select %p6679_p4, 1, 0 }
  0x30   : > { %5257 = vmatpush1.bf16.msra.mxu0 %v7819_v30  ;;  %5790 = vmatpush1.bf16.msra.mxu1 %v7820_v31  ;;  %v7893_v30 = vld [vmem:[%s9053_s27 + $0x280] ss:$16 sps:$4 sm:$0xff]   ;;  %v7896_v31 = vld [vmem:[%s9053_s27 + $0x288] ss:$16 sps:$4 sm:$0xff]  }
  0x31   : > { %5258 = vmatprep.subr.bf16.mxu0 %v7821_v32  ;;  %5791 = vmatprep.subr.bf16.mxu1 %v7823_v33  ;;  %v7901_v32 = vld [vmem:[%s9053_s27 + $0x2a4] ss:$16 sps:$4 sm:$0xff]   ;;  %v7904_v33 = vld [vmem:[%s9053_s27 + $0x2ac] ss:$16 sps:$4 sm:$0xff]   ;;  %v7932_v58 = vld [vmem:[%s9053_s27 + $0x348] ss:$16 sps:$4 sm:$0xff]  }
  0x34   : > { %5259 = vmatpush1.bf16.msra.mxu0 %v7825_v34  ;;  %5792 = vmatpush1.bf16.msra.mxu1 %v7826_v35  ;;  %v7899_v34 = vld [vmem:[%s9053_s27 + $0x2a0] ss:$16 sps:$4 sm:$0xff]   ;;  %v7902_v35 = vld [vmem:[%s9053_s27 + $0x2a8] ss:$16 sps:$4 sm:$0xff]  }
  0x35   : > { %5260 = vmatprep.subr.bf16.mxu0 %v7827_v39  ;;  %5793 = vmatprep.subr.bf16.mxu1 %v7829_v40  ;;  %v7908_v39 = vld [vmem:[%s9053_s27 + $0x2c8] ss:$16 sps:$4 sm:$0xff]   ;;  %v7913_v40 = vld [vmem:[%s9053_s27 + $0x2e4] ss:$16 sps:$4 sm:$0xff]  }
  0x38   : > { %5261 = vmatpush1.bf16.msra.mxu0 %v7831_v41  ;;  %5794 = vmatpush1.bf16.msra.mxu1 %v7832_v44  ;;  %v7916_v41 = vld [vmem:[%s9053_s27 + $0x2ec] ss:$16 sps:$4 sm:$0xff]   ;;  %v7914_v44 = vld [vmem:[%s9053_s27 + $0x2e8] ss:$16 sps:$4 sm:$0xff]  }
  0x39   : > { %5262 = vmatprep.subr.bf16.mxu0 %v7833_v45  ;;  %5795 = vmatprep.subr.bf16.mxu1 %v7835_v46  ;;  %v7919_v45 = vld [vmem:[%s9053_s27 + $0x304] ss:$16 sps:$4 sm:$0xff]   ;;  %v7922_v46 = vld [vmem:[%s9053_s27 + $0x30c] ss:$16 sps:$4 sm:$0xff]  }
  0x3c   : > { %5263 = vmatpush1.bf16.msra.mxu0 %v7837_v47  ;;  %5796 = vmatpush1.bf16.msra.mxu1 %v7838_v48  ;;  %v7917_v47 = vld [vmem:[%s9053_s27 + $0x300] ss:$16 sps:$4 sm:$0xff]   ;;  %v7920_v48 = vld [vmem:[%s9053_s27 + $0x308] ss:$16 sps:$4 sm:$0xff]  }
  0x3d   : > { %5264 = vmatprep.subr.bf16.mxu0 %v7839_v50  ;;  %5797 = vmatprep.subr.bf16.mxu1 %v7841_v51  ;;  %v7925_v50 = vld [vmem:[%s9053_s27 + $0x324] ss:$16 sps:$4 sm:$0xff]   ;;  %v7928_v51 = vld [vmem:[%s9053_s27 + $0x32c] ss:$16 sps:$4 sm:$0xff]  }
  0x40   : > { %5265 = vmatpush1.bf16.msra.mxu0 %v7843_v53  ;;  %5798 = vmatpush1.bf16.msra.mxu1 %v7844_v55  ;;  %v7923_v53 = vld [vmem:[%s9053_s27 + $0x320] ss:$16 sps:$4 sm:$0xff]   ;;  %v7931_v55 = vld [vmem:[%s9053_s27 + $0x344] ss:$16 sps:$4 sm:$0xff]  }
  0x41   : > { %5266 = vmatprep.subr.bf16.mxu0 %v7845_v56  ;;  %5799 = vmatprep.subr.bf16.mxu1 %v7847_v57  ;;  %v7934_v56 = vld [vmem:[%s9053_s27 + $0x34c] ss:$16 sps:$4 sm:$0xff]   ;;  %v7929_v57 = vld [vmem:[%s9053_s27 + $0x340] ss:$16 sps:$4 sm:$0xff]  }
  0x44   : > { %5267 = vmatpush1.bf16.msra.mxu0 %v7849_v59  ;;  %5800 = vmatpush1.bf16.msra.mxu1 %v7850_v61  ;;  %v7937_v59 = vld [vmem:[%s9053_s27 + $0x364] ss:$16 sps:$4 sm:$0xff]   ;;  %v7935_v61 = vld [vmem:[%s9053_s27 + $0x360] ss:$16 sps:$4 sm:$0xff]  }
  0x45   : > { %5268 = vmatprep.subr.bf16.mxu0 %v7851_v62  ;;  %5801 = vmatprep.subr.bf16.mxu1 %v7853_v63  ;;  %v7938_v62 = vld [vmem:[%s9053_s27 + $0x368] ss:$16 sps:$4 sm:$0xff]   ;;  %v7943_v63 = vld [vmem:[%s9053_s27 + $0x384] ss:$16 sps:$4 sm:$0xff]  }
  0x48   : > { %5269 = vmatpush1.bf16.msra.mxu0 %v7855_v0  ;;  %5802 = vmatpush1.bf16.msra.mxu1 %v7856_v1  ;;  %v7946_v0 = vld [vmem:[%s9053_s27 + $0x38c] ss:$16 sps:$4 sm:$0xff]   ;;  %v7941_v1 = vld [vmem:[%s9053_s27 + $0x380] ss:$16 sps:$4 sm:$0xff]  }
  0x49   : > { %5270 = vmatprep.subr.bf16.mxu0 %v7857_v2  ;;  %5803 = vmatprep.subr.bf16.mxu1 %v7859_v3  ;;  %v7944_v2 = vld [vmem:[%s9053_s27 + $0x388] ss:$16 sps:$4 sm:$0xff]   ;;  %v7949_v3 = vld [vmem:[%s9053_s27 + $0x3a4] ss:$16 sps:$4 sm:$0xff]  }
  0x4c   : > { %5271 = vmatpush1.bf16.msra.mxu0 %v7861_v4  ;;  %5804 = vmatpush1.bf16.msra.mxu1 %v7862_v5  ;;  %v7952_v4 = vld [vmem:[%s9053_s27 + $0x3ac] ss:$16 sps:$4 sm:$0xff]   ;;  %v7947_v5 = vld [vmem:[%s9053_s27 + $0x3a0] ss:$16 sps:$4 sm:$0xff]  }
  0x4d   : > { %5272 = vmatprep.subr.bf16.mxu0 %v7863_v6  ;;  %5805 = vmatprep.subr.bf16.mxu1 %v7865_v7  ;;  %v7950_v6 = vld [vmem:[%s9053_s27 + $0x3a8] ss:$16 sps:$4 sm:$0xff]   ;;  %v7955_v7 = vld [vmem:[%s9053_s27 + $0x3c4] ss:$16 sps:$4 sm:$0xff]  }
  0x50   : > { %5273 = vmatpush1.bf16.msra.mxu0 %v7867_v8  ;;  %5806 = vmatpush1.bf16.msra.mxu1 %v7868_v9  ;;  %v7958_v8 = vld [vmem:[%s9053_s27 + $0x3cc] ss:$16 sps:$4 sm:$0xff]   ;;  %v1133_v9 = vcombine.high %v9113_v52, %v9113_v52  ;;  %v7962_v52 = vld [vmem:[%s9053_s27 + $0x3e8] ss:$16 sps:$4 sm:$0xff]  }
  0x51   : > { %5283 = vmatprep.subr.bf16.mxu0 %v7871_v10  ;;  %5816 = vmatprep.subr.bf16.mxu1 %v7874_v11  ;;  %v7953_v10 = vld [vmem:[%s9053_s27 + $0x3c0] ss:$16 sps:$4 sm:$0xff]   ;;  %v7956_v11 = vld [vmem:[%s9053_s27 + $0x3c8] ss:$16 sps:$4 sm:$0xff]  }
  0x53   : > { %5275 = vmatmul.mubr.bf16.vlgmr.msra.gmra.mrb[0].mxu0 %v9140_v13  ;;  %5808 = vmatmul.mubr.bf16.vlgmr.msra.gmra.mrb[0].mxu1 %v9140_v13 }
  0x54   : > { %5284 = vmatpush1.bf16.msra.mxu0 %v7869_v12  ;;  %5817 = vmatpush1.bf16.msra.mxu1 %v7872_v14  ;;  %v7961_v12 = vld [vmem:[%s9053_s27 + $0x3e4] ss:$16 sps:$4 sm:$0xff]   ;;  %v7964_v14 = vld [vmem:[%s9053_s27 + $0x3ec] ss:$16 sps:$4 sm:$0xff]  }
  0x55   : > { %5285 = vmatprep.subr.bf16.mxu0 %v7877_v15  ;;  %5818 = vmatprep.subr.bf16.mxu1 %v7880_v16  ;;  %v9206_v15 = vrot.slane %v1133_v9, %v9108_v49  ;;  %v7959_v16 = vld [vmem:[%s9053_s27 + $0x3e0] ss:$16 sps:$4 sm:$0xff]   ;;  %v8040_v9 = vld [vmem:[%s9053_s27 + $0x588] ss:$16 sps:$4 sm:$0xff]  }
  0x56   : > { %5315 = vmatprep.mubr.bf16.mxu0 %v1180_v17  ;;  %5848 = vmatprep.mubr.bf16.mxu1 %v1180_v17  ;;  %v7967_v17 = vld [vmem:[%s9053_s27 + $0x404] ss:$16 sps:$4 sm:$0xff]  }
  0x58   : > { %5286 = vmatpush1.bf16.msra.mxu0 %v7875_v18  ;;  %5819 = vmatpush1.bf16.msra.mxu1 %v7878_v19  ;;  %v7970_v18 = vld [vmem:[%s9053_s27 + $0x40c] ss:$16 sps:$4 sm:$0xff]   ;;  %v1149_v19 = vcombine.high %v9206_v15, %v9206_v15 }
  0x59   : > { %5287 = vmatprep.subr.bf16.mxu0 %v7883_v20  ;;  %5820 = vmatprep.subr.bf16.mxu1 %v7886_v21  ;;  %v7965_v20 = vld [vmem:[%s9053_s27 + $0x400] ss:$16 sps:$4 sm:$0xff]   ;;  %v1178_v21 = vcombine.high %v9140_v13, %v9140_v13  ;;  %v7974_v13 = vld [vmem:[%s9053_s27 + $0x428] ss:$16 sps:$4 sm:$0xff]  }
  0x5c   : > { %5288 = vmatpush1.bf16.msra.mxu0 %v7881_v22  ;;  %5821 = vmatpush1.bf16.msra.mxu1 %v7884_v23  ;;  %v7968_v22 = vld [vmem:[%s9053_s27 + $0x408] ss:$16 sps:$4 sm:$0xff]   ;;  %v7973_v23 = vld [vmem:[%s9053_s27 + $0x424] ss:$16 sps:$4 sm:$0xff]  }
  0x5d   : > { %5289 = vmatprep.subr.bf16.mxu0 %v7889_v24  ;;  %5822 = vmatprep.subr.bf16.mxu1 %v7892_v25  ;;  %v7976_v24 = vld [vmem:[%s9053_s27 + $0x42c] ss:$16 sps:$4 sm:$0xff]   ;;  %v9221_v25 = vrot.slane %v1149_v19, %v9108_v49  ;;  %v8057_v19 = vld [vmem:[%s9053_s27 + $0x5e4] ss:$16 sps:$4 sm:$0xff]  }
  0x60   : > { %5290 = vmatpush1.bf16.msra.mxu0 %v7887_v26  ;;  %5823 = vmatpush1.bf16.msra.mxu1 %v7890_v27  ;;  %v7971_v26 = vld [vmem:[%s9053_s27 + $0x420] ss:$16 sps:$4 sm:$0xff]   ;;  %v7979_v27 = vld [vmem:[%s9053_s27 + $0x444] ss:$16 sps:$4 sm:$0xff]  }
  0x61   : > { %5291 = vmatprep.subr.bf16.mxu0 %v7895_v28  ;;  %5824 = vmatprep.subr.bf16.mxu1 %v7898_v29  ;;  %v7982_v28 = vld [vmem:[%s9053_s27 + $0x44c] ss:$16 sps:$4 sm:$0xff]   ;;  %v7977_v29 = vld [vmem:[%s9053_s27 + $0x440] ss:$16 sps:$4 sm:$0xff]  }
  0x64   : > { %5292 = vmatpush1.bf16.msra.mxu0 %v7893_v30  ;;  %5825 = vmatpush1.bf16.msra.mxu1 %v7896_v31  ;;  %v7980_v30 = vld [vmem:[%s9053_s27 + $0x448] ss:$16 sps:$4 sm:$0xff]   ;;  %v7985_v31 = vld [vmem:[%s9053_s27 + $0x464] ss:$16 sps:$4 sm:$0xff]  }
  0x65   : > { %5293 = vmatprep.subr.bf16.mxu0 %v7901_v32  ;;  %5826 = vmatprep.subr.bf16.mxu1 %v7904_v33  ;;  %v7988_v32 = vld [vmem:[%s9053_s27 + $0x46c] ss:$16 sps:$4 sm:$0xff]   ;;  %v7983_v33 = vld [vmem:[%s9053_s27 + $0x460] ss:$16 sps:$4 sm:$0xff]  }
  0x68   : > { %5294 = vmatpush1.bf16.msra.mxu0 %v7899_v34  ;;  %5827 = vmatpush1.bf16.msra.mxu1 %v7902_v35  ;;  %v7986_v34 = vld [vmem:[%s9053_s27 + $0x468] ss:$16 sps:$4 sm:$0xff]   ;;  %v7991_v35 = vld [vmem:[%s9053_s27 + $0x484] ss:$16 sps:$4 sm:$0xff]  }
  0x69   : > { %5295 = vmatprep.subr.bf16.mxu0 %v7907_v36  ;;  %5828 = vmatprep.subr.bf16.mxu1 %v7910_v37  ;;  %v7994_v36 = vld [vmem:[%s9053_s27 + $0x48c] ss:$16 sps:$4 sm:$0xff]   ;;  %v7989_v37 = vld [vmem:[%s9053_s27 + $0x480] ss:$16 sps:$4 sm:$0xff]  }
  0x6c   : > { %5296 = vmatpush1.bf16.msra.mxu0 %v7905_v38  ;;  %5829 = vmatpush1.bf16.msra.mxu1 %v7908_v39  ;;  %v7992_v38 = vld [vmem:[%s9053_s27 + $0x488] ss:$16 sps:$4 sm:$0xff]   ;;  %v7997_v39 = vld [vmem:[%s9053_s27 + $0x4a4] ss:$16 sps:$4 sm:$0xff]  }
  0x6d   : > { %5297 = vmatprep.subr.bf16.mxu0 %v7913_v40  ;;  %5830 = vmatprep.subr.bf16.mxu1 %v7916_v41  ;;  %v8000_v40 = vld [vmem:[%s9053_s27 + $0x4ac] ss:$16 sps:$4 sm:$0xff]   ;;  %v7995_v41 = vld [vmem:[%s9053_s27 + $0x4a0] ss:$16 sps:$4 sm:$0xff]  }
  0x70   : > { %5298 = vmatpush1.bf16.msra.mxu0 %v7911_v43  ;;  %5831 = vmatpush1.bf16.msra.mxu1 %v7914_v44  ;;  %v7998_v43 = vld [vmem:[%s9053_s27 + $0x4a8] ss:$16 sps:$4 sm:$0xff]   ;;  %v8003_v44 = vld [vmem:[%s9053_s27 + $0x4c4] ss:$16 sps:$4 sm:$0xff]  }
  0x71   : > { %5299 = vmatprep.subr.bf16.mxu0 %v7919_v45  ;;  %5832 = vmatprep.subr.bf16.mxu1 %v7922_v46  ;;  %v8006_v45 = vld [vmem:[%s9053_s27 + $0x4cc] ss:$16 sps:$4 sm:$0xff]   ;;  %v8001_v46 = vld [vmem:[%s9053_s27 + $0x4c0] ss:$16 sps:$4 sm:$0xff]  }
  0x74   : > { %5300 = vmatpush1.bf16.msra.mxu0 %v7917_v47  ;;  %5833 = vmatpush1.bf16.msra.mxu1 %v7920_v48  ;;  %v8004_v47 = vld [vmem:[%s9053_s27 + $0x4c8] ss:$16 sps:$4 sm:$0xff]   ;;  %v8009_v48 = vld [vmem:[%s9053_s27 + $0x4e4] ss:$16 sps:$4 sm:$0xff]  }
  0x75   : > { %5301 = vmatprep.subr.bf16.mxu0 %v7925_v50  ;;  %5834 = vmatprep.subr.bf16.mxu1 %v7928_v51  ;;  %v8012_v50 = vld [vmem:[%s9053_s27 + $0x4ec] ss:$16 sps:$4 sm:$0xff]   ;;  %v8007_v51 = vld [vmem:[%s9053_s27 + $0x4e0] ss:$16 sps:$4 sm:$0xff]  }
  0x78   : > { %5302 = vmatpush1.bf16.msra.mxu0 %v7923_v53  ;;  %5835 = vmatpush1.bf16.msra.mxu1 %v7926_v54  ;;  %v8010_v53 = vld [vmem:[%s9053_s27 + $0x4e8] ss:$16 sps:$4 sm:$0xff]   ;;  %v8015_v54 = vld [vmem:[%s9053_s27 + $0x504] ss:$16 sps:$4 sm:$0xff]  }
  0x79   : > { %5303 = vmatprep.subr.bf16.mxu0 %v7931_v55  ;;  %5836 = vmatprep.subr.bf16.mxu1 %v7934_v56  ;;  %v8018_v55 = vld [vmem:[%s9053_s27 + $0x50c] ss:$16 sps:$4 sm:$0xff]   ;;  %v8013_v56 = vld [vmem:[%s9053_s27 + $0x500] ss:$16 sps:$4 sm:$0xff]  }
  0x7c   : > { %5304 = vmatpush1.bf16.msra.mxu0 %v7929_v57  ;;  %5837 = vmatpush1.bf16.msra.mxu1 %v7932_v58  ;;  %v8016_v57 = vld [vmem:[%s9053_s27 + $0x508] ss:$16 sps:$4 sm:$0xff]   ;;  %v8021_v58 = vld [vmem:[%s9053_s27 + $0x524] ss:$16 sps:$4 sm:$0xff]  }
  0x7d   : > { %5305 = vmatprep.subr.bf16.mxu0 %v7937_v59  ;;  %5838 = vmatprep.subr.bf16.mxu1 %v7940_v60  ;;  %v8024_v59 = vld [vmem:[%s9053_s27 + $0x52c] ss:$16 sps:$4 sm:$0xff]   ;;  %v8019_v60 = vld [vmem:[%s9053_s27 + $0x520] ss:$16 sps:$4 sm:$0xff]  }
  0x80   : > { %5306 = vmatpush1.bf16.msra.mxu0 %v7935_v61  ;;  %5839 = vmatpush1.bf16.msra.mxu1 %v7938_v62  ;;  %v8022_v61 = vld [vmem:[%s9053_s27 + $0x528] ss:$16 sps:$4 sm:$0xff]   ;;  %v8027_v62 = vld [vmem:[%s9053_s27 + $0x544] ss:$16 sps:$4 sm:$0xff]  }
  0x81   : > { %5307 = vmatprep.subr.bf16.mxu0 %v7943_v63  ;;  %5840 = vmatprep.subr.bf16.mxu1 %v7946_v0  ;;  %v8030_v63 = vld [vmem:[%s9053_s27 + $0x54c] ss:$16 sps:$4 sm:$0xff]   ;;  %v8025_v0 = vld [vmem:[%s9053_s27 + $0x540] ss:$16 sps:$4 sm:$0xff]  }
  0x84   : > { %5308 = vmatpush1.bf16.msra.mxu0 %v7941_v1  ;;  %5841 = vmatpush1.bf16.msra.mxu1 %v7944_v2  ;;  %v8028_v1 = vld [vmem:[%s9053_s27 + $0x548] ss:$16 sps:$4 sm:$0xff]   ;;  %v8033_v2 = vld [vmem:[%s9053_s27 + $0x564] ss:$16 sps:$4 sm:$0xff]  }
  0x85   : > { %5309 = vmatprep.subr.bf16.mxu0 %v7949_v3  ;;  %5842 = vmatprep.subr.bf16.mxu1 %v7952_v4  ;;  %v8036_v3 = vld [vmem:[%s9053_s27 + $0x56c] ss:$16 sps:$4 sm:$0xff]   ;;  %v8031_v4 = vld [vmem:[%s9053_s27 + $0x560] ss:$16 sps:$4 sm:$0xff]  }
  0x88   : > { %5310 = vmatpush1.bf16.msra.mxu0 %v7947_v5  ;;  %5843 = vmatpush1.bf16.msra.mxu1 %v7950_v6  ;;  %v8034_v5 = vld [vmem:[%s9053_s27 + $0x568] ss:$16 sps:$4 sm:$0xff]   ;;  %v8039_v6 = vld [vmem:[%s9053_s27 + $0x584] ss:$16 sps:$4 sm:$0xff]  }
  0x89   : > { %5311 = vmatprep.subr.bf16.mxu0 %v7955_v7  ;;  %5844 = vmatprep.subr.bf16.mxu1 %v7958_v8  ;;  %v8042_v7 = vld [vmem:[%s9053_s27 + $0x58c] ss:$16 sps:$4 sm:$0xff]   ;;  %v8037_v8 = vld [vmem:[%s9053_s27 + $0x580] ss:$16 sps:$4 sm:$0xff]  }
  0x8c   : > { %5312 = vmatpush1.bf16.msra.mxu0 %v7953_v10  ;;  %5845 = vmatpush1.bf16.msra.mxu1 %v7956_v11  ;;  %v8045_v10 = vld [vmem:[%s9053_s27 + $0x5a4] ss:$16 sps:$4 sm:$0xff]   ;;  %v8048_v11 = vld [vmem:[%s9053_s27 + $0x5ac] ss:$16 sps:$4 sm:$0xff]  }
  0x8d   : > { %5313 = vmatprep.subr.bf16.mxu0 %v7961_v12  ;;  %5846 = vmatprep.subr.bf16.mxu1 %v7964_v14  ;;  %v8043_v12 = vld [vmem:[%s9053_s27 + $0x5a0] ss:$16 sps:$4 sm:$0xff]   ;;  %v8046_v14 = vld [vmem:[%s9053_s27 + $0x5a8] ss:$16 sps:$4 sm:$0xff]  }
  0x90   : > { %5314 = vmatpush1.bf16.msra.mxu0 %v7959_v16  ;;  %5847 = vmatpush1.bf16.msra.mxu1 %v7962_v52  ;;  %v8051_v16 = vld [vmem:[%s9053_s27 + $0x5c4] ss:$16 sps:$4 sm:$0xff]   ;;  %v8054_v52 = vld [vmem:[%s9053_s27 + $0x5cc] ss:$16 sps:$4 sm:$0xff]  }
  0x91   : > { %5324 = vmatprep.subr.bf16.mxu0 %v7967_v17  ;;  %5857 = vmatprep.subr.bf16.mxu1 %v7970_v18  ;;  %v8049_v17 = vld [vmem:[%s9053_s27 + $0x5c0] ss:$16 sps:$4 sm:$0xff]   ;;  %v8052_v18 = vld [vmem:[%s9053_s27 + $0x5c8] ss:$16 sps:$4 sm:$0xff]  }
  0x93   : > { %5316 = vmatmul.mubr.bf16.vlgmr.msra.gmra.mrb[0].mxu0 %v1178_v21  ;;  %5849 = vmatmul.mubr.bf16.vlgmr.msra.gmra.mrb[0].mxu1 %v1178_v21  ;;  %v8055_v21 = vld [vmem:[%s9053_s27 + $0x5e0] ss:$16 sps:$4 sm:$0xff]  }
  0x94   : > { %5325 = vmatpush1.bf16.msra.mxu0 %v7965_v20  ;;  %5858 = vmatpush1.bf16.msra.mxu1 %v7968_v22  ;;  %v8060_v20 = vld [vmem:[%s9053_s27 + $0x5ec] ss:$16 sps:$4 sm:$0xff]   ;;  %v8058_v22 = vld [vmem:[%s9053_s27 + $0x5e8] ss:$16 sps:$4 sm:$0xff]  }
  0x95   : > { %5326 = vmatprep.subr.bf16.mxu0 %v7973_v23  ;;  %5859 = vmatprep.subr.bf16.mxu1 %v7976_v24  ;;  %v8064_v23 = vld [vmem:[%s9053_s27 + $0x604] ss:$16 sps:$4 sm:$0xff]   ;;  %v8067_v24 = vld [vmem:[%s9053_s27 + $0x60c] ss:$16 sps:$4 sm:$0xff]  }
  0x96   : > { %5356 = vmatprep.mubr.bf16.mxu0 %v9221_v25  ;;  %5889 = vmatprep.mubr.bf16.mxu1 %v9221_v25 }
  0x98   : > { %5327 = vmatpush1.bf16.msra.mxu0 %v7971_v26  ;;  %5860 = vmatpush1.bf16.msra.mxu1 %v7974_v13  ;;  %v8062_v26 = vld [vmem:[%s9053_s27 + $0x600] ss:$16 sps:$4 sm:$0xff]   ;;  %v9288_v13 = vrot.slane %v9206_v15, %v9108_v49 }
  0x99   : > { %5328 = vmatprep.subr.bf16.mxu0 %v7979_v27  ;;  %5861 = vmatprep.subr.bf16.mxu1 %v7982_v28  ;;  %v8065_v27 = vld [vmem:[%s9053_s27 + $0x608] ss:$16 sps:$4 sm:$0xff]   ;;  %v8070_v28 = vld [vmem:[%s9053_s27 + $0x624] ss:$16 sps:$4 sm:$0xff]   ;;  %v8068_v15 = vld [vmem:[%s9053_s27 + $0x620] ss:$16 sps:$4 sm:$0xff]  }
  0x9c   : > { %5329 = vmatpush1.bf16.msra.mxu0 %v7977_v29  ;;  %5862 = vmatpush1.bf16.msra.mxu1 %v7980_v30  ;;  %v8073_v29 = vld [vmem:[%s9053_s27 + $0x62c] ss:$16 sps:$4 sm:$0xff]   ;;  %v1181_v30 = vcombine.high %v9221_v25, %v9221_v25  ;;  %v8074_v25 = vld [vmem:[%s9053_s27 + $0x640] ss:$16 sps:$4 sm:$0xff]  }
  0x9d   : > { %5330 = vmatprep.subr.bf16.mxu0 %v7985_v31  ;;  %5863 = vmatprep.subr.bf16.mxu1 %v7988_v32  ;;  %v8071_v31 = vld [vmem:[%s9053_s27 + $0x628] ss:$16 sps:$4 sm:$0xff]   ;;  %v8076_v32 = vld [vmem:[%s9053_s27 + $0x644] ss:$16 sps:$4 sm:$0xff]  }
  0xa0   : > { %5331 = vmatpush1.bf16.msra.mxu0 %v7983_v33  ;;  %5864 = vmatpush1.bf16.msra.mxu1 %v7986_v34  ;;  %v8079_v33 = vld [vmem:[%s9053_s27 + $0x64c] ss:$16 sps:$4 sm:$0xff]   ;;  %v8077_v34 = vld [vmem:[%s9053_s27 + $0x648] ss:$16 sps:$4 sm:$0xff]  }
  0xa1   : > { %5332 = vmatprep.subr.bf16.mxu0 %v7991_v35  ;;  %5865 = vmatprep.subr.bf16.mxu1 %v7994_v36  ;;  %v8082_v35 = vld [vmem:[%s9053_s27 + $0x664] ss:$16 sps:$4 sm:$0xff]   ;;  %v8085_v36 = vld [vmem:[%s9053_s27 + $0x66c] ss:$16 sps:$4 sm:$0xff]  }
  0xa4   : > { %5333 = vmatpush1.bf16.msra.mxu0 %v7989_v37  ;;  %5866 = vmatpush1.bf16.msra.mxu1 %v7992_v38  ;;  %v8080_v37 = vld [vmem:[%s9053_s27 + $0x660] ss:$16 sps:$4 sm:$0xff]   ;;  %v8083_v38 = vld [vmem:[%s9053_s27 + $0x668] ss:$16 sps:$4 sm:$0xff]  }
  0xa5   : > { %5334 = vmatprep.subr.bf16.mxu0 %v7997_v39  ;;  %5867 = vmatprep.subr.bf16.mxu1 %v8000_v40  ;;  %v8088_v39 = vld [vmem:[%s9053_s27 + $0x684] ss:$16 sps:$4 sm:$0xff]   ;;  %v8091_v40 = vld [vmem:[%s9053_s27 + $0x68c] ss:$16 sps:$4 sm:$0xff]  }
  0xa8   : > { %5335 = vmatpush1.bf16.msra.mxu0 %v7995_v41  ;;  %5868 = vmatpush1.bf16.msra.mxu1 %v7998_v43  ;;  %v8086_v41 = vld [vmem:[%s9053_s27 + $0x680] ss:$16 sps:$4 sm:$0xff]   ;;  %v8089_v43 = vld [vmem:[%s9053_s27 + $0x688] ss:$16 sps:$4 sm:$0xff]  }
  0xa9   : > { %5336 = vmatprep.subr.bf16.mxu0 %v8003_v44  ;;  %5869 = vmatprep.subr.bf16.mxu1 %v8006_v45  ;;  %v8094_v44 = vld [vmem:[%s9053_s27 + $0x6a4] ss:$16 sps:$4 sm:$0xff]   ;;  %v8097_v45 = vld [vmem:[%s9053_s27 + $0x6ac] ss:$16 sps:$4 sm:$0xff]  }
  0xac   : > { %5337 = vmatpush1.bf16.msra.mxu0 %v8001_v46  ;;  %5870 = vmatpush1.bf16.msra.mxu1 %v8004_v47  ;;  %v8092_v46 = vld [vmem:[%s9053_s27 + $0x6a0] ss:$16 sps:$4 sm:$0xff]   ;;  %v8095_v47 = vld [vmem:[%s9053_s27 + $0x6a8] ss:$16 sps:$4 sm:$0xff]  }
  0xad   : > { %5338 = vmatprep.subr.bf16.mxu0 %v8009_v48  ;;  %5871 = vmatprep.subr.bf16.mxu1 %v8012_v50  ;;  %v8100_v48 = vld [vmem:[%s9053_s27 + $0x6c4] ss:$16 sps:$4 sm:$0xff]   ;;  %v8103_v50 = vld [vmem:[%s9053_s27 + $0x6cc] ss:$16 sps:$4 sm:$0xff]  }
  0xb0   : > { %5339 = vmatpush1.bf16.msra.mxu0 %v8007_v51  ;;  %5872 = vmatpush1.bf16.msra.mxu1 %v8010_v53  ;;  %v8098_v51 = vld [vmem:[%s9053_s27 + $0x6c0] ss:$16 sps:$4 sm:$0xff]   ;;  %v8101_v53 = vld [vmem:[%s9053_s27 + $0x6c8] ss:$16 sps:$4 sm:$0xff]  }
  0xb1   : > { %5340 = vmatprep.subr.bf16.mxu0 %v8015_v54  ;;  %5873 = vmatprep.subr.bf16.mxu1 %v8018_v55  ;;  %v8106_v54 = vld [vmem:[%s9053_s27 + $0x6e4] ss:$16 sps:$4 sm:$0xff]   ;;  %v8109_v55 = vld [vmem:[%s9053_s27 + $0x6ec] ss:$16 sps:$4 sm:$0xff]  }
  0xb4   : > { %5341 = vmatpush1.bf16.msra.mxu0 %v8013_v56  ;;  %5874 = vmatpush1.bf16.msra.mxu1 %v8016_v57  ;;  %v8104_v56 = vld [vmem:[%s9053_s27 + $0x6e0] ss:$16 sps:$4 sm:$0xff]   ;;  %v8107_v57 = vld [vmem:[%s9053_s27 + $0x6e8] ss:$16 sps:$4 sm:$0xff]  }
  0xb5   : > { %5342 = vmatprep.subr.bf16.mxu0 %v8021_v58  ;;  %5875 = vmatprep.subr.bf16.mxu1 %v8024_v59  ;;  %v8112_v58 = vld [vmem:[%s9053_s27 + $0x704] ss:$16 sps:$4 sm:$0xff]   ;;  %v8115_v59 = vld [vmem:[%s9053_s27 + $0x70c] ss:$16 sps:$4 sm:$0xff]  }
  0xb8   : > { %5343 = vmatpush1.bf16.msra.mxu0 %v8019_v60  ;;  %5876 = vmatpush1.bf16.msra.mxu1 %v8022_v61  ;;  %v8110_v60 = vld [vmem:[%s9053_s27 + $0x700] ss:$16 sps:$4 sm:$0xff]   ;;  %v8113_v61 = vld [vmem:[%s9053_s27 + $0x708] ss:$16 sps:$4 sm:$0xff]  }
  0xb9   : > { %5344 = vmatprep.subr.bf16.mxu0 %v8027_v62  ;;  %5877 = vmatprep.subr.bf16.mxu1 %v8030_v63  ;;  %v8118_v62 = vld [vmem:[%s9053_s27 + $0x724] ss:$16 sps:$4 sm:$0xff]   ;;  %v8121_v63 = vld [vmem:[%s9053_s27 + $0x72c] ss:$16 sps:$4 sm:$0xff]  }
  0xbc   : > { %5345 = vmatpush1.bf16.msra.mxu0 %v8025_v0  ;;  %5878 = vmatpush1.bf16.msra.mxu1 %v8028_v1  ;;  %v8116_v0 = vld [vmem:[%s9053_s27 + $0x720] ss:$16 sps:$4 sm:$0xff]   ;;  %v8119_v1 = vld [vmem:[%s9053_s27 + $0x728] ss:$16 sps:$4 sm:$0xff]  }
  0xbd   : > { %5346 = vmatprep.subr.bf16.mxu0 %v8033_v2  ;;  %5879 = vmatprep.subr.bf16.mxu1 %v8036_v3  ;;  %v8124_v2 = vld [vmem:[%s9053_s27 + $0x744] ss:$16 sps:$4 sm:$0xff]   ;;  %v8127_v3 = vld [vmem:[%s9053_s27 + $0x74c] ss:$16 sps:$4 sm:$0xff]  }
  0xc0   : > { %5347 = vmatpush1.bf16.msra.mxu0 %v8031_v4  ;;  %5880 = vmatpush1.bf16.msra.mxu1 %v8034_v5  ;;  %v8122_v4 = vld [vmem:[%s9053_s27 + $0x740] ss:$16 sps:$4 sm:$0xff]   ;;  %v8125_v5 = vld [vmem:[%s9053_s27 + $0x748] ss:$16 sps:$4 sm:$0xff]  }
  0xc1   : > { %5348 = vmatprep.subr.bf16.mxu0 %v8039_v6  ;;  %5881 = vmatprep.subr.bf16.mxu1 %v8042_v7  ;;  %v8130_v6 = vld [vmem:[%s9053_s27 + $0x764] ss:$16 sps:$4 sm:$0xff]   ;;  %v8133_v7 = vld [vmem:[%s9053_s27 + $0x76c] ss:$16 sps:$4 sm:$0xff]  }
  0xc4   : > { %5349 = vmatpush1.bf16.msra.mxu0 %v8037_v8  ;;  %5882 = vmatpush1.bf16.msra.mxu1 %v8040_v9  ;;  %v8128_v8 = vld [vmem:[%s9053_s27 + $0x760] ss:$16 sps:$4 sm:$0xff]   ;;  %v8131_v9 = vld [vmem:[%s9053_s27 + $0x768] ss:$16 sps:$4 sm:$0xff]  }
  0xc5   : > { %5350 = vmatprep.subr.bf16.mxu0 %v8045_v10  ;;  %5883 = vmatprep.subr.bf16.mxu1 %v8048_v11  ;;  %v8136_v10 = vld [vmem:[%s9053_s27 + $0x784] ss:$16 sps:$4 sm:$0xff]   ;;  %v8139_v11 = vld [vmem:[%s9053_s27 + $0x78c] ss:$16 sps:$4 sm:$0xff]  }
  0xc8   : > { %5351 = vmatpush1.bf16.msra.mxu0 %v8043_v12  ;;  %5884 = vmatpush1.bf16.msra.mxu1 %v8046_v14  ;;  %v8134_v12 = vld [vmem:[%s9053_s27 + $0x780] ss:$16 sps:$4 sm:$0xff]   ;;  %v8137_v14 = vld [vmem:[%s9053_s27 + $0x788] ss:$16 sps:$4 sm:$0xff]  }
  0xc9   : > { %5352 = vmatprep.subr.bf16.mxu0 %v8051_v16  ;;  %5885 = vmatprep.subr.bf16.mxu1 %v8054_v52  ;;  %v8142_v16 = vld [vmem:[%s9053_s27 + $0x7a4] ss:$16 sps:$4 sm:$0xff]   ;;  %v8145_v52 = vld [vmem:[%s9053_s27 + $0x7ac] ss:$16 sps:$4 sm:$0xff]  }
  0xcc   : > { %5353 = vmatpush1.bf16.msra.mxu0 %v8049_v17  ;;  %5886 = vmatpush1.bf16.msra.mxu1 %v8052_v18  ;;  %v8140_v17 = vld [vmem:[%s9053_s27 + $0x7a0] ss:$16 sps:$4 sm:$0xff]   ;;  %v8143_v18 = vld [vmem:[%s9053_s27 + $0x7a8] ss:$16 sps:$4 sm:$0xff]  }
  0xcd   : > { %5354 = vmatprep.subr.bf16.mxu0 %v8057_v19  ;;  %5887 = vmatprep.subr.bf16.mxu1 %v8060_v20  ;;  %v8148_v19 = vld [vmem:[%s9053_s27 + $0x7c4] ss:$16 sps:$4 sm:$0xff]   ;;  %v8151_v20 = vld [vmem:[%s9053_s27 + $0x7cc] ss:$16 sps:$4 sm:$0xff]  }
  0xd0   : > { %5355 = vmatpush1.bf16.msra.mxu0 %v8055_v21  ;;  %5888 = vmatpush1.bf16.msra.mxu1 %v8058_v22  ;;  %v9350_v21 = vld.sshfl [vmem:[%s9105_s7 + $0x8] sm:$0xff pattern:$0x75316420]  ;;  %v8146_v22 = vld [vmem:[%s9053_s27 + $0x7c0] ss:$16 sps:$4 sm:$0xff]  }
  0xd1   : > { %5365 = vmatprep.subr.bf16.mxu0 %v8064_v23  ;;  %5898 = vmatprep.subr.bf16.mxu1 %v8067_v24  ;;  %v8149_v23 = vld [vmem:[%s9053_s27 + $0x7c8] ss:$16 sps:$4 sm:$0xff]   ;;  %v8154_v24 = vld [vmem:[%s9053_s27 + $0x7e4] ss:$16 sps:$4 sm:$0xff]  }
  0xd3   : > { %5357 = vmatmul.mubr.bf16.vlgmr.msra.gmra.mrb[0].mxu0 %v9288_v13  ;;  %5890 = vmatmul.mubr.bf16.vlgmr.msra.gmra.mrb[0].mxu1 %v9288_v13 }
  0xd4   : > { %5366 = vmatpush1.bf16.msra.mxu0 %v8062_v26  ;;  %5899 = vmatpush1.bf16.msra.mxu1 %v8065_v27  ;;  %v8157_v26 = vld [vmem:[%s9053_s27 + $0x7ec] ss:$16 sps:$4 sm:$0xff]   ;;  %v8152_v27 = vld [vmem:[%s9053_s27 + $0x7e0] ss:$16 sps:$4 sm:$0xff]  }
  0xd5   : > { %5367 = vmatprep.subr.bf16.mxu0 %v8070_v28  ;;  %5900 = vmatprep.subr.bf16.mxu1 %v8073_v29  ;;  %v8155_v28 = vld [vmem:[%s9053_s27 + $0x7e8] ss:$16 sps:$4 sm:$0xff]   ;;  %v8160_v29 = vld [vmem:[%s9053_s27 + $0x804] ss:$16 sps:$4 sm:$0xff]  }
  0xd6   : > { %5397 = vmatprep.mubr.bf16.mxu0 %v1181_v30  ;;  %5930 = vmatprep.mubr.bf16.mxu1 %v1181_v30  ;;  %v8163_v30 = vld [vmem:[%s9053_s27 + $0x80c] ss:$16 sps:$4 sm:$0xff]  }
  0xd8   : > { %5368 = vmatpush1.bf16.msra.mxu0 %v8068_v15  ;;  %5901 = vmatpush1.bf16.msra.mxu1 %v8071_v31  ;;  %v1197_v15 = vcombine.high %v9350_v21, %v9350_v21  ;;  %v1179_v31 = vcombine.high %v9288_v13, %v9288_v13  ;;  %v8164_v13 = vld [vmem:[%s9053_s27 + $0x820] ss:$16 sps:$4 sm:$0xff]  }
  0xd9   : > { %5369 = vmatprep.subr.bf16.mxu0 %v8076_v32  ;;  %5902 = vmatprep.subr.bf16.mxu1 %v8079_v33  ;;  %v8158_v32 = vld [vmem:[%s9053_s27 + $0x800] ss:$16 sps:$4 sm:$0xff]   ;;  %v8161_v33 = vld [vmem:[%s9053_s27 + $0x808] ss:$16 sps:$4 sm:$0xff]  }
  0xdc   : > { %5370 = vmatpush1.bf16.msra.mxu0 %v8074_v25  ;;  %5903 = vmatpush1.bf16.msra.mxu1 %v8077_v34  ;;  %v8166_v25 = vld [vmem:[%s9053_s27 + $0x824] ss:$16 sps:$4 sm:$0xff]   ;;  %v8169_v34 = vld [vmem:[%s9053_s27 + $0x82c] ss:$16 sps:$4 sm:$0xff]  }
  0xdd   : > { %5371 = vmatprep.subr.bf16.mxu0 %v8082_v35  ;;  %5904 = vmatprep.subr.bf16.mxu1 %v8085_v36  ;;  %v9369_v35 = vrot.slane %v1197_v15, %v9108_v49  ;;  %v8167_v36 = vld [vmem:[%s9053_s27 + $0x828] ss:$16 sps:$4 sm:$0xff]   ;;  %v8250_v15 = vld [vmem:[%s9053_s27 + $0x9e4] ss:$16 sps:$4 sm:$0xff]  }
  0xe0   : > { %5372 = vmatpush1.bf16.msra.mxu0 %v8080_v37  ;;  %5905 = vmatpush1.bf16.msra.mxu1 %v8083_v38  ;;  %v8172_v37 = vld [vmem:[%s9053_s27 + $0x844] ss:$16 sps:$4 sm:$0xff]   ;;  %v8175_v38 = vld [vmem:[%s9053_s27 + $0x84c] ss:$16 sps:$4 sm:$0xff]  }
  0xe1   : > { %5373 = vmatprep.subr.bf16.mxu0 %v8088_v39  ;;  %5906 = vmatprep.subr.bf16.mxu1 %v8091_v40  ;;  %v8170_v39 = vld [vmem:[%s9053_s27 + $0x840] ss:$16 sps:$4 sm:$0xff]   ;;  %v8173_v40 = vld [vmem:[%s9053_s27 + $0x848] ss:$16 sps:$4 sm:$0xff]  }
  0xe4   : > { %5374 = vmatpush1.bf16.msra.mxu0 %v8086_v41  ;;  %5907 = vmatpush1.bf16.msra.mxu1 %v8089_v43  ;;  %v8178_v41 = vld [vmem:[%s9053_s27 + $0x864] ss:$16 sps:$4 sm:$0xff]   ;;  %v8181_v43 = vld [vmem:[%s9053_s27 + $0x86c] ss:$16 sps:$4 sm:$0xff]  }
  0xe5   : > { %5375 = vmatprep.subr.bf16.mxu0 %v8094_v44  ;;  %5908 = vmatprep.subr.bf16.mxu1 %v8097_v45  ;;  %v8176_v44 = vld [vmem:[%s9053_s27 + $0x860] ss:$16 sps:$4 sm:$0xff]   ;;  %v8179_v45 = vld [vmem:[%s9053_s27 + $0x868] ss:$16 sps:$4 sm:$0xff]  }
  0xe8   : > { %5376 = vmatpush1.bf16.msra.mxu0 %v8092_v46  ;;  %5909 = vmatpush1.bf16.msra.mxu1 %v8095_v47  ;;  %v8184_v46 = vld [vmem:[%s9053_s27 + $0x884] ss:$16 sps:$4 sm:$0xff]   ;;  %v8187_v47 = vld [vmem:[%s9053_s27 + $0x88c] ss:$16 sps:$4 sm:$0xff]  }
  0xe9   : > { %5377 = vmatprep.subr.bf16.mxu0 %v8100_v48  ;;  %5910 = vmatprep.subr.bf16.mxu1 %v8103_v50  ;;  %v8182_v48 = vld [vmem:[%s9053_s27 + $0x880] ss:$16 sps:$4 sm:$0xff]   ;;  %v8185_v50 = vld [vmem:[%s9053_s27 + $0x888] ss:$16 sps:$4 sm:$0xff]  }
  0xec   : > { %5378 = vmatpush1.bf16.msra.mxu0 %v8098_v51  ;;  %5911 = vmatpush1.bf16.msra.mxu1 %v8101_v53  ;;  %v8190_v51 = vld [vmem:[%s9053_s27 + $0x8a4] ss:$16 sps:$4 sm:$0xff]   ;;  %v8193_v53 = vld [vmem:[%s9053_s27 + $0x8ac] ss:$16 sps:$4 sm:$0xff]  }
  0xed   : > { %5379 = vmatprep.subr.bf16.mxu0 %v8106_v54  ;;  %5912 = vmatprep.subr.bf16.mxu1 %v8109_v55  ;;  %v8188_v54 = vld [vmem:[%s9053_s27 + $0x8a0] ss:$16 sps:$4 sm:$0xff]   ;;  %v8191_v55 = vld [vmem:[%s9053_s27 + $0x8a8] ss:$16 sps:$4 sm:$0xff]  }
  0xf0   : > { %5380 = vmatpush1.bf16.msra.mxu0 %v8104_v56  ;;  %5913 = vmatpush1.bf16.msra.mxu1 %v8107_v57  ;;  %v8196_v56 = vld [vmem:[%s9053_s27 + $0x8c4] ss:$16 sps:$4 sm:$0xff]   ;;  %v8199_v57 = vld [vmem:[%s9053_s27 + $0x8cc] ss:$16 sps:$4 sm:$0xff]  }
  0xf1   : > { %5381 = vmatprep.subr.bf16.mxu0 %v8112_v58  ;;  %5914 = vmatprep.subr.bf16.mxu1 %v8115_v59  ;;  %v8194_v58 = vld [vmem:[%s9053_s27 + $0x8c0] ss:$16 sps:$4 sm:$0xff]   ;;  %v8197_v59 = vld [vmem:[%s9053_s27 + $0x8c8] ss:$16 sps:$4 sm:$0xff]  }
  0xf4   : > { %5382 = vmatpush1.bf16.msra.mxu0 %v8110_v60  ;;  %5915 = vmatpush1.bf16.msra.mxu1 %v8113_v61  ;;  %v8202_v60 = vld [vmem:[%s9053_s27 + $0x8e4] ss:$16 sps:$4 sm:$0xff]   ;;  %v8205_v61 = vld [vmem:[%s9053_s27 + $0x8ec] ss:$16 sps:$4 sm:$0xff]  }
  0xf5   : > { %5383 = vmatprep.subr.bf16.mxu0 %v8118_v62  ;;  %5916 = vmatprep.subr.bf16.mxu1 %v8121_v63  ;;  %v8200_v62 = vld [vmem:[%s9053_s27 + $0x8e0] ss:$16 sps:$4 sm:$0xff]   ;;  %v8203_v63 = vld [vmem:[%s9053_s27 + $0x8e8] ss:$16 sps:$4 sm:$0xff]  }
  0xf8   : > { %5384 = vmatpush1.bf16.msra.mxu0 %v8116_v0  ;;  %5917 = vmatpush1.bf16.msra.mxu1 %v8119_v1  ;;  %v8208_v0 = vld [vmem:[%s9053_s27 + $0x904] ss:$16 sps:$4 sm:$0xff]   ;;  %v8211_v1 = vld [vmem:[%s9053_s27 + $0x90c] ss:$16 sps:$4 sm:$0xff]  }
  0xf9   : > { %5385 = vmatprep.subr.bf16.mxu0 %v8124_v2  ;;  %5918 = vmatprep.subr.bf16.mxu1 %v8127_v3  ;;  %v8206_v2 = vld [vmem:[%s9053_s27 + $0x900] ss:$16 sps:$4 sm:$0xff]   ;;  %v8209_v3 = vld [vmem:[%s9053_s27 + $0x908] ss:$16 sps:$4 sm:$0xff]  }
  0xfc   : > { %5386 = vmatpush1.bf16.msra.mxu0 %v8122_v4  ;;  %5919 = vmatpush1.bf16.msra.mxu1 %v8125_v5  ;;  %v8214_v4 = vld [vmem:[%s9053_s27 + $0x924] ss:$16 sps:$4 sm:$0xff]   ;;  %v8217_v5 = vld [vmem:[%s9053_s27 + $0x92c] ss:$16 sps:$4 sm:$0xff]  }
  0xfd   : > { %5387 = vmatprep.subr.bf16.mxu0 %v8130_v6  ;;  %5920 = vmatprep.subr.bf16.mxu1 %v8133_v7  ;;  %v8212_v6 = vld [vmem:[%s9053_s27 + $0x920] ss:$16 sps:$4 sm:$0xff]   ;;  %v8215_v7 = vld [vmem:[%s9053_s27 + $0x928] ss:$16 sps:$4 sm:$0xff]  }
 0x100   : > { %5388 = vmatpush1.bf16.msra.mxu0 %v8128_v8  ;;  %5921 = vmatpush1.bf16.msra.mxu1 %v8131_v9  ;;  %v8220_v8 = vld [vmem:[%s9053_s27 + $0x944] ss:$16 sps:$4 sm:$0xff]   ;;  %v8223_v9 = vld [vmem:[%s9053_s27 + $0x94c] ss:$16 sps:$4 sm:$0xff]  }
 0x101   : > { %5389 = vmatprep.subr.bf16.mxu0 %v8136_v10  ;;  %5922 = vmatprep.subr.bf16.mxu1 %v8139_v11  ;;  %v8218_v10 = vld [vmem:[%s9053_s27 + $0x940] ss:$16 sps:$4 sm:$0xff]   ;;  %v8221_v11 = vld [vmem:[%s9053_s27 + $0x948] ss:$16 sps:$4 sm:$0xff]  }
 0x104   : > { %5390 = vmatpush1.bf16.msra.mxu0 %v8134_v12  ;;  %5923 = vmatpush1.bf16.msra.mxu1 %v8137_v14  ;;  %v8226_v12 = vld [vmem:[%s9053_s27 + $0x964] ss:$16 sps:$4 sm:$0xff]   ;;  %v8229_v14 = vld [vmem:[%s9053_s27 + $0x96c] ss:$16 sps:$4 sm:$0xff]  }
 0x105   : > { %5391 = vmatprep.subr.bf16.mxu0 %v8142_v16  ;;  %5924 = vmatprep.subr.bf16.mxu1 %v8145_v52  ;;  %v8224_v16 = vld [vmem:[%s9053_s27 + $0x960] ss:$16 sps:$4 sm:$0xff]   ;;  %v8227_v52 = vld [vmem:[%s9053_s27 + $0x968] ss:$16 sps:$4 sm:$0xff]  }
 0x108   : > { %5392 = vmatpush1.bf16.msra.mxu0 %v8140_v17  ;;  %5925 = vmatpush1.bf16.msra.mxu1 %v8143_v18  ;;  %v8232_v17 = vld [vmem:[%s9053_s27 + $0x984] ss:$16 sps:$4 sm:$0xff]   ;;  %v8235_v18 = vld [vmem:[%s9053_s27 + $0x98c] ss:$16 sps:$4 sm:$0xff]  }
 0x109   : > { %5393 = vmatprep.subr.bf16.mxu0 %v8148_v19  ;;  %5926 = vmatprep.subr.bf16.mxu1 %v8151_v20  ;;  %v8230_v19 = vld [vmem:[%s9053_s27 + $0x980] ss:$16 sps:$4 sm:$0xff]   ;;  %v8233_v20 = vld [vmem:[%s9053_s27 + $0x988] ss:$16 sps:$4 sm:$0xff]  }
 0x10c   : > { %5394 = vmatpush1.bf16.msra.mxu0 %v8146_v22  ;;  %5927 = vmatpush1.bf16.msra.mxu1 %v8149_v23  ;;  %v8238_v22 = vld [vmem:[%s9053_s27 + $0x9a4] ss:$16 sps:$4 sm:$0xff]   ;;  %v8241_v23 = vld [vmem:[%s9053_s27 + $0x9ac] ss:$16 sps:$4 sm:$0xff]  }
 0x10d   : > { %5395 = vmatprep.subr.bf16.mxu0 %v8154_v24  ;;  %5928 = vmatprep.subr.bf16.mxu1 %v8157_v26  ;;  %v8236_v24 = vld [vmem:[%s9053_s27 + $0x9a0] ss:$16 sps:$4 sm:$0xff]   ;;  %v8239_v26 = vld [vmem:[%s9053_s27 + $0x9a8] ss:$16 sps:$4 sm:$0xff]  }
 0x110   : > { %5396 = vmatpush1.bf16.msra.mxu0 %v8152_v27  ;;  %5929 = vmatpush1.bf16.msra.mxu1 %v8155_v28  ;;  %v8244_v27 = vld [vmem:[%s9053_s27 + $0x9c4] ss:$16 sps:$4 sm:$0xff]   ;;  %v8247_v28 = vld [vmem:[%s9053_s27 + $0x9cc] ss:$16 sps:$4 sm:$0xff]  }
 0x111   : > { %5406 = vmatprep.subr.bf16.mxu0 %v8160_v29  ;;  %5939 = vmatprep.subr.bf16.mxu1 %v8163_v30  ;;  %v8242_v29 = vld [vmem:[%s9053_s27 + $0x9c0] ss:$16 sps:$4 sm:$0xff]   ;;  %v8245_v30 = vld [vmem:[%s9053_s27 + $0x9c8] ss:$16 sps:$4 sm:$0xff]  }
 0x113   : > { %5398 = vmatmul.mubr.bf16.vlgmr.msra.gmra.mrb[0].mxu0 %v1179_v31  ;;  %5931 = vmatmul.mubr.bf16.vlgmr.msra.gmra.mrb[0].mxu1 %v1179_v31  ;;  %v8253_v31 = vld [vmem:[%s9053_s27 + $0x9ec] ss:$16 sps:$4 sm:$0xff]  }
 0x114   : > { %5407 = vmatpush1.bf16.msra.mxu0 %v8158_v32  ;;  %5940 = vmatpush1.bf16.msra.mxu1 %v8161_v33  ;;  %v8248_v32 = vld [vmem:[%s9053_s27 + $0x9e0] ss:$16 sps:$4 sm:$0xff]   ;;  %v8251_v33 = vld [vmem:[%s9053_s27 + $0x9e8] ss:$16 sps:$4 sm:$0xff]  }
 0x115   : > { %5408 = vmatprep.subr.bf16.mxu0 %v8166_v25  ;;  %5941 = vmatprep.subr.bf16.mxu1 %v8169_v34  ;;  %v8256_v25 = vld [vmem:[%s9053_s27 + $0xa04] ss:$16 sps:$4 sm:$0xff]   ;;  %v8259_v34 = vld [vmem:[%s9053_s27 + $0xa0c] ss:$16 sps:$4 sm:$0xff]  }
 0x116   : > { %5438 = vmatprep.mubr.bf16.mxu0 %v9369_v35  ;;  %5971 = vmatprep.mubr.bf16.mxu1 %v9369_v35 }
 0x118   : > { %5409 = vmatpush1.bf16.msra.mxu0 %v8164_v13  ;;  %5942 = vmatpush1.bf16.msra.mxu1 %v8167_v36  ;;  %v9435_v13 = vrot.slane %v9350_v21, %v9108_v49  ;;  %v8254_v36 = vld [vmem:[%s9053_s27 + $0xa00] ss:$16 sps:$4 sm:$0xff]  }
 0x119   : > { %5410 = vmatprep.subr.bf16.mxu0 %v8172_v37  ;;  %5943 = vmatprep.subr.bf16.mxu1 %v8175_v38  ;;  %v8257_v37 = vld [vmem:[%s9053_s27 + $0xa08] ss:$16 sps:$4 sm:$0xff]   ;;  %v8262_v38 = vld [vmem:[%s9053_s27 + $0xa24] ss:$16 sps:$4 sm:$0xff]   ;;  %v8260_v21 = vld [vmem:[%s9053_s27 + $0xa20] ss:$16 sps:$4 sm:$0xff]  }
 0x11c   : > { %5411 = vmatpush1.bf16.msra.mxu0 %v8170_v39  ;;  %5944 = vmatpush1.bf16.msra.mxu1 %v8173_v40  ;;  %v8265_v39 = vld [vmem:[%s9053_s27 + $0xa2c] ss:$16 sps:$4 sm:$0xff]   ;;  %v1229_v40 = vcombine.high %v9369_v35, %v9369_v35  ;;  %v8266_v35 = vld [vmem:[%s9053_s27 + $0xa40] ss:$16 sps:$4 sm:$0xff]  }
 0x11d   : > { %5412 = vmatprep.subr.bf16.mxu0 %v8178_v41  ;;  %5945 = vmatprep.subr.bf16.mxu1 %v8181_v43  ;;  %v8263_v41 = vld [vmem:[%s9053_s27 + $0xa28] ss:$16 sps:$4 sm:$0xff]   ;;  %v8268_v43 = vld [vmem:[%s9053_s27 + $0xa44] ss:$16 sps:$4 sm:$0xff]  }
 0x120   : > { %5413 = vmatpush1.bf16.msra.mxu0 %v8176_v44  ;;  %5946 = vmatpush1.bf16.msra.mxu1 %v8179_v45  ;;  %v8271_v44 = vld [vmem:[%s9053_s27 + $0xa4c] ss:$16 sps:$4 sm:$0xff]   ;;  %v8269_v45 = vld [vmem:[%s9053_s27 + $0xa48] ss:$16 sps:$4 sm:$0xff]  }
 0x121   : > { %5414 = vmatprep.subr.bf16.mxu0 %v8184_v46  ;;  %5947 = vmatprep.subr.bf16.mxu1 %v8187_v47  ;;  %v8274_v46 = vld [vmem:[%s9053_s27 + $0xa64] ss:$16 sps:$4 sm:$0xff]   ;;  %v8277_v47 = vld [vmem:[%s9053_s27 + $0xa6c] ss:$16 sps:$4 sm:$0xff]  }
 0x124   : > { %5415 = vmatpush1.bf16.msra.mxu0 %v8182_v48  ;;  %5948 = vmatpush1.bf16.msra.mxu1 %v8185_v50  ;;  %v8272_v48 = vld [vmem:[%s9053_s27 + $0xa60] ss:$16 sps:$4 sm:$0xff]   ;;  %v8275_v50 = vld [vmem:[%s9053_s27 + $0xa68] ss:$16 sps:$4 sm:$0xff]  }
 0x125   : > { %5416 = vmatprep.subr.bf16.mxu0 %v8190_v51  ;;  %5949 = vmatprep.subr.bf16.mxu1 %v8193_v53  ;;  %v8280_v51 = vld [vmem:[%s9053_s27 + $0xa84] ss:$16 sps:$4 sm:$0xff]   ;;  %v8283_v53 = vld [vmem:[%s9053_s27 + $0xa8c] ss:$16 sps:$4 sm:$0xff]  }
 0x128   : > { %5417 = vmatpush1.bf16.msra.mxu0 %v8188_v54  ;;  %5950 = vmatpush1.bf16.msra.mxu1 %v8191_v55  ;;  %v8278_v54 = vld [vmem:[%s9053_s27 + $0xa80] ss:$16 sps:$4 sm:$0xff]   ;;  %v8281_v55 = vld [vmem:[%s9053_s27 + $0xa88] ss:$16 sps:$4 sm:$0xff]  }
 0x129   : > { %5418 = vmatprep.subr.bf16.mxu0 %v8196_v56  ;;  %5951 = vmatprep.subr.bf16.mxu1 %v8199_v57  ;;  %v8286_v56 = vld [vmem:[%s9053_s27 + $0xaa4] ss:$16 sps:$4 sm:$0xff]   ;;  %v8289_v57 = vld [vmem:[%s9053_s27 + $0xaac] ss:$16 sps:$4 sm:$0xff]  }
 0x12c   : > { %5419 = vmatpush1.bf16.msra.mxu0 %v8194_v58  ;;  %5952 = vmatpush1.bf16.msra.mxu1 %v8197_v59  ;;  %v8284_v58 = vld [vmem:[%s9053_s27 + $0xaa0] ss:$16 sps:$4 sm:$0xff]   ;;  %v8287_v59 = vld [vmem:[%s9053_s27 + $0xaa8] ss:$16 sps:$4 sm:$0xff]  }
 0x12d   : > { %5420 = vmatprep.subr.bf16.mxu0 %v8202_v60  ;;  %5953 = vmatprep.subr.bf16.mxu1 %v8205_v61  ;;  %v8292_v60 = vld [vmem:[%s9053_s27 + $0xac4] ss:$16 sps:$4 sm:$0xff]   ;;  %v8295_v61 = vld [vmem:[%s9053_s27 + $0xacc] ss:$16 sps:$4 sm:$0xff]  }
 0x130   : > { %5421 = vmatpush1.bf16.msra.mxu0 %v8200_v62  ;;  %5954 = vmatpush1.bf16.msra.mxu1 %v8203_v63  ;;  %v8290_v62 = vld [vmem:[%s9053_s27 + $0xac0] ss:$16 sps:$4 sm:$0xff]   ;;  %v8293_v63 = vld [vmem:[%s9053_s27 + $0xac8] ss:$16 sps:$4 sm:$0xff]  }
 0x131   : > { %5422 = vmatprep.subr.bf16.mxu0 %v8208_v0  ;;  %5955 = vmatprep.subr.bf16.mxu1 %v8211_v1  ;;  %v8298_v0 = vld [vmem:[%s9053_s27 + $0xae4] ss:$16 sps:$4 sm:$0xff]   ;;  %v8301_v1 = vld [vmem:[%s9053_s27 + $0xaec] ss:$16 sps:$4 sm:$0xff]  }
 0x134   : > { %5423 = vmatpush1.bf16.msra.mxu0 %v8206_v2  ;;  %5956 = vmatpush1.bf16.msra.mxu1 %v8209_v3  ;;  %v8296_v2 = vld [vmem:[%s9053_s27 + $0xae0] ss:$16 sps:$4 sm:$0xff]   ;;  %v8299_v3 = vld [vmem:[%s9053_s27 + $0xae8] ss:$16 sps:$4 sm:$0xff]  }
 0x135   : > { %5424 = vmatprep.subr.bf16.mxu0 %v8214_v4  ;;  %5957 = vmatprep.subr.bf16.mxu1 %v8217_v5  ;;  %v8304_v4 = vld [vmem:[%s9053_s27 + $0xb04] ss:$16 sps:$4 sm:$0xff]   ;;  %v8307_v5 = vld [vmem:[%s9053_s27 + $0xb0c] ss:$16 sps:$4 sm:$0xff]  }
 0x138   : > { %5425 = vmatpush1.bf16.msra.mxu0 %v8212_v6  ;;  %5958 = vmatpush1.bf16.msra.mxu1 %v8215_v7  ;;  %v8302_v6 = vld [vmem:[%s9053_s27 + $0xb00] ss:$16 sps:$4 sm:$0xff]   ;;  %v8305_v7 = vld [vmem:[%s9053_s27 + $0xb08] ss:$16 sps:$4 sm:$0xff]  }
 0x139   : > { %5426 = vmatprep.subr.bf16.mxu0 %v8220_v8  ;;  %5959 = vmatprep.subr.bf16.mxu1 %v8223_v9  ;;  %v8310_v8 = vld [vmem:[%s9053_s27 + $0xb24] ss:$16 sps:$4 sm:$0xff]   ;;  %v8313_v9 = vld [vmem:[%s9053_s27 + $0xb2c] ss:$16 sps:$4 sm:$0xff]  }
 0x13c   : > { %5427 = vmatpush1.bf16.msra.mxu0 %v8218_v10  ;;  %5960 = vmatpush1.bf16.msra.mxu1 %v8221_v11  ;;  %v8308_v10 = vld [vmem:[%s9053_s27 + $0xb20] ss:$16 sps:$4 sm:$0xff]   ;;  %v8311_v11 = vld [vmem:[%s9053_s27 + $0xb28] ss:$16 sps:$4 sm:$0xff]  }
 0x13d   : > { %5428 = vmatprep.subr.bf16.mxu0 %v8226_v12  ;;  %5961 = vmatprep.subr.bf16.mxu1 %v8229_v14  ;;  %v8316_v12 = vld [vmem:[%s9053_s27 + $0xb44] ss:$16 sps:$4 sm:$0xff]   ;;  %v8319_v14 = vld [vmem:[%s9053_s27 + $0xb4c] ss:$16 sps:$4 sm:$0xff]  }
 0x140   : > { %5429 = vmatpush1.bf16.msra.mxu0 %v8224_v16  ;;  %5962 = vmatpush1.bf16.msra.mxu1 %v8227_v52  ;;  %v8314_v16 = vld [vmem:[%s9053_s27 + $0xb40] ss:$16 sps:$4 sm:$0xff]   ;;  %v8317_v52 = vld [vmem:[%s9053_s27 + $0xb48] ss:$16 sps:$4 sm:$0xff]  }
 0x141   : > { %5430 = vmatprep.subr.bf16.mxu0 %v8232_v17  ;;  %5963 = vmatprep.subr.bf16.mxu1 %v8235_v18  ;;  %v8322_v17 = vld [vmem:[%s9053_s27 + $0xb64] ss:$16 sps:$4 sm:$0xff]   ;;  %v8325_v18 = vld [vmem:[%s9053_s27 + $0xb6c] ss:$16 sps:$4 sm:$0xff]  }
 0x144   : > { %5431 = vmatpush1.bf16.msra.mxu0 %v8230_v19  ;;  %5964 = vmatpush1.bf16.msra.mxu1 %v8233_v20  ;;  %v8320_v19 = vld [vmem:[%s9053_s27 + $0xb60] ss:$16 sps:$4 sm:$0xff]   ;;  %v8323_v20 = vld [vmem:[%s9053_s27 + $0xb68] ss:$16 sps:$4 sm:$0xff]  }
 0x145   : > { %5432 = vmatprep.subr.bf16.mxu0 %v8238_v22  ;;  %5965 = vmatprep.subr.bf16.mxu1 %v8241_v23  ;;  %v8328_v22 = vld [vmem:[%s9053_s27 + $0xb84] ss:$16 sps:$4 sm:$0xff]   ;;  %v8331_v23 = vld [vmem:[%s9053_s27 + $0xb8c] ss:$16 sps:$4 sm:$0xff]  }
 0x148   : > { %5433 = vmatpush1.bf16.msra.mxu0 %v8236_v24  ;;  %5966 = vmatpush1.bf16.msra.mxu1 %v8239_v26  ;;  %v8326_v24 = vld [vmem:[%s9053_s27 + $0xb80] ss:$16 sps:$4 sm:$0xff]   ;;  %v8329_v26 = vld [vmem:[%s9053_s27 + $0xb88] ss:$16 sps:$4 sm:$0xff]  }
 0x149   : > { %5434 = vmatprep.subr.bf16.mxu0 %v8244_v27  ;;  %5967 = vmatprep.subr.bf16.mxu1 %v8247_v28  ;;  %v8334_v27 = vld [vmem:[%s9053_s27 + $0xba4] ss:$16 sps:$4 sm:$0xff]   ;;  %v8337_v28 = vld [vmem:[%s9053_s27 + $0xbac] ss:$16 sps:$4 sm:$0xff]  }
 0x14c   : > { %5435 = vmatpush1.bf16.msra.mxu0 %v8242_v29  ;;  %5968 = vmatpush1.bf16.msra.mxu1 %v8245_v30  ;;  %v8332_v29 = vld [vmem:[%s9053_s27 + $0xba0] ss:$16 sps:$4 sm:$0xff]   ;;  %v8335_v30 = vld [vmem:[%s9053_s27 + $0xba8] ss:$16 sps:$4 sm:$0xff]  }
 0x14d   : > { %5436 = vmatprep.subr.bf16.mxu0 %v8250_v15  ;;  %5969 = vmatprep.subr.bf16.mxu1 %v8253_v31  ;;  %v8340_v15 = vld [vmem:[%s9053_s27 + $0xbc4] ss:$16 sps:$4 sm:$0xff]   ;;  %v8343_v31 = vld [vmem:[%s9053_s27 + $0xbcc] ss:$16 sps:$4 sm:$0xff]  }
 0x150   : > { %5437 = vmatpush1.bf16.msra.mxu0 %v8248_v32  ;;  %5970 = vmatpush1.bf16.msra.mxu1 %v8251_v33  ;;  %v8988_v32 = vld [vmem:[%s9105_s7 + $0x8] sm:$0xff] }
 0x151   : > { %5447 = vmatprep.subr.bf16.mxu0 %v8256_v25  ;;  %5980 = vmatprep.subr.bf16.mxu1 %v8259_v34  ;;  %v1182_v33 = vcombine.high %v8988_v32, %v8988_v32  ;;  %v8338_v25 = vld [vmem:[%s9053_s27 + $0xbc0] ss:$16 sps:$4 sm:$0xff]   ;;  %v8341_v34 = vld [vmem:[%s9053_s27 + $0xbc8] ss:$16 sps:$4 sm:$0xff]  }
 0x152   : > { %v8422_v32 = vld [vmem:[%s9053_s27 + $0xd80] ss:$16 sps:$4 sm:$0xff]  }
 0x153   : > { %5439 = vmatmul.mubr.bf16.vlgmr.msra.gmra.mrb[0].mxu0 %v9435_v13  ;;  %5972 = vmatmul.mubr.bf16.vlgmr.msra.gmra.mrb[0].mxu1 %v9435_v13 }
 0x154   : > { %5448 = vmatpush1.bf16.msra.mxu0 %v8254_v36  ;;  %5981 = vmatpush1.bf16.msra.mxu1 %v8257_v37  ;;  %v8346_v36 = vld [vmem:[%s9053_s27 + $0xbe4] ss:$16 sps:$4 sm:$0xff]   ;;  %v8349_v37 = vld [vmem:[%s9053_s27 + $0xbec] ss:$16 sps:$4 sm:$0xff]  }
 0x155   : > { %5449 = vmatprep.subr.bf16.mxu0 %v8262_v38  ;;  %5982 = vmatprep.subr.bf16.mxu1 %v8265_v39  ;;  %v9503_v38 = vrot.slane %v1182_v33, %v9108_v49  ;;  %v8344_v39 = vld [vmem:[%s9053_s27 + $0xbe0] ss:$16 sps:$4 sm:$0xff]   ;;  %v8425_v33 = vld [vmem:[%s9053_s27 + $0xd88] ss:$16 sps:$4 sm:$0xff]  }
 0x156   : > { %5479 = vmatprep.mubr.bf16.mxu0 %v1229_v40  ;;  %6012 = vmatprep.mubr.bf16.mxu1 %v1229_v40  ;;  %v8347_v40 = vld [vmem:[%s9053_s27 + $0xbe8] ss:$16 sps:$4 sm:$0xff]  }
 0x158   : > { %5450 = vmatpush1.bf16.msra.mxu0 %v8260_v21  ;;  %5983 = vmatpush1.bf16.msra.mxu1 %v8263_v41  ;;  %v8352_v21 = vld [vmem:[%s9053_s27 + $0xc04] ss:$16 sps:$4 sm:$0xff]   ;;  %v8355_v41 = vld [vmem:[%s9053_s27 + $0xc0c] ss:$16 sps:$4 sm:$0xff]  }
 0x159   : > { %5451 = vmatprep.subr.bf16.mxu0 %v8268_v43  ;;  %5984 = vmatprep.subr.bf16.mxu1 %v8271_v44  ;;  %v1198_v43 = vcombine.high %v9503_v38, %v9503_v38  ;;  %v1227_v44 = vcombine.high %v9435_v13, %v9435_v13  ;;  %v8356_v13 = vld [vmem:[%s9053_s27 + $0xc20] ss:$16 sps:$4 sm:$0xff]  }
 0x15c   : > { %5452 = vmatpush1.bf16.msra.mxu0 %v8266_v35  ;;  %5985 = vmatpush1.bf16.msra.mxu1 %v8269_v45  ;;  %v8350_v35 = vld [vmem:[%s9053_s27 + $0xc00] ss:$16 sps:$4 sm:$0xff]   ;;  %v8353_v45 = vld [vmem:[%s9053_s27 + $0xc08] ss:$16 sps:$4 sm:$0xff]  }
 0x15d   : > { %5453 = vmatprep.subr.bf16.mxu0 %v8274_v46  ;;  %5986 = vmatprep.subr.bf16.mxu1 %v8277_v47  ;;  %v8358_v46 = vld [vmem:[%s9053_s27 + $0xc24] ss:$16 sps:$4 sm:$0xff]   ;;  %v8361_v47 = vld [vmem:[%s9053_s27 + $0xc2c] ss:$16 sps:$4 sm:$0xff]  }
 0x160   : > { %5454 = vmatpush1.bf16.msra.mxu0 %v8272_v48  ;;  %5987 = vmatpush1.bf16.msra.mxu1 %v8275_v50  ;;  %v9518_v48 = vrot.slane %v1198_v43, %v9108_v49  ;;  %v8359_v50 = vld [vmem:[%s9053_s27 + $0xc28] ss:$16 sps:$4 sm:$0xff]   ;;  %v8442_v43 = vld [vmem:[%s9053_s27 + $0xde4] ss:$16 sps:$4 sm:$0xff]  }
 0x161   : > { %5455 = vmatprep.subr.bf16.mxu0 %v8280_v51  ;;  %5988 = vmatprep.subr.bf16.mxu1 %v8283_v53  ;;  %v8364_v51 = vld [vmem:[%s9053_s27 + $0xc44] ss:$16 sps:$4 sm:$0xff]   ;;  %v8367_v53 = vld [vmem:[%s9053_s27 + $0xc4c] ss:$16 sps:$4 sm:$0xff]  }
 0x164   : > { %5456 = vmatpush1.bf16.msra.mxu0 %v8278_v54  ;;  %5989 = vmatpush1.bf16.msra.mxu1 %v8281_v55  ;;  %v8362_v54 = vld [vmem:[%s9053_s27 + $0xc40] ss:$16 sps:$4 sm:$0xff]   ;;  %v8365_v55 = vld [vmem:[%s9053_s27 + $0xc48] ss:$16 sps:$4 sm:$0xff]  }
 0x165   : > { %5457 = vmatprep.subr.bf16.mxu0 %v8286_v56  ;;  %5990 = vmatprep.subr.bf16.mxu1 %v8289_v57  ;;  %v8370_v56 = vld [vmem:[%s9053_s27 + $0xc64] ss:$16 sps:$4 sm:$0xff]   ;;  %v8373_v57 = vld [vmem:[%s9053_s27 + $0xc6c] ss:$16 sps:$4 sm:$0xff]  }
 0x168   : > { %5458 = vmatpush1.bf16.msra.mxu0 %v8284_v58  ;;  %5991 = vmatpush1.bf16.msra.mxu1 %v8287_v59  ;;  %v8368_v58 = vld [vmem:[%s9053_s27 + $0xc60] ss:$16 sps:$4 sm:$0xff]   ;;  %v8371_v59 = vld [vmem:[%s9053_s27 + $0xc68] ss:$16 sps:$4 sm:$0xff]  }
 0x169   : > { %5459 = vmatprep.subr.bf16.mxu0 %v8292_v60  ;;  %5992 = vmatprep.subr.bf16.mxu1 %v8295_v61  ;;  %v8376_v60 = vld [vmem:[%s9053_s27 + $0xc84] ss:$16 sps:$4 sm:$0xff]   ;;  %v8379_v61 = vld [vmem:[%s9053_s27 + $0xc8c] ss:$16 sps:$4 sm:$0xff]  }
 0x16c   : > { %5460 = vmatpush1.bf16.msra.mxu0 %v8290_v62  ;;  %5993 = vmatpush1.bf16.msra.mxu1 %v8293_v63  ;;  %v8374_v62 = vld [vmem:[%s9053_s27 + $0xc80] ss:$16 sps:$4 sm:$0xff]   ;;  %v8377_v63 = vld [vmem:[%s9053_s27 + $0xc88] ss:$16 sps:$4 sm:$0xff]  }
 0x16d   : > { %5461 = vmatprep.subr.bf16.mxu0 %v8298_v0  ;;  %5994 = vmatprep.subr.bf16.mxu1 %v8301_v1  ;;  %v8382_v0 = vld [vmem:[%s9053_s27 + $0xca4] ss:$16 sps:$4 sm:$0xff]   ;;  %v8385_v1 = vld [vmem:[%s9053_s27 + $0xcac] ss:$16 sps:$4 sm:$0xff]  }
 0x170   : > { %5462 = vmatpush1.bf16.msra.mxu0 %v8296_v2  ;;  %5995 = vmatpush1.bf16.msra.mxu1 %v8299_v3  ;;  %v8380_v2 = vld [vmem:[%s9053_s27 + $0xca0] ss:$16 sps:$4 sm:$0xff]   ;;  %v8383_v3 = vld [vmem:[%s9053_s27 + $0xca8] ss:$16 sps:$4 sm:$0xff]  }
 0x171   : > { %5463 = vmatprep.subr.bf16.mxu0 %v8304_v4  ;;  %5996 = vmatprep.subr.bf16.mxu1 %v8307_v5  ;;  %v8388_v4 = vld [vmem:[%s9053_s27 + $0xcc4] ss:$16 sps:$4 sm:$0xff]   ;;  %v8391_v5 = vld [vmem:[%s9053_s27 + $0xccc] ss:$16 sps:$4 sm:$0xff]  }
 0x174   : > { %5464 = vmatpush1.bf16.msra.mxu0 %v8302_v6  ;;  %5997 = vmatpush1.bf16.msra.mxu1 %v8305_v7  ;;  %v8386_v6 = vld [vmem:[%s9053_s27 + $0xcc0] ss:$16 sps:$4 sm:$0xff]   ;;  %v8389_v7 = vld [vmem:[%s9053_s27 + $0xcc8] ss:$16 sps:$4 sm:$0xff]  }
 0x175   : > { %5465 = vmatprep.subr.bf16.mxu0 %v8310_v8  ;;  %5998 = vmatprep.subr.bf16.mxu1 %v8313_v9  ;;  %v8394_v8 = vld [vmem:[%s9053_s27 + $0xce4] ss:$16 sps:$4 sm:$0xff]   ;;  %v8397_v9 = vld [vmem:[%s9053_s27 + $0xcec] ss:$16 sps:$4 sm:$0xff]  }
 0x178   : > { %5466 = vmatpush1.bf16.msra.mxu0 %v8308_v10  ;;  %5999 = vmatpush1.bf16.msra.mxu1 %v8311_v11  ;;  %v8392_v10 = vld [vmem:[%s9053_s27 + $0xce0] ss:$16 sps:$4 sm:$0xff]   ;;  %v8395_v11 = vld [vmem:[%s9053_s27 + $0xce8] ss:$16 sps:$4 sm:$0xff]  }
 0x179   : > { %5467 = vmatprep.subr.bf16.mxu0 %v8316_v12  ;;  %6000 = vmatprep.subr.bf16.mxu1 %v8319_v14  ;;  %v8400_v12 = vld [vmem:[%s9053_s27 + $0xd04] ss:$16 sps:$4 sm:$0xff]   ;;  %v8403_v14 = vld [vmem:[%s9053_s27 + $0xd0c] ss:$16 sps:$4 sm:$0xff]  }
 0x17c   : > { %5468 = vmatpush1.bf16.msra.mxu0 %v8314_v16  ;;  %6001 = vmatpush1.bf16.msra.mxu1 %v8317_v52  ;;  %v8398_v16 = vld [vmem:[%s9053_s27 + $0xd00] ss:$16 sps:$4 sm:$0xff]   ;;  %v8401_v52 = vld [vmem:[%s9053_s27 + $0xd08] ss:$16 sps:$4 sm:$0xff]  }
 0x17d   : > { %5469 = vmatprep.subr.bf16.mxu0 %v8322_v17  ;;  %6002 = vmatprep.subr.bf16.mxu1 %v8325_v18  ;;  %v8406_v17 = vld [vmem:[%s9053_s27 + $0xd24] ss:$16 sps:$4 sm:$0xff]   ;;  %v8409_v18 = vld [vmem:[%s9053_s27 + $0xd2c] ss:$16 sps:$4 sm:$0xff]  }
 0x180   : > { %5470 = vmatpush1.bf16.msra.mxu0 %v8320_v19  ;;  %6003 = vmatpush1.bf16.msra.mxu1 %v8323_v20  ;;  %v8404_v19 = vld [vmem:[%s9053_s27 + $0xd20] ss:$16 sps:$4 sm:$0xff]   ;;  %v8407_v20 = vld [vmem:[%s9053_s27 + $0xd28] ss:$16 sps:$4 sm:$0xff]  }
 0x181   : > { %5471 = vmatprep.subr.bf16.mxu0 %v8328_v22  ;;  %6004 = vmatprep.subr.bf16.mxu1 %v8331_v23  ;;  %v8412_v22 = vld [vmem:[%s9053_s27 + $0xd44] ss:$16 sps:$4 sm:$0xff]   ;;  %v8415_v23 = vld [vmem:[%s9053_s27 + $0xd4c] ss:$16 sps:$4 sm:$0xff]  }
 0x184   : > { %5472 = vmatpush1.bf16.msra.mxu0 %v8326_v24  ;;  %6005 = vmatpush1.bf16.msra.mxu1 %v8329_v26  ;;  %v8410_v24 = vld [vmem:[%s9053_s27 + $0xd40] ss:$16 sps:$4 sm:$0xff]   ;;  %v8413_v26 = vld [vmem:[%s9053_s27 + $0xd48] ss:$16 sps:$4 sm:$0xff]  }
 0x185   : > { %5473 = vmatprep.subr.bf16.mxu0 %v8334_v27  ;;  %6006 = vmatprep.subr.bf16.mxu1 %v8337_v28  ;;  %v8418_v27 = vld [vmem:[%s9053_s27 + $0xd64] ss:$16 sps:$4 sm:$0xff]   ;;  %v8421_v28 = vld [vmem:[%s9053_s27 + $0xd6c] ss:$16 sps:$4 sm:$0xff]  }
 0x188   : > { %5474 = vmatpush1.bf16.msra.mxu0 %v8332_v29  ;;  %6007 = vmatpush1.bf16.msra.mxu1 %v8335_v30  ;;  %v8416_v29 = vld [vmem:[%s9053_s27 + $0xd60] ss:$16 sps:$4 sm:$0xff]   ;;  %v8419_v30 = vld [vmem:[%s9053_s27 + $0xd68] ss:$16 sps:$4 sm:$0xff]  }
 0x189   : > { %5475 = vmatprep.subr.bf16.mxu0 %v8340_v15  ;;  %6008 = vmatprep.subr.bf16.mxu1 %v8343_v31  ;;  %v8424_v15 = vld [vmem:[%s9053_s27 + $0xd84] ss:$16 sps:$4 sm:$0xff]   ;;  %v8427_v31 = vld [vmem:[%s9053_s27 + $0xd8c] ss:$16 sps:$4 sm:$0xff]  }
 0x18c   : > { %5476 = vmatpush1.bf16.msra.mxu0 %v8338_v25  ;;  %6009 = vmatpush1.bf16.msra.mxu1 %v8341_v34  ;;  %v8430_v25 = vld [vmem:[%s9053_s27 + $0xda4] ss:$16 sps:$4 sm:$0xff]   ;;  %v8433_v34 = vld [vmem:[%s9053_s27 + $0xdac] ss:$16 sps:$4 sm:$0xff]  }
 0x18d   : > { %5477 = vmatprep.subr.bf16.mxu0 %v8346_v36  ;;  %6010 = vmatprep.subr.bf16.mxu1 %v8349_v37  ;;  %v8428_v36 = vld [vmem:[%s9053_s27 + $0xda0] ss:$16 sps:$4 sm:$0xff]   ;;  %v8431_v37 = vld [vmem:[%s9053_s27 + $0xda8] ss:$16 sps:$4 sm:$0xff]  }
 0x190   : > { %5478 = vmatpush1.bf16.msra.mxu0 %v8344_v39  ;;  %6011 = vmatpush1.bf16.msra.mxu1 %v8347_v40  ;;  %v8436_v39 = vld [vmem:[%s9053_s27 + $0xdc4] ss:$16 sps:$4 sm:$0xff]   ;;  %v8439_v40 = vld [vmem:[%s9053_s27 + $0xdcc] ss:$16 sps:$4 sm:$0xff]  }
 0x191   : > { %5488 = vmatprep.subr.bf16.mxu0 %v8352_v21  ;;  %6021 = vmatprep.subr.bf16.mxu1 %v8355_v41  ;;  %v8434_v21 = vld [vmem:[%s9053_s27 + $0xdc0] ss:$16 sps:$4 sm:$0xff]   ;;  %v8437_v41 = vld [vmem:[%s9053_s27 + $0xdc8] ss:$16 sps:$4 sm:$0xff]  }
 0x193   : > { %5480 = vmatmul.mubr.bf16.vlgmr.msra.gmra.mrb[0].mxu0 %v1227_v44  ;;  %6013 = vmatmul.mubr.bf16.vlgmr.msra.gmra.mrb[0].mxu1 %v1227_v44  ;;  %v8445_v44 = vld [vmem:[%s9053_s27 + $0xdec] ss:$16 sps:$4 sm:$0xff]  }
 0x194   : > { %5489 = vmatpush1.bf16.msra.mxu0 %v8350_v35  ;;  %6022 = vmatpush1.bf16.msra.mxu1 %v8353_v45  ;;  %v8440_v35 = vld [vmem:[%s9053_s27 + $0xde0] ss:$16 sps:$4 sm:$0xff]   ;;  %v8443_v45 = vld [vmem:[%s9053_s27 + $0xde8] ss:$16 sps:$4 sm:$0xff]  }
 0x195   : > { %5490 = vmatprep.subr.bf16.mxu0 %v8358_v46  ;;  %6023 = vmatprep.subr.bf16.mxu1 %v8361_v47  ;;  %v8449_v46 = vld [vmem:[%s9053_s27 + $0xe04] ss:$16 sps:$4 sm:$0xff]   ;;  %v8452_v47 = vld [vmem:[%s9053_s27 + $0xe0c] ss:$16 sps:$4 sm:$0xff]  }
 0x196   : > { %5520 = vmatprep.mubr.bf16.mxu0 %v9518_v48  ;;  %6053 = vmatprep.mubr.bf16.mxu1 %v9518_v48 }
 0x198   : > { %5491 = vmatpush1.bf16.msra.mxu0 %v8356_v13  ;;  %6024 = vmatpush1.bf16.msra.mxu1 %v8359_v50  ;;  %v9584_v13 = vrot.slane %v9503_v38, %v9108_v49  ;;  %v8447_v50 = vld [vmem:[%s9053_s27 + $0xe00] ss:$16 sps:$4 sm:$0xff]  }
 0x199   : > { %5492 = vmatprep.subr.bf16.mxu0 %v8364_v51  ;;  %6025 = vmatprep.subr.bf16.mxu1 %v8367_v53  ;;  %v8450_v51 = vld [vmem:[%s9053_s27 + $0xe08] ss:$16 sps:$4 sm:$0xff]   ;;  %v8455_v53 = vld [vmem:[%s9053_s27 + $0xe24] ss:$16 sps:$4 sm:$0xff]   ;;  %v8453_v38 = vld [vmem:[%s9053_s27 + $0xe20] ss:$16 sps:$4 sm:$0xff]  }
 0x19c   : > { %5493 = vmatpush1.bf16.msra.mxu0 %v8362_v54  ;;  %6026 = vmatpush1.bf16.msra.mxu1 %v8365_v55  ;;  %v8458_v54 = vld [vmem:[%s9053_s27 + $0xe2c] ss:$16 sps:$4 sm:$0xff]   ;;  %v1230_v55 = vcombine.high %v9518_v48, %v9518_v48  ;;  %v8459_v48 = vld [vmem:[%s9053_s27 + $0xe40] ss:$16 sps:$4 sm:$0xff]  }
 0x19d   : > { %5494 = vmatprep.subr.bf16.mxu0 %v8370_v56  ;;  %6027 = vmatprep.subr.bf16.mxu1 %v8373_v57  ;;  %v8456_v56 = vld [vmem:[%s9053_s27 + $0xe28] ss:$16 sps:$4 sm:$0xff]   ;;  %v8461_v57 = vld [vmem:[%s9053_s27 + $0xe44] ss:$16 sps:$4 sm:$0xff]  }
 0x1a0   : > { %5495 = vmatpush1.bf16.msra.mxu0 %v8368_v58  ;;  %6028 = vmatpush1.bf16.msra.mxu1 %v8371_v59  ;;  %v8464_v58 = vld [vmem:[%s9053_s27 + $0xe4c] ss:$16 sps:$4 sm:$0xff]   ;;  %v8462_v59 = vld [vmem:[%s9053_s27 + $0xe48] ss:$16 sps:$4 sm:$0xff]  }
 0x1a1   : > { %5496 = vmatprep.subr.bf16.mxu0 %v8376_v60  ;;  %6029 = vmatprep.subr.bf16.mxu1 %v8379_v61  ;;  %v8467_v60 = vld [vmem:[%s9053_s27 + $0xe64] ss:$16 sps:$4 sm:$0xff]   ;;  %v8470_v61 = vld [vmem:[%s9053_s27 + $0xe6c] ss:$16 sps:$4 sm:$0xff]  }
 0x1a4   : > { %5497 = vmatpush1.bf16.msra.mxu0 %v8374_v62  ;;  %6030 = vmatpush1.bf16.msra.mxu1 %v8377_v63  ;;  %v8465_v62 = vld [vmem:[%s9053_s27 + $0xe60] ss:$16 sps:$4 sm:$0xff]   ;;  %v8468_v63 = vld [vmem:[%s9053_s27 + $0xe68] ss:$16 sps:$4 sm:$0xff]  }
 0x1a5   : > { %5498 = vmatprep.subr.bf16.mxu0 %v8382_v0  ;;  %6031 = vmatprep.subr.bf16.mxu1 %v8385_v1  ;;  %v8473_v0 = vld [vmem:[%s9053_s27 + $0xe84] ss:$16 sps:$4 sm:$0xff]   ;;  %v8476_v1 = vld [vmem:[%s9053_s27 + $0xe8c] ss:$16 sps:$4 sm:$0xff]  }
 0x1a8   : > { %5499 = vmatpush1.bf16.msra.mxu0 %v8380_v2  ;;  %6032 = vmatpush1.bf16.msra.mxu1 %v8383_v3  ;;  %v8471_v2 = vld [vmem:[%s9053_s27 + $0xe80] ss:$16 sps:$4 sm:$0xff]   ;;  %v8474_v3 = vld [vmem:[%s9053_s27 + $0xe88] ss:$16 sps:$4 sm:$0xff]  }
 0x1a9   : > { %5500 = vmatprep.subr.bf16.mxu0 %v8388_v4  ;;  %6033 = vmatprep.subr.bf16.mxu1 %v8391_v5  ;;  %v8479_v4 = vld [vmem:[%s9053_s27 + $0xea4] ss:$16 sps:$4 sm:$0xff]   ;;  %v8482_v5 = vld [vmem:[%s9053_s27 + $0xeac] ss:$16 sps:$4 sm:$0xff]  }
 0x1ac   : > { %5501 = vmatpush1.bf16.msra.mxu0 %v8386_v6  ;;  %6034 = vmatpush1.bf16.msra.mxu1 %v8389_v7  ;;  %v8477_v6 = vld [vmem:[%s9053_s27 + $0xea0] ss:$16 sps:$4 sm:$0xff]   ;;  %v8480_v7 = vld [vmem:[%s9053_s27 + $0xea8] ss:$16 sps:$4 sm:$0xff]  }
 0x1ad   : > { %5502 = vmatprep.subr.bf16.mxu0 %v8394_v8  ;;  %6035 = vmatprep.subr.bf16.mxu1 %v8397_v9  ;;  %v8485_v8 = vld [vmem:[%s9053_s27 + $0xec4] ss:$16 sps:$4 sm:$0xff]   ;;  %v8488_v9 = vld [vmem:[%s9053_s27 + $0xecc] ss:$16 sps:$4 sm:$0xff]  }
 0x1b0   : > { %5503 = vmatpush1.bf16.msra.mxu0 %v8392_v10  ;;  %6036 = vmatpush1.bf16.msra.mxu1 %v8395_v11  ;;  %v8483_v10 = vld [vmem:[%s9053_s27 + $0xec0] ss:$16 sps:$4 sm:$0xff]   ;;  %v8486_v11 = vld [vmem:[%s9053_s27 + $0xec8] ss:$16 sps:$4 sm:$0xff]  }
 0x1b1   : > { %5504 = vmatprep.subr.bf16.mxu0 %v8400_v12  ;;  %6037 = vmatprep.subr.bf16.mxu1 %v8403_v14  ;;  %v8491_v12 = vld [vmem:[%s9053_s27 + $0xee4] ss:$16 sps:$4 sm:$0xff]   ;;  %v8494_v14 = vld [vmem:[%s9053_s27 + $0xeec] ss:$16 sps:$4 sm:$0xff]  }
 0x1b4   : > { %5505 = vmatpush1.bf16.msra.mxu0 %v8398_v16  ;;  %6038 = vmatpush1.bf16.msra.mxu1 %v8401_v52  ;;  %v8489_v16 = vld [vmem:[%s9053_s27 + $0xee0] ss:$16 sps:$4 sm:$0xff]   ;;  %v8492_v52 = vld [vmem:[%s9053_s27 + $0xee8] ss:$16 sps:$4 sm:$0xff]  }
 0x1b5   : > { %5506 = vmatprep.subr.bf16.mxu0 %v8406_v17  ;;  %6039 = vmatprep.subr.bf16.mxu1 %v8409_v18  ;;  %v8497_v17 = vld [vmem:[%s9053_s27 + $0xf04] ss:$16 sps:$4 sm:$0xff]   ;;  %v8500_v18 = vld [vmem:[%s9053_s27 + $0xf0c] ss:$16 sps:$4 sm:$0xff]  }
 0x1b8   : > { %5507 = vmatpush1.bf16.msra.mxu0 %v8404_v19  ;;  %6040 = vmatpush1.bf16.msra.mxu1 %v8407_v20  ;;  %v8495_v19 = vld [vmem:[%s9053_s27 + $0xf00] ss:$16 sps:$4 sm:$0xff]   ;;  %v8498_v20 = vld [vmem:[%s9053_s27 + $0xf08] ss:$16 sps:$4 sm:$0xff]  }
 0x1b9   : > { %5508 = vmatprep.subr.bf16.mxu0 %v8412_v22  ;;  %6041 = vmatprep.subr.bf16.mxu1 %v8415_v23  ;;  %v8503_v22 = vld [vmem:[%s9053_s27 + $0xf24] ss:$16 sps:$4 sm:$0xff]   ;;  %v8506_v23 = vld [vmem:[%s9053_s27 + $0xf2c] ss:$16 sps:$4 sm:$0xff]  }
 0x1bc   : > { %5509 = vmatpush1.bf16.msra.mxu0 %v8410_v24  ;;  %6042 = vmatpush1.bf16.msra.mxu1 %v8413_v26  ;;  %v8501_v24 = vld [vmem:[%s9053_s27 + $0xf20] ss:$16 sps:$4 sm:$0xff]   ;;  %v8504_v26 = vld [vmem:[%s9053_s27 + $0xf28] ss:$16 sps:$4 sm:$0xff]  }
 0x1bd   : > { %5510 = vmatprep.subr.bf16.mxu0 %v8418_v27  ;;  %6043 = vmatprep.subr.bf16.mxu1 %v8421_v28  ;;  %v8509_v27 = vld [vmem:[%s9053_s27 + $0xf44] ss:$16 sps:$4 sm:$0xff]   ;;  %v8512_v28 = vld [vmem:[%s9053_s27 + $0xf4c] ss:$16 sps:$4 sm:$0xff]  }
 0x1c0   : > { %5511 = vmatpush1.bf16.msra.mxu0 %v8416_v29  ;;  %6044 = vmatpush1.bf16.msra.mxu1 %v8419_v30  ;;  %v8507_v29 = vld [vmem:[%s9053_s27 + $0xf40] ss:$16 sps:$4 sm:$0xff]   ;;  %v8510_v30 = vld [vmem:[%s9053_s27 + $0xf48] ss:$16 sps:$4 sm:$0xff]  }
 0x1c1   : > { %5512 = vmatprep.subr.bf16.mxu0 %v8424_v15  ;;  %6045 = vmatprep.subr.bf16.mxu1 %v8427_v31  ;;  %v8515_v15 = vld [vmem:[%s9053_s27 + $0xf64] ss:$16 sps:$4 sm:$0xff]   ;;  %v8518_v31 = vld [vmem:[%s9053_s27 + $0xf6c] ss:$16 sps:$4 sm:$0xff]  }
 0x1c4   : > { %5513 = vmatpush1.bf16.msra.mxu0 %v8422_v32  ;;  %6046 = vmatpush1.bf16.msra.mxu1 %v8425_v33  ;;  %v8513_v32 = vld [vmem:[%s9053_s27 + $0xf60] ss:$16 sps:$4 sm:$0xff]   ;;  %v8516_v33 = vld [vmem:[%s9053_s27 + $0xf68] ss:$16 sps:$4 sm:$0xff]  }
 0x1c5   : > { %5514 = vmatprep.subr.bf16.mxu0 %v8430_v25  ;;  %6047 = vmatprep.subr.bf16.mxu1 %v8433_v34  ;;  %v8521_v25 = vld [vmem:[%s9053_s27 + $0xf84] ss:$16 sps:$4 sm:$0xff]   ;;  %v8524_v34 = vld [vmem:[%s9053_s27 + $0xf8c] ss:$16 sps:$4 sm:$0xff]  }
 0x1c8   : > { %5515 = vmatpush1.bf16.msra.mxu0 %v8428_v36  ;;  %6048 = vmatpush1.bf16.msra.mxu1 %v8431_v37  ;;  %v8519_v36 = vld [vmem:[%s9053_s27 + $0xf80] ss:$16 sps:$4 sm:$0xff]   ;;  %v8522_v37 = vld [vmem:[%s9053_s27 + $0xf88] ss:$16 sps:$4 sm:$0xff]  }
 0x1c9   : > { %5516 = vmatprep.subr.bf16.mxu0 %v8436_v39  ;;  %6049 = vmatprep.subr.bf16.mxu1 %v8439_v40  ;;  %v8527_v39 = vld [vmem:[%s9053_s27 + $0xfa4] ss:$16 sps:$4 sm:$0xff]   ;;  %v8530_v40 = vld [vmem:[%s9053_s27 + $0xfac] ss:$16 sps:$4 sm:$0xff]  }
 0x1cc   : > { %5517 = vmatpush1.bf16.msra.mxu0 %v8434_v21  ;;  %6050 = vmatpush1.bf16.msra.mxu1 %v8437_v41  ;;  %v8525_v21 = vld [vmem:[%s9053_s27 + $0xfa0] ss:$16 sps:$4 sm:$0xff]   ;;  %v8528_v41 = vld [vmem:[%s9053_s27 + $0xfa8] ss:$16 sps:$4 sm:$0xff]  }
 0x1cd   : > { %5518 = vmatprep.subr.bf16.mxu0 %v8442_v43  ;;  %6051 = vmatprep.subr.bf16.mxu1 %v8445_v44  ;;  %v8533_v43 = vld [vmem:[%s9053_s27 + $0xfc4] ss:$16 sps:$4 sm:$0xff]   ;;  %v8536_v44 = vld [vmem:[%s9053_s27 + $0xfcc] ss:$16 sps:$4 sm:$0xff]  }
 0x1d0   : > { %5519 = vmatpush1.bf16.msra.mxu0 %v8440_v35  ;;  %6052 = vmatpush1.bf16.msra.mxu1 %v8443_v45  ;;  %v9647_v35 = vld [vmem:[%s9105_s7 + $0x10] sm:$0xff] }
 0x1d1   : > { %5529 = vmatprep.subr.bf16.mxu0 %v8449_v46  ;;  %6062 = vmatprep.subr.bf16.mxu1 %v8452_v47  ;;  %v8531_v45 = vld [vmem:[%s9053_s27 + $0xfc0] ss:$16 sps:$4 sm:$0xff]   ;;  %v8534_v46 = vld [vmem:[%s9053_s27 + $0xfc8] ss:$16 sps:$4 sm:$0xff]   ;;  %v8539_v47 = vld [vmem:[%s9053_s27 + $0xfe4] ss:$16 sps:$4 sm:$0xff]  }
 0x1d3   : > { %5521 = vmatmul.mubr.bf16.vlgmr.msra.gmra.mrb[0].mxu0 %v9584_v13  ;;  %6054 = vmatmul.mubr.bf16.vlgmr.msra.gmra.mrb[0].mxu1 %v9584_v13 }
 0x1d4   : > { %5530 = vmatpush1.bf16.msra.mxu0 %v8447_v50  ;;  %6063 = vmatpush1.bf16.msra.mxu1 %v8450_v51  ;;  %v8542_v50 = vld [vmem:[%s9053_s27 + $0xfec] ss:$16 sps:$4 sm:$0xff]   ;;  %v9655_v51 = vrot.slane %v9647_v35, %v9108_v49 }
 0x1d5   : > { %5531 = vmatprep.subr.bf16.mxu0 %v8455_v53  ;;  %6064 = vmatprep.subr.bf16.mxu1 %v8458_v54  ;;  %v8537_v53 = vld [vmem:[%s9053_s27 + $0xfe0] ss:$16 sps:$4 sm:$0xff]   ;;  %v8540_v54 = vld [vmem:[%s9053_s27 + $0xfe8] ss:$16 sps:$4 sm:$0xff]  }
 0x1d6   : > { %5561 = vmatprep.mubr.bf16.mxu0 %v1230_v55  ;;  %6094 = vmatprep.mubr.bf16.mxu1 %v1230_v55  ;;  %v8545_v55 = vld [vmem:[%s9053_s27 + $0x1004] ss:$16 sps:$4 sm:$0xff]  }
 0x1d8   : > { %5532 = vmatpush1.bf16.msra.mxu0 %v8453_v38  ;;  %6065 = vmatpush1.bf16.msra.mxu1 %v8456_v56  ;;  %v8548_v38 = vld [vmem:[%s9053_s27 + $0x100c] ss:$16 sps:$4 sm:$0xff]   ;;  %v1246_v56 = vcombine.high %v9655_v51, %v9655_v51 }
 0x1d9   : > { %5533 = vmatprep.subr.bf16.mxu0 %v8461_v57  ;;  %6066 = vmatprep.subr.bf16.mxu1 %v8464_v58  ;;  %v1228_v57 = vcombine.high %v9584_v13, %v9584_v13  ;;  %v8543_v58 = vld [vmem:[%s9053_s27 + $0x1000] ss:$16 sps:$4 sm:$0xff]  }
 0x1da   : > { %v8549_v13 = vld [vmem:[%s9053_s27 + $0x1020] ss:$16 sps:$4 sm:$0xff]  }
 0x1dc   : > { %5534 = vmatpush1.bf16.msra.mxu0 %v8459_v48  ;;  %6067 = vmatpush1.bf16.msra.mxu1 %v8462_v59  ;;  %v8546_v48 = vld [vmem:[%s9053_s27 + $0x1008] ss:$16 sps:$4 sm:$0xff]   ;;  %v8551_v59 = vld [vmem:[%s9053_s27 + $0x1024] ss:$16 sps:$4 sm:$0xff]  }
 0x1dd   : > { %5535 = vmatprep.subr.bf16.mxu0 %v8467_v60  ;;  %6068 = vmatprep.subr.bf16.mxu1 %v8470_v61  ;;  %v8554_v60 = vld [vmem:[%s9053_s27 + $0x102c] ss:$16 sps:$4 sm:$0xff]   ;;  %v9670_v61 = vrot.slane %v1246_v56, %v9108_v49  ;;  %v8630_v56 = vld [vmem:[%s9053_s27 + $0x11c8] ss:$16 sps:$4 sm:$0xff]  }
 0x1e0   : > { %5536 = vmatpush1.bf16.msra.mxu0 %v8465_v62  ;;  %6069 = vmatpush1.bf16.msra.mxu1 %v8468_v63  ;;  %v8552_v62 = vld [vmem:[%s9053_s27 + $0x1028] ss:$16 sps:$4 sm:$0xff]   ;;  %v8557_v63 = vld [vmem:[%s9053_s27 + $0x1044] ss:$16 sps:$4 sm:$0xff]  }
 0x1e1   : > { %5537 = vmatprep.subr.bf16.mxu0 %v8473_v0  ;;  %6070 = vmatprep.subr.bf16.mxu1 %v8476_v1  ;;  %v8560_v0 = vld [vmem:[%s9053_s27 + $0x104c] ss:$16 sps:$4 sm:$0xff]   ;;  %v8555_v1 = vld [vmem:[%s9053_s27 + $0x1040] ss:$16 sps:$4 sm:$0xff]  }
 0x1e4   : > { %5538 = vmatpush1.bf16.msra.mxu0 %v8471_v2  ;;  %6071 = vmatpush1.bf16.msra.mxu1 %v8474_v3  ;;  %v8558_v2 = vld [vmem:[%s9053_s27 + $0x1048] ss:$16 sps:$4 sm:$0xff]   ;;  %v8563_v3 = vld [vmem:[%s9053_s27 + $0x1064] ss:$16 sps:$4 sm:$0xff]  }
 0x1e5   : > { %5539 = vmatprep.subr.bf16.mxu0 %v8479_v4  ;;  %6072 = vmatprep.subr.bf16.mxu1 %v8482_v5  ;;  %v8566_v4 = vld [vmem:[%s9053_s27 + $0x106c] ss:$16 sps:$4 sm:$0xff]   ;;  %v8561_v5 = vld [vmem:[%s9053_s27 + $0x1060] ss:$16 sps:$4 sm:$0xff]  }
 0x1e8   : > { %5540 = vmatpush1.bf16.msra.mxu0 %v8477_v6  ;;  %6073 = vmatpush1.bf16.msra.mxu1 %v8480_v7  ;;  %v8564_v6 = vld [vmem:[%s9053_s27 + $0x1068] ss:$16 sps:$4 sm:$0xff]   ;;  %v8569_v7 = vld [vmem:[%s9053_s27 + $0x1084] ss:$16 sps:$4 sm:$0xff]  }
 0x1e9   : > { %5541 = vmatprep.subr.bf16.mxu0 %v8485_v8  ;;  %6074 = vmatprep.subr.bf16.mxu1 %v8488_v9  ;;  %v8572_v8 = vld [vmem:[%s9053_s27 + $0x108c] ss:$16 sps:$4 sm:$0xff]   ;;  %v8567_v9 = vld [vmem:[%s9053_s27 + $0x1080] ss:$16 sps:$4 sm:$0xff]  }
 0x1ec   : > { %5542 = vmatpush1.bf16.msra.mxu0 %v8483_v10  ;;  %6075 = vmatpush1.bf16.msra.mxu1 %v8486_v11  ;;  %v8570_v10 = vld [vmem:[%s9053_s27 + $0x1088] ss:$16 sps:$4 sm:$0xff]   ;;  %v8575_v11 = vld [vmem:[%s9053_s27 + $0x10a4] ss:$16 sps:$4 sm:$0xff]  }
 0x1ed   : > { %5543 = vmatprep.subr.bf16.mxu0 %v8491_v12  ;;  %6076 = vmatprep.subr.bf16.mxu1 %v8494_v14  ;;  %v8578_v12 = vld [vmem:[%s9053_s27 + $0x10ac] ss:$16 sps:$4 sm:$0xff]   ;;  %v8573_v14 = vld [vmem:[%s9053_s27 + $0x10a0] ss:$16 sps:$4 sm:$0xff]  }
 0x1f0   : > { %5544 = vmatpush1.bf16.msra.mxu0 %v8489_v16  ;;  %6077 = vmatpush1.bf16.msra.mxu1 %v8492_v52  ;;  %v8576_v16 = vld [vmem:[%s9053_s27 + $0x10a8] ss:$16 sps:$4 sm:$0xff]   ;;  %v8581_v52 = vld [vmem:[%s9053_s27 + $0x10c4] ss:$16 sps:$4 sm:$0xff]  }
 0x1f1   : > { %5545 = vmatprep.subr.bf16.mxu0 %v8497_v17  ;;  %6078 = vmatprep.subr.bf16.mxu1 %v8500_v18  ;;  %v8584_v17 = vld [vmem:[%s9053_s27 + $0x10cc] ss:$16 sps:$4 sm:$0xff]   ;;  %v8579_v18 = vld [vmem:[%s9053_s27 + $0x10c0] ss:$16 sps:$4 sm:$0xff]  }
 0x1f4   : > { %5546 = vmatpush1.bf16.msra.mxu0 %v8495_v19  ;;  %6079 = vmatpush1.bf16.msra.mxu1 %v8498_v20  ;;  %v8582_v19 = vld [vmem:[%s9053_s27 + $0x10c8] ss:$16 sps:$4 sm:$0xff]   ;;  %v8587_v20 = vld [vmem:[%s9053_s27 + $0x10e4] ss:$16 sps:$4 sm:$0xff]  }
 0x1f5   : > { %5547 = vmatprep.subr.bf16.mxu0 %v8503_v22  ;;  %6080 = vmatprep.subr.bf16.mxu1 %v8506_v23  ;;  %v8590_v22 = vld [vmem:[%s9053_s27 + $0x10ec] ss:$16 sps:$4 sm:$0xff]   ;;  %v8585_v23 = vld [vmem:[%s9053_s27 + $0x10e0] ss:$16 sps:$4 sm:$0xff]  }
 0x1f8   : > { %5548 = vmatpush1.bf16.msra.mxu0 %v8501_v24  ;;  %6081 = vmatpush1.bf16.msra.mxu1 %v8504_v26  ;;  %v8588_v24 = vld [vmem:[%s9053_s27 + $0x10e8] ss:$16 sps:$4 sm:$0xff]   ;;  %v8593_v26 = vld [vmem:[%s9053_s27 + $0x1104] ss:$16 sps:$4 sm:$0xff]  }
 0x1f9   : > { %5549 = vmatprep.subr.bf16.mxu0 %v8509_v27  ;;  %6082 = vmatprep.subr.bf16.mxu1 %v8512_v28  ;;  %v8596_v27 = vld [vmem:[%s9053_s27 + $0x110c] ss:$16 sps:$4 sm:$0xff]   ;;  %v8591_v28 = vld [vmem:[%s9053_s27 + $0x1100] ss:$16 sps:$4 sm:$0xff]  }
 0x1fc   : > { %5550 = vmatpush1.bf16.msra.mxu0 %v8507_v29  ;;  %6083 = vmatpush1.bf16.msra.mxu1 %v8510_v30  ;;  %v8594_v29 = vld [vmem:[%s9053_s27 + $0x1108] ss:$16 sps:$4 sm:$0xff]   ;;  %v8599_v30 = vld [vmem:[%s9053_s27 + $0x1124] ss:$16 sps:$4 sm:$0xff]  }
 0x1fd   : > { %5551 = vmatprep.subr.bf16.mxu0 %v8515_v15  ;;  %6084 = vmatprep.subr.bf16.mxu1 %v8518_v31  ;;  %v8602_v15 = vld [vmem:[%s9053_s27 + $0x112c] ss:$16 sps:$4 sm:$0xff]   ;;  %v8597_v31 = vld [vmem:[%s9053_s27 + $0x1120] ss:$16 sps:$4 sm:$0xff]  }
 0x200   : > { %5552 = vmatpush1.bf16.msra.mxu0 %v8513_v32  ;;  %6085 = vmatpush1.bf16.msra.mxu1 %v8516_v33  ;;  %v8600_v32 = vld [vmem:[%s9053_s27 + $0x1128] ss:$16 sps:$4 sm:$0xff]   ;;  %v8605_v33 = vld [vmem:[%s9053_s27 + $0x1144] ss:$16 sps:$4 sm:$0xff]  }
 0x201   : > { %5553 = vmatprep.subr.bf16.mxu0 %v8521_v25  ;;  %6086 = vmatprep.subr.bf16.mxu1 %v8524_v34  ;;  %v8608_v25 = vld [vmem:[%s9053_s27 + $0x114c] ss:$16 sps:$4 sm:$0xff]   ;;  %v8603_v34 = vld [vmem:[%s9053_s27 + $0x1140] ss:$16 sps:$4 sm:$0xff]  }
 0x204   : > { %5554 = vmatpush1.bf16.msra.mxu0 %v8519_v36  ;;  %6087 = vmatpush1.bf16.msra.mxu1 %v8522_v37  ;;  %v8606_v36 = vld [vmem:[%s9053_s27 + $0x1148] ss:$16 sps:$4 sm:$0xff]   ;;  %v8611_v37 = vld [vmem:[%s9053_s27 + $0x1164] ss:$16 sps:$4 sm:$0xff]  }
 0x205   : > { %5555 = vmatprep.subr.bf16.mxu0 %v8527_v39  ;;  %6088 = vmatprep.subr.bf16.mxu1 %v8530_v40  ;;  %v8614_v39 = vld [vmem:[%s9053_s27 + $0x116c] ss:$16 sps:$4 sm:$0xff]   ;;  %v8609_v40 = vld [vmem:[%s9053_s27 + $0x1160] ss:$16 sps:$4 sm:$0xff]  }
 0x208   : > { %5556 = vmatpush1.bf16.msra.mxu0 %v8525_v21  ;;  %6089 = vmatpush1.bf16.msra.mxu1 %v8528_v41  ;;  %v8612_v21 = vld [vmem:[%s9053_s27 + $0x1168] ss:$16 sps:$4 sm:$0xff]   ;;  %v8617_v41 = vld [vmem:[%s9053_s27 + $0x1184] ss:$16 sps:$4 sm:$0xff]  }
 0x209   : > { %5557 = vmatprep.subr.bf16.mxu0 %v8533_v43  ;;  %6090 = vmatprep.subr.bf16.mxu1 %v8536_v44  ;;  %v8620_v43 = vld [vmem:[%s9053_s27 + $0x118c] ss:$16 sps:$4 sm:$0xff]   ;;  %v8615_v44 = vld [vmem:[%s9053_s27 + $0x1180] ss:$16 sps:$4 sm:$0xff]  }
 0x20c   : > { %5558 = vmatpush1.bf16.msra.mxu0 %v8531_v45  ;;  %6091 = vmatpush1.bf16.msra.mxu1 %v8534_v46  ;;  %v8618_v45 = vld [vmem:[%s9053_s27 + $0x1188] ss:$16 sps:$4 sm:$0xff]   ;;  %v8623_v46 = vld [vmem:[%s9053_s27 + $0x11a4] ss:$16 sps:$4 sm:$0xff]  }
 0x20d   : > { %5559 = vmatprep.subr.bf16.mxu0 %v8539_v47  ;;  %6092 = vmatprep.subr.bf16.mxu1 %v8542_v50  ;;  %v8626_v47 = vld [vmem:[%s9053_s27 + $0x11ac] ss:$16 sps:$4 sm:$0xff]   ;;  %v8621_v50 = vld [vmem:[%s9053_s27 + $0x11a0] ss:$16 sps:$4 sm:$0xff]  }
 0x210   : > { %5560 = vmatpush1.bf16.msra.mxu0 %v8537_v53  ;;  %6093 = vmatpush1.bf16.msra.mxu1 %v8540_v54  ;;  %v8624_v53 = vld [vmem:[%s9053_s27 + $0x11a8] ss:$16 sps:$4 sm:$0xff]   ;;  %v8629_v54 = vld [vmem:[%s9053_s27 + $0x11c4] ss:$16 sps:$4 sm:$0xff]  }
 0x211   : > { %5570 = vmatprep.subr.bf16.mxu0 %v8545_v55  ;;  %6103 = vmatprep.subr.bf16.mxu1 %v8548_v38  ;;  %v8632_v55 = vld [vmem:[%s9053_s27 + $0x11cc] ss:$16 sps:$4 sm:$0xff]   ;;  %v8627_v38 = vld [vmem:[%s9053_s27 + $0x11c0] ss:$16 sps:$4 sm:$0xff]  }
 0x213   : > { %5562 = vmatmul.mubr.bf16.vlgmr.msra.gmra.mrb[0].mxu0 %v1228_v57  ;;  %6095 = vmatmul.mubr.bf16.vlgmr.msra.gmra.mrb[0].mxu1 %v1228_v57  ;;  %v8635_v57 = vld [vmem:[%s9053_s27 + $0x11e4] ss:$16 sps:$4 sm:$0xff]  }
 0x214   : > { %5571 = vmatpush1.bf16.msra.mxu0 %v8543_v58  ;;  %6104 = vmatpush1.bf16.msra.mxu1 %v8546_v48  ;;  %v8638_v58 = vld [vmem:[%s9053_s27 + $0x11ec] ss:$16 sps:$4 sm:$0xff]   ;;  %v8633_v48 = vld [vmem:[%s9053_s27 + $0x11e0] ss:$16 sps:$4 sm:$0xff]  }
 0x215   : > { %5572 = vmatprep.subr.bf16.mxu0 %v8551_v59  ;;  %6105 = vmatprep.subr.bf16.mxu1 %v8554_v60  ;;  %v8636_v59 = vld [vmem:[%s9053_s27 + $0x11e8] ss:$16 sps:$4 sm:$0xff]   ;;  %v8641_v60 = vld [vmem:[%s9053_s27 + $0x1204] ss:$16 sps:$4 sm:$0xff]  }
 0x216   : > { %5602 = vmatprep.mubr.bf16.mxu0 %v9670_v61  ;;  %6135 = vmatprep.mubr.bf16.mxu1 %v9670_v61 }
 0x218   : > { %5573 = vmatpush1.bf16.msra.mxu0 %v8549_v13  ;;  %6106 = vmatpush1.bf16.msra.mxu1 %v8552_v62  ;;  %v8644_v13 = vld [vmem:[%s9053_s27 + $0x120c] ss:$16 sps:$4 sm:$0xff]   ;;  %v9736_v62 = vrot.slane %v9655_v51, %v9108_v49  ;;  %v8645_v51 = vld [vmem:[%s9053_s27 + $0x1220] ss:$16 sps:$4 sm:$0xff]  }
 0x219   : > { %5574 = vmatprep.subr.bf16.mxu0 %v8557_v63  ;;  %6107 = vmatprep.subr.bf16.mxu1 %v8560_v0  ;;  %v8639_v63 = vld [vmem:[%s9053_s27 + $0x1200] ss:$16 sps:$4 sm:$0xff]   ;;  %v8642_v0 = vld [vmem:[%s9053_s27 + $0x1208] ss:$16 sps:$4 sm:$0xff]  }
 0x21c   : > { %5575 = vmatpush1.bf16.msra.mxu0 %v8555_v1  ;;  %6108 = vmatpush1.bf16.msra.mxu1 %v8558_v2  ;;  %v8647_v1 = vld [vmem:[%s9053_s27 + $0x1224] ss:$16 sps:$4 sm:$0xff]   ;;  %v8650_v2 = vld [vmem:[%s9053_s27 + $0x122c] ss:$16 sps:$4 sm:$0xff]  }
 0x21d   : > { %5576 = vmatprep.subr.bf16.mxu0 %v8563_v3  ;;  %6109 = vmatprep.subr.bf16.mxu1 %v8566_v4  ;;  %v1278_v3 = vcombine.high %v9670_v61, %v9670_v61  ;;  %v8648_v4 = vld [vmem:[%s9053_s27 + $0x1228] ss:$16 sps:$4 sm:$0xff]   ;;  %v8651_v61 = vld [vmem:[%s9053_s27 + $0x1240] ss:$16 sps:$4 sm:$0xff]  }
 0x220   : > { %5577 = vmatpush1.bf16.msra.mxu0 %v8561_v5  ;;  %6110 = vmatpush1.bf16.msra.mxu1 %v8564_v6  ;;  %v8653_v5 = vld [vmem:[%s9053_s27 + $0x1244] ss:$16 sps:$4 sm:$0xff]   ;;  %v8656_v6 = vld [vmem:[%s9053_s27 + $0x124c] ss:$16 sps:$4 sm:$0xff]  }
 0x221   : > { %5578 = vmatprep.subr.bf16.mxu0 %v8569_v7  ;;  %6111 = vmatprep.subr.bf16.mxu1 %v8572_v8  ;;  %v8654_v7 = vld [vmem:[%s9053_s27 + $0x1248] ss:$16 sps:$4 sm:$0xff]   ;;  %v8659_v8 = vld [vmem:[%s9053_s27 + $0x1264] ss:$16 sps:$4 sm:$0xff]  }
 0x224   : > { %5579 = vmatpush1.bf16.msra.mxu0 %v8567_v9  ;;  %6112 = vmatpush1.bf16.msra.mxu1 %v8570_v10  ;;  %v8662_v9 = vld [vmem:[%s9053_s27 + $0x126c] ss:$16 sps:$4 sm:$0xff]   ;;  %v8657_v10 = vld [vmem:[%s9053_s27 + $0x1260] ss:$16 sps:$4 sm:$0xff]  }
 0x225   : > { %5580 = vmatprep.subr.bf16.mxu0 %v8575_v11  ;;  %6113 = vmatprep.subr.bf16.mxu1 %v8578_v12  ;;  %v8660_v11 = vld [vmem:[%s9053_s27 + $0x1268] ss:$16 sps:$4 sm:$0xff]   ;;  %v8665_v12 = vld [vmem:[%s9053_s27 + $0x1284] ss:$16 sps:$4 sm:$0xff]  }
 0x228   : > { %5581 = vmatpush1.bf16.msra.mxu0 %v8573_v14  ;;  %6114 = vmatpush1.bf16.msra.mxu1 %v8576_v16  ;;  %v8668_v14 = vld [vmem:[%s9053_s27 + $0x128c] ss:$16 sps:$4 sm:$0xff]   ;;  %v8663_v16 = vld [vmem:[%s9053_s27 + $0x1280] ss:$16 sps:$4 sm:$0xff]  }
 0x229   : > { %5582 = vmatprep.subr.bf16.mxu0 %v8581_v52  ;;  %6115 = vmatprep.subr.bf16.mxu1 %v8584_v17  ;;  %v8666_v52 = vld [vmem:[%s9053_s27 + $0x1288] ss:$16 sps:$4 sm:$0xff]   ;;  %v8671_v17 = vld [vmem:[%s9053_s27 + $0x12a4] ss:$16 sps:$4 sm:$0xff]  }
 0x22c   : > { %5583 = vmatpush1.bf16.msra.mxu0 %v8579_v18  ;;  %6116 = vmatpush1.bf16.msra.mxu1 %v8582_v19  ;;  %v8674_v18 = vld [vmem:[%s9053_s27 + $0x12ac] ss:$16 sps:$4 sm:$0xff]   ;;  %v8669_v19 = vld [vmem:[%s9053_s27 + $0x12a0] ss:$16 sps:$4 sm:$0xff]  }
 0x22d   : > { %5584 = vmatprep.subr.bf16.mxu0 %v8587_v20  ;;  %6117 = vmatprep.subr.bf16.mxu1 %v8590_v22  ;;  %v8672_v20 = vld [vmem:[%s9053_s27 + $0x12a8] ss:$16 sps:$4 sm:$0xff]   ;;  %v8677_v22 = vld [vmem:[%s9053_s27 + $0x12c4] ss:$16 sps:$4 sm:$0xff]  }
 0x230   : > { %5585 = vmatpush1.bf16.msra.mxu0 %v8585_v23  ;;  %6118 = vmatpush1.bf16.msra.mxu1 %v8588_v24  ;;  %v8680_v23 = vld [vmem:[%s9053_s27 + $0x12cc] ss:$16 sps:$4 sm:$0xff]   ;;  %v8675_v24 = vld [vmem:[%s9053_s27 + $0x12c0] ss:$16 sps:$4 sm:$0xff]  }
 0x231   : > { %5586 = vmatprep.subr.bf16.mxu0 %v8593_v26  ;;  %6119 = vmatprep.subr.bf16.mxu1 %v8596_v27  ;;  %v8678_v26 = vld [vmem:[%s9053_s27 + $0x12c8] ss:$16 sps:$4 sm:$0xff]   ;;  %v8683_v27 = vld [vmem:[%s9053_s27 + $0x12e4] ss:$16 sps:$4 sm:$0xff]  }
 0x234   : > { %5587 = vmatpush1.bf16.msra.mxu0 %v8591_v28  ;;  %6120 = vmatpush1.bf16.msra.mxu1 %v8594_v29  ;;  %v8686_v28 = vld [vmem:[%s9053_s27 + $0x12ec] ss:$16 sps:$4 sm:$0xff]   ;;  %v8681_v29 = vld [vmem:[%s9053_s27 + $0x12e0] ss:$16 sps:$4 sm:$0xff]  }
 0x235   : > { %5588 = vmatprep.subr.bf16.mxu0 %v8599_v30  ;;  %6121 = vmatprep.subr.bf16.mxu1 %v8602_v15  ;;  %v8684_v30 = vld [vmem:[%s9053_s27 + $0x12e8] ss:$16 sps:$4 sm:$0xff]   ;;  %v8689_v15 = vld [vmem:[%s9053_s27 + $0x1304] ss:$16 sps:$4 sm:$0xff]  }
 0x238   : > { %5589 = vmatpush1.bf16.msra.mxu0 %v8597_v31  ;;  %6122 = vmatpush1.bf16.msra.mxu1 %v8600_v32  ;;  %v8692_v31 = vld [vmem:[%s9053_s27 + $0x130c] ss:$16 sps:$4 sm:$0xff]   ;;  %v8687_v32 = vld [vmem:[%s9053_s27 + $0x1300] ss:$16 sps:$4 sm:$0xff]  }
 0x239   : > { %5590 = vmatprep.subr.bf16.mxu0 %v8605_v33  ;;  %6123 = vmatprep.subr.bf16.mxu1 %v8608_v25  ;;  %v8690_v33 = vld [vmem:[%s9053_s27 + $0x1308] ss:$16 sps:$4 sm:$0xff]   ;;  %v8695_v25 = vld [vmem:[%s9053_s27 + $0x1324] ss:$16 sps:$4 sm:$0xff]  }
 0x23c   : > { %5591 = vmatpush1.bf16.msra.mxu0 %v8603_v34  ;;  %6124 = vmatpush1.bf16.msra.mxu1 %v8606_v36  ;;  %v8698_v34 = vld [vmem:[%s9053_s27 + $0x132c] ss:$16 sps:$4 sm:$0xff]   ;;  %v8693_v36 = vld [vmem:[%s9053_s27 + $0x1320] ss:$16 sps:$4 sm:$0xff]  }
 0x23d   : > { %5592 = vmatprep.subr.bf16.mxu0 %v8611_v37  ;;  %6125 = vmatprep.subr.bf16.mxu1 %v8614_v39  ;;  %v8696_v37 = vld [vmem:[%s9053_s27 + $0x1328] ss:$16 sps:$4 sm:$0xff]   ;;  %v8701_v39 = vld [vmem:[%s9053_s27 + $0x1344] ss:$16 sps:$4 sm:$0xff]  }
 0x240   : > { %5593 = vmatpush1.bf16.msra.mxu0 %v8609_v40  ;;  %6126 = vmatpush1.bf16.msra.mxu1 %v8612_v21  ;;  %v8704_v40 = vld [vmem:[%s9053_s27 + $0x134c] ss:$16 sps:$4 sm:$0xff]   ;;  %v8699_v21 = vld [vmem:[%s9053_s27 + $0x1340] ss:$16 sps:$4 sm:$0xff]  }
 0x241   : > { %5594 = vmatprep.subr.bf16.mxu0 %v8617_v41  ;;  %6127 = vmatprep.subr.bf16.mxu1 %v8620_v43  ;;  %v8702_v41 = vld [vmem:[%s9053_s27 + $0x1348] ss:$16 sps:$4 sm:$0xff]   ;;  %v8707_v43 = vld [vmem:[%s9053_s27 + $0x1364] ss:$16 sps:$4 sm:$0xff]  }
 0x244   : > { %5595 = vmatpush1.bf16.msra.mxu0 %v8615_v44  ;;  %6128 = vmatpush1.bf16.msra.mxu1 %v8618_v45  ;;  %v8710_v44 = vld [vmem:[%s9053_s27 + $0x136c] ss:$16 sps:$4 sm:$0xff]   ;;  %v8705_v45 = vld [vmem:[%s9053_s27 + $0x1360] ss:$16 sps:$4 sm:$0xff]  }
 0x245   : > { %5596 = vmatprep.subr.bf16.mxu0 %v8623_v46  ;;  %6129 = vmatprep.subr.bf16.mxu1 %v8626_v47  ;;  %v8708_v46 = vld [vmem:[%s9053_s27 + $0x1368] ss:$16 sps:$4 sm:$0xff]   ;;  %v8713_v47 = vld [vmem:[%s9053_s27 + $0x1384] ss:$16 sps:$4 sm:$0xff]  }
 0x248   : > { %5597 = vmatpush1.bf16.msra.mxu0 %v8621_v50  ;;  %6130 = vmatpush1.bf16.msra.mxu1 %v8624_v53  ;;  %v8716_v50 = vld [vmem:[%s9053_s27 + $0x138c] ss:$16 sps:$4 sm:$0xff]   ;;  %v8711_v53 = vld [vmem:[%s9053_s27 + $0x1380] ss:$16 sps:$4 sm:$0xff]  }
 0x249   : > { %5598 = vmatprep.subr.bf16.mxu0 %v8629_v54  ;;  %6131 = vmatprep.subr.bf16.mxu1 %v8632_v55  ;;  %v8714_v54 = vld [vmem:[%s9053_s27 + $0x1388] ss:$16 sps:$4 sm:$0xff]   ;;  %v8719_v55 = vld [vmem:[%s9053_s27 + $0x13a4] ss:$16 sps:$4 sm:$0xff]  }
 0x24c   : > { %5599 = vmatpush1.bf16.msra.mxu0 %v8627_v38  ;;  %6132 = vmatpush1.bf16.msra.mxu1 %v8630_v56  ;;  %v8722_v38 = vld [vmem:[%s9053_s27 + $0x13ac] ss:$16 sps:$4 sm:$0xff]   ;;  %v8717_v56 = vld [vmem:[%s9053_s27 + $0x13a0] ss:$16 sps:$4 sm:$0xff]  }
 0x24d   : > { %5600 = vmatprep.subr.bf16.mxu0 %v8635_v57  ;;  %6133 = vmatprep.subr.bf16.mxu1 %v8638_v58  ;;  %v8720_v57 = vld [vmem:[%s9053_s27 + $0x13a8] ss:$16 sps:$4 sm:$0xff]   ;;  %v8725_v58 = vld [vmem:[%s9053_s27 + $0x13c4] ss:$16 sps:$4 sm:$0xff]  }
 0x250   : > { %5601 = vmatpush1.bf16.msra.mxu0 %v8633_v48  ;;  %6134 = vmatpush1.bf16.msra.mxu1 %v8636_v59  ;;  %v8728_v48 = vld [vmem:[%s9053_s27 + $0x13cc] ss:$16 sps:$4 sm:$0xff]   ;;  %v1231_v59 = vcombine.high %v9647_v35, %v9647_v35  ;;  %v8729_v35 = vld [vmem:[%s9053_s27 + $0x13e0] ss:$16 sps:$4 sm:$0xff]  }
 0x251   : > { %5611 = vmatprep.subr.bf16.mxu0 %v8641_v60  ;;  %6144 = vmatprep.subr.bf16.mxu1 %v8644_v13  ;;  %v8723_v60 = vld [vmem:[%s9053_s27 + $0x13c0] ss:$16 sps:$4 sm:$0xff]   ;;  %v8726_v13 = vld [vmem:[%s9053_s27 + $0x13c8] ss:$16 sps:$4 sm:$0xff]  }
 0x253   : > { %5603 = vmatmul.mubr.bf16.vlgmr.msra.gmra.mrb[0].mxu0 %v9736_v62  ;;  %6136 = vmatmul.mubr.bf16.vlgmr.msra.gmra.mrb[0].mxu1 %v9736_v62 }
 0x254   : > { %5612 = vmatpush1.bf16.msra.mxu0 %v8639_v63  ;;  %6145 = vmatpush1.bf16.msra.mxu1 %v8642_v0  ;;  %v8731_v63 = vld [vmem:[%s9053_s27 + $0x13e4] ss:$16 sps:$4 sm:$0xff]   ;;  %v8734_v0 = vld [vmem:[%s9053_s27 + $0x13ec] ss:$16 sps:$4 sm:$0xff]  }
 0x255   : > { %5613 = vmatprep.subr.bf16.mxu0 %v8647_v1  ;;  %6146 = vmatprep.subr.bf16.mxu1 %v8650_v2  ;;  %v9805_v1 = vrot.slane %v1231_v59, %v9108_v49  ;;  %v8732_v2 = vld [vmem:[%s9053_s27 + $0x13e8] ss:$16 sps:$4 sm:$0xff]  }
 0x256   : > { %5643 = vmatprep.mubr.bf16.mxu0 %v1278_v3  ;;  %6176 = vmatprep.mubr.bf16.mxu1 %v1278_v3  ;;  %v8737_v3 = vld [vmem:[%s9053_s27 + $0x1404] ss:$16 sps:$4 sm:$0xff]   ;;  %v8810_v59 = vld [vmem:[%s9053_s27 + $0x1588] ss:$16 sps:$4 sm:$0xff]  }
 0x258   : > { %5614 = vmatpush1.bf16.msra.mxu0 %v8645_v51  ;;  %6147 = vmatpush1.bf16.msra.mxu1 %v8648_v4  ;;  %v8740_v51 = vld [vmem:[%s9053_s27 + $0x140c] ss:$16 sps:$4 sm:$0xff]   ;;  %v1247_v4 = vcombine.high %v9805_v1, %v9805_v1 }
 0x259   : > { %5615 = vmatprep.subr.bf16.mxu0 %v8653_v5  ;;  %6148 = vmatprep.subr.bf16.mxu1 %v8656_v6  ;;  %v1276_v5 = vcombine.high %v9736_v62, %v9736_v62  ;;  %v8735_v6 = vld [vmem:[%s9053_s27 + $0x1400] ss:$16 sps:$4 sm:$0xff]  }
 0x25a   : > { %v8741_v62 = vld [vmem:[%s9053_s27 + $0x1420] ss:$16 sps:$4 sm:$0xff]  }
 0x25c   : > { %5616 = vmatpush1.bf16.msra.mxu0 %v8651_v61  ;;  %6149 = vmatpush1.bf16.msra.mxu1 %v8654_v7  ;;  %v8738_v61 = vld [vmem:[%s9053_s27 + $0x1408] ss:$16 sps:$4 sm:$0xff]   ;;  %v8743_v7 = vld [vmem:[%s9053_s27 + $0x1424] ss:$16 sps:$4 sm:$0xff]  }
 0x25d   : > { %5617 = vmatprep.subr.bf16.mxu0 %v8659_v8  ;;  %6150 = vmatprep.subr.bf16.mxu1 %v8662_v9  ;;  %v8746_v8 = vld [vmem:[%s9053_s27 + $0x142c] ss:$16 sps:$4 sm:$0xff]   ;;  %v9820_v9 = vrot.slane %v1247_v4, %v9108_v49  ;;  %v8827_v4 = vld [vmem:[%s9053_s27 + $0x15e4] ss:$16 sps:$4 sm:$0xff]  }
 0x260   : > { %5618 = vmatpush1.bf16.msra.mxu0 %v8657_v10  ;;  %6151 = vmatpush1.bf16.msra.mxu1 %v8660_v11  ;;  %v8744_v10 = vld [vmem:[%s9053_s27 + $0x1428] ss:$16 sps:$4 sm:$0xff]   ;;  %v8749_v11 = vld [vmem:[%s9053_s27 + $0x1444] ss:$16 sps:$4 sm:$0xff]  }
 0x261   : > { %5619 = vmatprep.subr.bf16.mxu0 %v8665_v12  ;;  %6152 = vmatprep.subr.bf16.mxu1 %v8668_v14  ;;  %v8752_v12 = vld [vmem:[%s9053_s27 + $0x144c] ss:$16 sps:$4 sm:$0xff]   ;;  %v8747_v14 = vld [vmem:[%s9053_s27 + $0x1440] ss:$16 sps:$4 sm:$0xff]  }
 0x264   : > { %5620 = vmatpush1.bf16.msra.mxu0 %v8663_v16  ;;  %6153 = vmatpush1.bf16.msra.mxu1 %v8666_v52  ;;  %v8750_v16 = vld [vmem:[%s9053_s27 + $0x1448] ss:$16 sps:$4 sm:$0xff]   ;;  %v8755_v52 = vld [vmem:[%s9053_s27 + $0x1464] ss:$16 sps:$4 sm:$0xff]  }
 0x265   : > { %5621 = vmatprep.subr.bf16.mxu0 %v8671_v17  ;;  %6154 = vmatprep.subr.bf16.mxu1 %v8674_v18  ;;  %v8758_v17 = vld [vmem:[%s9053_s27 + $0x146c] ss:$16 sps:$4 sm:$0xff]   ;;  %v8753_v18 = vld [vmem:[%s9053_s27 + $0x1460] ss:$16 sps:$4 sm:$0xff]  }
 0x268   : > { %5622 = vmatpush1.bf16.msra.mxu0 %v8669_v19  ;;  %6155 = vmatpush1.bf16.msra.mxu1 %v8672_v20  ;;  %v8756_v19 = vld [vmem:[%s9053_s27 + $0x1468] ss:$16 sps:$4 sm:$0xff]   ;;  %v8761_v20 = vld [vmem:[%s9053_s27 + $0x1484] ss:$16 sps:$4 sm:$0xff]  }
 0x269   : > { %5623 = vmatprep.subr.bf16.mxu0 %v8677_v22  ;;  %6156 = vmatprep.subr.bf16.mxu1 %v8680_v23  ;;  %v8764_v22 = vld [vmem:[%s9053_s27 + $0x148c] ss:$16 sps:$4 sm:$0xff]   ;;  %v8759_v23 = vld [vmem:[%s9053_s27 + $0x1480] ss:$16 sps:$4 sm:$0xff]  }
 0x26c   : > { %5624 = vmatpush1.bf16.msra.mxu0 %v8675_v24  ;;  %6157 = vmatpush1.bf16.msra.mxu1 %v8678_v26  ;;  %v8762_v24 = vld [vmem:[%s9053_s27 + $0x1488] ss:$16 sps:$4 sm:$0xff]   ;;  %v8767_v26 = vld [vmem:[%s9053_s27 + $0x14a4] ss:$16 sps:$4 sm:$0xff]  }
 0x26d   : > { %5625 = vmatprep.subr.bf16.mxu0 %v8683_v27  ;;  %6158 = vmatprep.subr.bf16.mxu1 %v8686_v28  ;;  %v8770_v27 = vld [vmem:[%s9053_s27 + $0x14ac] ss:$16 sps:$4 sm:$0xff]   ;;  %v8765_v28 = vld [vmem:[%s9053_s27 + $0x14a0] ss:$16 sps:$4 sm:$0xff]  }
 0x270   : > { %5626 = vmatpush1.bf16.msra.mxu0 %v8681_v29  ;;  %6159 = vmatpush1.bf16.msra.mxu1 %v8684_v30  ;;  %v8768_v29 = vld [vmem:[%s9053_s27 + $0x14a8] ss:$16 sps:$4 sm:$0xff]   ;;  %v8773_v30 = vld [vmem:[%s9053_s27 + $0x14c4] ss:$16 sps:$4 sm:$0xff]  }
 0x271   : > { %5627 = vmatprep.subr.bf16.mxu0 %v8689_v15  ;;  %6160 = vmatprep.subr.bf16.mxu1 %v8692_v31  ;;  %v8776_v15 = vld [vmem:[%s9053_s27 + $0x14cc] ss:$16 sps:$4 sm:$0xff]   ;;  %v8771_v31 = vld [vmem:[%s9053_s27 + $0x14c0] ss:$16 sps:$4 sm:$0xff]  }
 0x274   : > { %5628 = vmatpush1.bf16.msra.mxu0 %v8687_v32  ;;  %6161 = vmatpush1.bf16.msra.mxu1 %v8690_v33  ;;  %v8774_v32 = vld [vmem:[%s9053_s27 + $0x14c8] ss:$16 sps:$4 sm:$0xff]   ;;  %v8779_v33 = vld [vmem:[%s9053_s27 + $0x14e4] ss:$16 sps:$4 sm:$0xff]  }
 0x275   : > { %5629 = vmatprep.subr.bf16.mxu0 %v8695_v25  ;;  %6162 = vmatprep.subr.bf16.mxu1 %v8698_v34  ;;  %v8782_v25 = vld [vmem:[%s9053_s27 + $0x14ec] ss:$16 sps:$4 sm:$0xff]   ;;  %v8777_v34 = vld [vmem:[%s9053_s27 + $0x14e0] ss:$16 sps:$4 sm:$0xff]  }
 0x278   : > { %5630 = vmatpush1.bf16.msra.mxu0 %v8693_v36  ;;  %6163 = vmatpush1.bf16.msra.mxu1 %v8696_v37  ;;  %v8780_v36 = vld [vmem:[%s9053_s27 + $0x14e8] ss:$16 sps:$4 sm:$0xff]   ;;  %v8785_v37 = vld [vmem:[%s9053_s27 + $0x1504] ss:$16 sps:$4 sm:$0xff]  }
 0x279   : > { %5631 = vmatprep.subr.bf16.mxu0 %v8701_v39  ;;  %6164 = vmatprep.subr.bf16.mxu1 %v8704_v40  ;;  %v8788_v39 = vld [vmem:[%s9053_s27 + $0x150c] ss:$16 sps:$4 sm:$0xff]   ;;  %v8783_v40 = vld [vmem:[%s9053_s27 + $0x1500] ss:$16 sps:$4 sm:$0xff]  }
 0x27c   : > { %5632 = vmatpush1.bf16.msra.mxu0 %v8699_v21  ;;  %6165 = vmatpush1.bf16.msra.mxu1 %v8702_v41  ;;  %v8786_v21 = vld [vmem:[%s9053_s27 + $0x1508] ss:$16 sps:$4 sm:$0xff]   ;;  %v8791_v41 = vld [vmem:[%s9053_s27 + $0x1524] ss:$16 sps:$4 sm:$0xff]  }
 0x27d   : > { %5633 = vmatprep.subr.bf16.mxu0 %v8707_v43  ;;  %6166 = vmatprep.subr.bf16.mxu1 %v8710_v44  ;;  %v8794_v43 = vld [vmem:[%s9053_s27 + $0x152c] ss:$16 sps:$4 sm:$0xff]   ;;  %v8789_v44 = vld [vmem:[%s9053_s27 + $0x1520] ss:$16 sps:$4 sm:$0xff]  }
 0x280   : > { %5634 = vmatpush1.bf16.msra.mxu0 %v8705_v45  ;;  %6167 = vmatpush1.bf16.msra.mxu1 %v8708_v46  ;;  %v8792_v45 = vld [vmem:[%s9053_s27 + $0x1528] ss:$16 sps:$4 sm:$0xff]   ;;  %v8797_v46 = vld [vmem:[%s9053_s27 + $0x1544] ss:$16 sps:$4 sm:$0xff]  }
 0x281   : > { %5635 = vmatprep.subr.bf16.mxu0 %v8713_v47  ;;  %6168 = vmatprep.subr.bf16.mxu1 %v8716_v50  ;;  %v8800_v47 = vld [vmem:[%s9053_s27 + $0x154c] ss:$16 sps:$4 sm:$0xff]   ;;  %v8795_v50 = vld [vmem:[%s9053_s27 + $0x1540] ss:$16 sps:$4 sm:$0xff]  }
 0x284   : > { %5636 = vmatpush1.bf16.msra.mxu0 %v8711_v53  ;;  %6169 = vmatpush1.bf16.msra.mxu1 %v8714_v54  ;;  %v8798_v53 = vld [vmem:[%s9053_s27 + $0x1548] ss:$16 sps:$4 sm:$0xff]   ;;  %v8803_v54 = vld [vmem:[%s9053_s27 + $0x1564] ss:$16 sps:$4 sm:$0xff]  }
 0x285   : > { %5637 = vmatprep.subr.bf16.mxu0 %v8719_v55  ;;  %6170 = vmatprep.subr.bf16.mxu1 %v8722_v38  ;;  %v8806_v55 = vld [vmem:[%s9053_s27 + $0x156c] ss:$16 sps:$4 sm:$0xff]   ;;  %v8801_v38 = vld [vmem:[%s9053_s27 + $0x1560] ss:$16 sps:$4 sm:$0xff]  }
 0x288   : > { %5638 = vmatpush1.bf16.msra.mxu0 %v8717_v56  ;;  %6171 = vmatpush1.bf16.msra.mxu1 %v8720_v57  ;;  %v8804_v56 = vld [vmem:[%s9053_s27 + $0x1568] ss:$16 sps:$4 sm:$0xff]   ;;  %v8809_v57 = vld [vmem:[%s9053_s27 + $0x1584] ss:$16 sps:$4 sm:$0xff]  }
 0x289   : > { %5639 = vmatprep.subr.bf16.mxu0 %v8725_v58  ;;  %6172 = vmatprep.subr.bf16.mxu1 %v8728_v48  ;;  %v8812_v58 = vld [vmem:[%s9053_s27 + $0x158c] ss:$16 sps:$4 sm:$0xff]   ;;  %v8807_v48 = vld [vmem:[%s9053_s27 + $0x1580] ss:$16 sps:$4 sm:$0xff]  }
 0x28c   : > { %5640 = vmatpush1.bf16.msra.mxu0 %v8723_v60  ;;  %6173 = vmatpush1.bf16.msra.mxu1 %v8726_v13  ;;  %v8815_v60 = vld [vmem:[%s9053_s27 + $0x15a4] ss:$16 sps:$4 sm:$0xff]   ;;  %v8818_v13 = vld [vmem:[%s9053_s27 + $0x15ac] ss:$16 sps:$4 sm:$0xff]  }
 0x28d   : > { %5641 = vmatprep.subr.bf16.mxu0 %v8731_v63  ;;  %6174 = vmatprep.subr.bf16.mxu1 %v8734_v0  ;;  %v8813_v63 = vld [vmem:[%s9053_s27 + $0x15a0] ss:$16 sps:$4 sm:$0xff]   ;;  %v8816_v0 = vld [vmem:[%s9053_s27 + $0x15a8] ss:$16 sps:$4 sm:$0xff]  }
 0x290   : > { %5642 = vmatpush1.bf16.msra.mxu0 %v8729_v35  ;;  %6175 = vmatpush1.bf16.msra.mxu1 %v8732_v2  ;;  %v8821_v35 = vld [vmem:[%s9053_s27 + $0x15c4] ss:$16 sps:$4 sm:$0xff]   ;;  %v8824_v2 = vld [vmem:[%s9053_s27 + $0x15cc] ss:$16 sps:$4 sm:$0xff]  }
 0x291   : > { %5652 = vmatprep.subr.bf16.mxu0 %v8737_v3  ;;  %6185 = vmatprep.subr.bf16.mxu1 %v8740_v51  ;;  %v8819_v3 = vld [vmem:[%s9053_s27 + $0x15c0] ss:$16 sps:$4 sm:$0xff]   ;;  %v8822_v51 = vld [vmem:[%s9053_s27 + $0x15c8] ss:$16 sps:$4 sm:$0xff]  }
 0x293   : > { %5644 = vmatmul.mubr.bf16.vlgmr.msra.gmra.mrb[0].mxu0 %v1276_v5  ;;  %6177 = vmatmul.mubr.bf16.vlgmr.msra.gmra.mrb[0].mxu1 %v1276_v5  ;;  %v8830_v5 = vld [vmem:[%s9053_s27 + $0x15ec] ss:$16 sps:$4 sm:$0xff]  }
 0x294   : > { %5653 = vmatpush1.bf16.msra.mxu0 %v8735_v6  ;;  %6186 = vmatpush1.bf16.msra.mxu1 %v8738_v61  ;;  %v8825_v6 = vld [vmem:[%s9053_s27 + $0x15e0] ss:$16 sps:$4 sm:$0xff]   ;;  %v8828_v61 = vld [vmem:[%s9053_s27 + $0x15e8] ss:$16 sps:$4 sm:$0xff]  }
 0x295   : > { %5654 = vmatprep.subr.bf16.mxu0 %v8743_v7  ;;  %6187 = vmatprep.subr.bf16.mxu1 %v8746_v8  ;;  %v8834_v7 = vld [vmem:[%s9053_s27 + $0x1604] ss:$16 sps:$4 sm:$0xff]   ;;  %v8837_v8 = vld [vmem:[%s9053_s27 + $0x160c] ss:$16 sps:$4 sm:$0xff]  }
 0x296   : > { %5684 = vmatprep.mubr.bf16.mxu0 %v9820_v9  ;;  %6217 = vmatprep.mubr.bf16.mxu1 %v9820_v9 }
 0x298   : > { %5655 = vmatpush1.bf16.msra.mxu0 %v8741_v62  ;;  %6188 = vmatpush1.bf16.msra.mxu1 %v8744_v10  ;;  %v9892_v62 = vrot.slane %v9805_v1, %v9108_v49  ;;  %v8832_v10 = vld [vmem:[%s9053_s27 + $0x1600] ss:$16 sps:$4 sm:$0xff]  }
 0x299   : > { %5656 = vmatprep.subr.bf16.mxu0 %v8749_v11  ;;  %6189 = vmatprep.subr.bf16.mxu1 %v8752_v12  ;;  %v8835_v11 = vld [vmem:[%s9053_s27 + $0x1608] ss:$16 sps:$4 sm:$0xff]   ;;  %v8840_v12 = vld [vmem:[%s9053_s27 + $0x1624] ss:$16 sps:$4 sm:$0xff]   ;;  %v8838_v1 = vld [vmem:[%s9053_s27 + $0x1620] ss:$16 sps:$4 sm:$0xff]  }
 0x29c   : > { %5657 = vmatpush1.bf16.msra.mxu0 %v8747_v14  ;;  %6190 = vmatpush1.bf16.msra.mxu1 %v8750_v16  ;;  %v8843_v14 = vld [vmem:[%s9053_s27 + $0x162c] ss:$16 sps:$4 sm:$0xff]   ;;  %v1279_v16 = vcombine.high %v9820_v9, %v9820_v9  ;;  %v8844_v9 = vld [vmem:[%s9053_s27 + $0x1640] ss:$16 sps:$4 sm:$0xff]  }
 0x29d   : > { %5658 = vmatprep.subr.bf16.mxu0 %v8755_v52  ;;  %6191 = vmatprep.subr.bf16.mxu1 %v8758_v17  ;;  %v8841_v52 = vld [vmem:[%s9053_s27 + $0x1628] ss:$16 sps:$4 sm:$0xff]   ;;  %v8846_v17 = vld [vmem:[%s9053_s27 + $0x1644] ss:$16 sps:$4 sm:$0xff]  }
 0x2a0   : > { %5659 = vmatpush1.bf16.msra.mxu0 %v8753_v18  ;;  %6192 = vmatpush1.bf16.msra.mxu1 %v8756_v19  ;;  %v8849_v18 = vld [vmem:[%s9053_s27 + $0x164c] ss:$16 sps:$4 sm:$0xff]   ;;  %v8847_v19 = vld [vmem:[%s9053_s27 + $0x1648] ss:$16 sps:$4 sm:$0xff]  }
 0x2a1   : > { %5660 = vmatprep.subr.bf16.mxu0 %v8761_v20  ;;  %6193 = vmatprep.subr.bf16.mxu1 %v8764_v22  ;;  %v8852_v20 = vld [vmem:[%s9053_s27 + $0x1664] ss:$16 sps:$4 sm:$0xff]   ;;  %v8855_v22 = vld [vmem:[%s9053_s27 + $0x166c] ss:$16 sps:$4 sm:$0xff]  }
 0x2a4   : > { %5661 = vmatpush1.bf16.msra.mxu0 %v8759_v23  ;;  %6194 = vmatpush1.bf16.msra.mxu1 %v8762_v24  ;;  %v8850_v23 = vld [vmem:[%s9053_s27 + $0x1660] ss:$16 sps:$4 sm:$0xff]   ;;  %v8853_v24 = vld [vmem:[%s9053_s27 + $0x1668] ss:$16 sps:$4 sm:$0xff]  }
 0x2a5   : > { %5662 = vmatprep.subr.bf16.mxu0 %v8767_v26  ;;  %6195 = vmatprep.subr.bf16.mxu1 %v8770_v27  ;;  %v8858_v26 = vld [vmem:[%s9053_s27 + $0x1684] ss:$16 sps:$4 sm:$0xff]   ;;  %v8861_v27 = vld [vmem:[%s9053_s27 + $0x168c] ss:$16 sps:$4 sm:$0xff]  }
 0x2a8   : > { %5663 = vmatpush1.bf16.msra.mxu0 %v8765_v28  ;;  %6196 = vmatpush1.bf16.msra.mxu1 %v8768_v29  ;;  %v8856_v28 = vld [vmem:[%s9053_s27 + $0x1680] ss:$16 sps:$4 sm:$0xff]   ;;  %v8859_v29 = vld [vmem:[%s9053_s27 + $0x1688] ss:$16 sps:$4 sm:$0xff]  }
 0x2a9   : > { %5664 = vmatprep.subr.bf16.mxu0 %v8773_v30  ;;  %6197 = vmatprep.subr.bf16.mxu1 %v8776_v15  ;;  %v8864_v30 = vld [vmem:[%s9053_s27 + $0x16a4] ss:$16 sps:$4 sm:$0xff]   ;;  %v8867_v15 = vld [vmem:[%s9053_s27 + $0x16ac] ss:$16 sps:$4 sm:$0xff]  }
 0x2ac   : > { %5665 = vmatpush1.bf16.msra.mxu0 %v8771_v31  ;;  %6198 = vmatpush1.bf16.msra.mxu1 %v8774_v32  ;;  %v8862_v31 = vld [vmem:[%s9053_s27 + $0x16a0] ss:$16 sps:$4 sm:$0xff]   ;;  %v8865_v32 = vld [vmem:[%s9053_s27 + $0x16a8] ss:$16 sps:$4 sm:$0xff]  }
 0x2ad   : > { %5666 = vmatprep.subr.bf16.mxu0 %v8779_v33  ;;  %6199 = vmatprep.subr.bf16.mxu1 %v8782_v25  ;;  %v8870_v33 = vld [vmem:[%s9053_s27 + $0x16c4] ss:$16 sps:$4 sm:$0xff]   ;;  %v8873_v25 = vld [vmem:[%s9053_s27 + $0x16cc] ss:$16 sps:$4 sm:$0xff]  }
 0x2b0   : > { %5667 = vmatpush1.bf16.msra.mxu0 %v8777_v34  ;;  %6200 = vmatpush1.bf16.msra.mxu1 %v8780_v36  ;;  %v8868_v34 = vld [vmem:[%s9053_s27 + $0x16c0] ss:$16 sps:$4 sm:$0xff]   ;;  %v8871_v36 = vld [vmem:[%s9053_s27 + $0x16c8] ss:$16 sps:$4 sm:$0xff]  }
 0x2b1   : > { %5668 = vmatprep.subr.bf16.mxu0 %v8785_v37  ;;  %6201 = vmatprep.subr.bf16.mxu1 %v8788_v39  ;;  %v8876_v37 = vld [vmem:[%s9053_s27 + $0x16e4] ss:$16 sps:$4 sm:$0xff]   ;;  %v8879_v39 = vld [vmem:[%s9053_s27 + $0x16ec] ss:$16 sps:$4 sm:$0xff]  }
 0x2b4   : > { %5669 = vmatpush1.bf16.msra.mxu0 %v8783_v40  ;;  %6202 = vmatpush1.bf16.msra.mxu1 %v8786_v21  ;;  %v8874_v40 = vld [vmem:[%s9053_s27 + $0x16e0] ss:$16 sps:$4 sm:$0xff]   ;;  %v8877_v21 = vld [vmem:[%s9053_s27 + $0x16e8] ss:$16 sps:$4 sm:$0xff]  }
 0x2b5   : > { %5670 = vmatprep.subr.bf16.mxu0 %v8791_v41  ;;  %6203 = vmatprep.subr.bf16.mxu1 %v8794_v43  ;;  %v8882_v41 = vld [vmem:[%s9053_s27 + $0x1704] ss:$16 sps:$4 sm:$0xff]   ;;  %v8885_v43 = vld [vmem:[%s9053_s27 + $0x170c] ss:$16 sps:$4 sm:$0xff]  }
 0x2b8   : > { %5671 = vmatpush1.bf16.msra.mxu0 %v8789_v44  ;;  %6204 = vmatpush1.bf16.msra.mxu1 %v8792_v45  ;;  %v8880_v44 = vld [vmem:[%s9053_s27 + $0x1700] ss:$16 sps:$4 sm:$0xff]   ;;  %v8883_v45 = vld [vmem:[%s9053_s27 + $0x1708] ss:$16 sps:$4 sm:$0xff]  }
 0x2b9   : > { %5672 = vmatprep.subr.bf16.mxu0 %v8797_v46  ;;  %6205 = vmatprep.subr.bf16.mxu1 %v8800_v47  ;;  %v8888_v46 = vld [vmem:[%s9053_s27 + $0x1724] ss:$16 sps:$4 sm:$0xff]   ;;  %v8891_v47 = vld [vmem:[%s9053_s27 + $0x172c] ss:$16 sps:$4 sm:$0xff]  }
 0x2bc   : > { %5673 = vmatpush1.bf16.msra.mxu0 %v8795_v50  ;;  %6206 = vmatpush1.bf16.msra.mxu1 %v8798_v53  ;;  %v8886_v50 = vld [vmem:[%s9053_s27 + $0x1720] ss:$16 sps:$4 sm:$0xff]   ;;  %v8889_v53 = vld [vmem:[%s9053_s27 + $0x1728] ss:$16 sps:$4 sm:$0xff]  }
 0x2bd   : > { %5674 = vmatprep.subr.bf16.mxu0 %v8803_v54  ;;  %6207 = vmatprep.subr.bf16.mxu1 %v8806_v55  ;;  %v8894_v54 = vld [vmem:[%s9053_s27 + $0x1744] ss:$16 sps:$4 sm:$0xff]   ;;  %v8897_v55 = vld [vmem:[%s9053_s27 + $0x174c] ss:$16 sps:$4 sm:$0xff]  }
 0x2c0   : > { %5675 = vmatpush1.bf16.msra.mxu0 %v8801_v38  ;;  %6208 = vmatpush1.bf16.msra.mxu1 %v8804_v56  ;;  %v8892_v38 = vld [vmem:[%s9053_s27 + $0x1740] ss:$16 sps:$4 sm:$0xff]   ;;  %v8895_v56 = vld [vmem:[%s9053_s27 + $0x1748] ss:$16 sps:$4 sm:$0xff]  }
 0x2c1   : > { %5676 = vmatprep.subr.bf16.mxu0 %v8809_v57  ;;  %6209 = vmatprep.subr.bf16.mxu1 %v8812_v58  ;;  %v8900_v57 = vld [vmem:[%s9053_s27 + $0x1764] ss:$16 sps:$4 sm:$0xff]   ;;  %v8903_v58 = vld [vmem:[%s9053_s27 + $0x176c] ss:$16 sps:$4 sm:$0xff]  }
 0x2c4   : > { %5677 = vmatpush1.bf16.msra.mxu0 %v8807_v48  ;;  %6210 = vmatpush1.bf16.msra.mxu1 %v8810_v59  ;;  %v8898_v48 = vld [vmem:[%s9053_s27 + $0x1760] ss:$16 sps:$4 sm:$0xff]   ;;  %v8901_v59 = vld [vmem:[%s9053_s27 + $0x1768] ss:$16 sps:$4 sm:$0xff]  }
 0x2c5   : > { %5678 = vmatprep.subr.bf16.mxu0 %v8815_v60  ;;  %6211 = vmatprep.subr.bf16.mxu1 %v8818_v13  ;;  %v8906_v60 = vld [vmem:[%s9053_s27 + $0x1784] ss:$16 sps:$4 sm:$0xff]   ;;  %v8909_v13 = vld [vmem:[%s9053_s27 + $0x178c] ss:$16 sps:$4 sm:$0xff]  }
 0x2c8   : > { %5679 = vmatpush1.bf16.msra.mxu0 %v8813_v63  ;;  %6212 = vmatpush1.bf16.msra.mxu1 %v8816_v0  ;;  %v8904_v63 = vld [vmem:[%s9053_s27 + $0x1780] ss:$16 sps:$4 sm:$0xff]   ;;  %v8907_v0 = vld [vmem:[%s9053_s27 + $0x1788] ss:$16 sps:$4 sm:$0xff]  }
 0x2c9   : > { %5680 = vmatprep.subr.bf16.mxu0 %v8821_v35  ;;  %6213 = vmatprep.subr.bf16.mxu1 %v8824_v2  ;;  %v8912_v35 = vld [vmem:[%s9053_s27 + $0x17a4] ss:$16 sps:$4 sm:$0xff]   ;;  %v8915_v2 = vld [vmem:[%s9053_s27 + $0x17ac] ss:$16 sps:$4 sm:$0xff]  }
 0x2cc   : > { %5681 = vmatpush1.bf16.msra.mxu0 %v8819_v3  ;;  %6214 = vmatpush1.bf16.msra.mxu1 %v8822_v51  ;;  %v8910_v3 = vld [vmem:[%s9053_s27 + $0x17a0] ss:$16 sps:$4 sm:$0xff]   ;;  %v8913_v51 = vld [vmem:[%s9053_s27 + $0x17a8] ss:$16 sps:$4 sm:$0xff]  }
 0x2cd   : > { %5682 = vmatprep.subr.bf16.mxu0 %v8827_v4  ;;  %6215 = vmatprep.subr.bf16.mxu1 %v8830_v5  ;;  %v8918_v4 = vld [vmem:[%s9053_s27 + $0x17c4] ss:$16 sps:$4 sm:$0xff]   ;;  %v8921_v5 = vld [vmem:[%s9053_s27 + $0x17cc] ss:$16 sps:$4 sm:$0xff]  }
 0x2d0   : > { %5683 = vmatpush1.bf16.msra.mxu0 %v8825_v6  ;;  %6216 = vmatpush1.bf16.msra.mxu1 %v8828_v61  ;;  %v8916_v6 = vld [vmem:[%s9053_s27 + $0x17c0] ss:$16 sps:$4 sm:$0xff]   ;;  %v8919_v61 = vld [vmem:[%s9053_s27 + $0x17c8] ss:$16 sps:$4 sm:$0xff]  }
 0x2d1   : > { %5693 = vmatprep.subr.bf16.mxu0 %v8834_v7  ;;  %6226 = vmatprep.subr.bf16.mxu1 %v8837_v8  ;;  %v8924_v7 = vld [vmem:[%s9053_s27 + $0x17e4] ss:$16 sps:$4 sm:$0xff]   ;;  %v8927_v8 = vld [vmem:[%s9053_s27 + $0x17ec] ss:$16 sps:$4 sm:$0xff]  }
 0x2d3   : > { %5685 = vmatmul.mubr.bf16.vlgmr.msra.gmra.mrb[0].mxu0 %v9892_v62  ;;  %6218 = vmatmul.mubr.bf16.vlgmr.msra.gmra.mrb[0].mxu1 %v9892_v62 }
 0x2d4   : > { %5694 = vmatpush1.bf16.msra.mxu0 %v8832_v10  ;;  %6227 = vmatpush1.bf16.msra.mxu1 %v8835_v11  ;;  %v8922_v10 = vld [vmem:[%s9053_s27 + $0x17e0] ss:$16 sps:$4 sm:$0xff]   ;;  %v8925_v11 = vld [vmem:[%s9053_s27 + $0x17e8] ss:$16 sps:$4 sm:$0xff]  }
 0x2d5   : > { %5695 = vmatprep.subr.bf16.mxu0 %v8840_v12  ;;  %6228 = vmatprep.subr.bf16.mxu1 %v8843_v14  ;;  %v8930_v12 = vld [vmem:[%s9053_s27 + $0x1804] ss:$16 sps:$4 sm:$0xff]   ;;  %v8933_v14 = vld [vmem:[%s9053_s27 + $0x180c] ss:$16 sps:$4 sm:$0xff]  }
 0x2d6   : > { %5725 = vmatprep.mubr.bf16.mxu0 %v1279_v16  ;;  %6258 = vmatprep.mubr.bf16.mxu1 %v1279_v16  ;;  %v1277_v16 = vcombine.high %v9892_v62, %v9892_v62  ;;  %v8937_v62 = vld [vmem:[%s9053_s27 + $0x1828] ss:$16 sps:$4 sm:$0xff]  }
 0x2d8   : > { %5696 = vmatpush1.bf16.msra.mxu0 %v8838_v1  ;;  %6229 = vmatpush1.bf16.msra.mxu1 %v8841_v52  ;;  %v8928_v1 = vld [vmem:[%s9053_s27 + $0x1800] ss:$16 sps:$4 sm:$0xff]   ;;  %v8931_v52 = vld [vmem:[%s9053_s27 + $0x1808] ss:$16 sps:$4 sm:$0xff]  }
 0x2d9   : > { %5697 = vmatprep.subr.bf16.mxu0 %v8846_v17  ;;  %6230 = vmatprep.subr.bf16.mxu1 %v8849_v18  ;;  %v8936_v17 = vld [vmem:[%s9053_s27 + $0x1824] ss:$16 sps:$4 sm:$0xff]   ;;  %v8939_v18 = vld [vmem:[%s9053_s27 + $0x182c] ss:$16 sps:$4 sm:$0xff]  }
 0x2dc   : > { %5698 = vmatpush1.bf16.msra.mxu0 %v8844_v9  ;;  %6231 = vmatpush1.bf16.msra.mxu1 %v8847_v19  ;;  %v8934_v9 = vld [vmem:[%s9053_s27 + $0x1820] ss:$16 sps:$4 sm:$0xff]   ;;  %v8942_v19 = vld [vmem:[%s9053_s27 + $0x1844] ss:$16 sps:$4 sm:$0xff]  }
 0x2dd   : > { %5699 = vmatprep.subr.bf16.mxu0 %v8852_v20  ;;  %6232 = vmatprep.subr.bf16.mxu1 %v8855_v22  ;;  %v8945_v20 = vld [vmem:[%s9053_s27 + $0x184c] ss:$16 sps:$4 sm:$0xff]   ;;  %v8999_v22 = vmov 0  }
 0x2e0   : > { %5700 = vmatpush1.bf16.msra.mxu0 %v8850_v23  ;;  %6233 = vmatpush1.bf16.msra.mxu1 %v8853_v24  ;;  %v8940_v23 = vld [vmem:[%s9053_s27 + $0x1840] ss:$16 sps:$4 sm:$0xff]   ;;  %v8943_v24 = vld [vmem:[%s9053_s27 + $0x1848] ss:$16 sps:$4 sm:$0xff]  }
 0x2e1   : > { %5701 = vmatprep.subr.bf16.mxu0 %v8858_v26  ;;  %6234 = vmatprep.subr.bf16.mxu1 %v8861_v27  ;;  %v8948_v26 = vld [vmem:[%s9053_s27 + $0x1864] ss:$16 sps:$4 sm:$0xff]   ;;  %v8951_v27 = vld [vmem:[%s9053_s27 + $0x186c] ss:$16 sps:$4 sm:$0xff]  }
 0x2e4   : > { %5702 = vmatpush1.bf16.msra.mxu0 %v8856_v28  ;;  %6235 = vmatpush1.bf16.msra.mxu1 %v8859_v29  ;;  %v8946_v28 = vld [vmem:[%s9053_s27 + $0x1860] ss:$16 sps:$4 sm:$0xff]   ;;  %v8949_v29 = vld [vmem:[%s9053_s27 + $0x1868] ss:$16 sps:$4 sm:$0xff]  }
 0x2e5   : > { %5703 = vmatprep.subr.bf16.mxu0 %v8864_v30  ;;  %6236 = vmatprep.subr.bf16.mxu1 %v8867_v15  ;;  %v6793_v30 = vld.sshfl [vmem:[%s9105_s7 + $0x18] sm:$0x1 pattern:$0x75316420]  ;;  %v8952_v15 = vld [vmem:[%s9847_s11 + $0x40] sm:$0xff]  }
 0x2e8   : > { %5704 = vmatpush1.bf16.msra.mxu0 %v8862_v31  ;;  %6237 = vmatpush1.bf16.msra.mxu1 %v8865_v32  ;;  %v8953_v31 = vld [vmem:[%s9847_s11 + $0xc0] sm:$0xff]   ;;  %v1293_v32 = vrot.slane %v6793_v30, %v9108_v49  ;;  %v8958_v49 = vld [vmem:[%s9847_s11 + $0x8] sm:$0xff]  }
 0x2e9   : > { %5705 = vmatprep.subr.bf16.mxu0 %v8870_v33  ;;  %6238 = vmatprep.subr.bf16.mxu1 %v8873_v25  ;;  %v8954_v33 = vld [vmem:[%s9847_s11] sm:$0xff]  }
 0x2ea   : > { %v8955_v25 = vld [vmem:[%s9847_s11 + $0x80] sm:$0xff]  }
 0x2ec   : > { %5706 = vmatpush1.bf16.msra.mxu0 %v8868_v34  ;;  %6239 = vmatpush1.bf16.msra.mxu1 %v8871_v36  ;;  %v8956_v34 = vld [vmem:[%s9847_s11 + $0x48] sm:$0xff]  }
 0x2ed   : > { %5707 = vmatprep.subr.bf16.mxu0 %v8876_v37  ;;  %6240 = vmatprep.subr.bf16.mxu1 %v8879_v39  ;;  %v8957_v36 = vld [vmem:[%s9847_s11 + $0xc8] sm:$0xff]   ;;  %v8960_v39 = vld [vmem:[%s9847_s11 + $0x50] sm:$0xff]  }
 0x2ee   : > { %v8959_v37 = vld [vmem:[%s9847_s11 + $0x88] sm:$0xff]  }
 0x2f0   : > { %5708 = vmatpush1.bf16.msra.mxu0 %v8874_v40  ;;  %6241 = vmatpush1.bf16.msra.mxu1 %v8877_v21  ;;  %v8961_v40 = vld [vmem:[%s9847_s11 + $0xd0] sm:$0xff]  }
 0x2f1   : > { %5709 = vmatprep.subr.bf16.mxu0 %v8882_v41  ;;  %6242 = vmatprep.subr.bf16.mxu1 %v8885_v43  ;;  %v8962_v21 = vld [vmem:[%s9847_s11 + $0x10] sm:$0xff]   ;;  %v8964_v43 = vld [vmem:[%s9847_s11 + $0x58] sm:$0xff]  }
 0x2f2   : > { %v8963_v41 = vld [vmem:[%s9847_s11 + $0x90] sm:$0xff]  }
 0x2f4   : > { %5710 = vmatpush1.bf16.msra.mxu0 %v8880_v44  ;;  %6243 = vmatpush1.bf16.msra.mxu1 %v8883_v45  ;;  %v8965_v44 = vld [vmem:[%s9847_s11 + $0xd8] sm:$0xff]  }
 0x2f5   : > { %5711 = vmatprep.subr.bf16.mxu0 %v8888_v46  ;;  %6244 = vmatprep.subr.bf16.mxu1 %v8891_v47  ;;  %v8966_v45 = vld [vmem:[%s9847_s11 + $0x18] sm:$0xff]   ;;  %v8968_v47 = vld [vmem:[%s9847_s11 + $0x60] sm:$0xff]  }
 0x2f6   : > { %v8967_v46 = vld [vmem:[%s9847_s11 + $0x98] sm:$0xff]  }
 0x2f8   : > { %5712 = vmatpush1.bf16.msra.mxu0 %v8886_v50  ;;  %6245 = vmatpush1.bf16.msra.mxu1 %v8889_v53  ;;  %v8969_v50 = vld [vmem:[%s9847_s11 + $0xe0] sm:$0xff]  }
 0x2f9   : > { %5713 = vmatprep.subr.bf16.mxu0 %v8894_v54  ;;  %6246 = vmatprep.subr.bf16.mxu1 %v8897_v55  ;;  %v8970_v53 = vld [vmem:[%s9847_s11 + $0x20] sm:$0xff]   ;;  %v8972_v55 = vld [vmem:[%s9847_s11 + $0x68] sm:$0xff]  }
 0x2fa   : > { %v8971_v54 = vld [vmem:[%s9847_s11 + $0xa0] sm:$0xff]  }
 0x2fc   : > { %5714 = vmatpush1.bf16.msra.mxu0 %v8892_v38  ;;  %6247 = vmatpush1.bf16.msra.mxu1 %v8895_v56  ;;  %v8973_v38 = vld [vmem:[%s9847_s11 + $0xe8] sm:$0xff]  }
 0x2fd   : > { %5715 = vmatprep.subr.bf16.mxu0 %v8900_v57  ;;  %6248 = vmatprep.subr.bf16.mxu1 %v8903_v58  ;;  %v8974_v56 = vld [vmem:[%s9847_s11 + $0x28] sm:$0xff]   ;;  %v8976_v58 = vld [vmem:[%s9847_s11 + $0x70] sm:$0xff]  }
 0x2fe   : > { %v8975_v57 = vld [vmem:[%s9847_s11 + $0xa8] sm:$0xff]  }
 0x300   : > { %5716 = vmatpush1.bf16.msra.mxu0 %v8898_v48  ;;  %6249 = vmatpush1.bf16.msra.mxu1 %v8901_v59  ;;  %v8977_v48 = vld [vmem:[%s9847_s11 + $0xf0] sm:$0xff]  }
 0x301   : > { %5717 = vmatprep.subr.bf16.mxu0 %v8906_v60  ;;  %6250 = vmatprep.subr.bf16.mxu1 %v8909_v13  ;;  %v8978_v59 = vld [vmem:[%s9847_s11 + $0x30] sm:$0xff]   ;;  %v8980_v13 = vld [vmem:[%s9847_s11 + $0x78] sm:$0xff]  }
 0x302   : > { %v8979_v60 = vld [vmem:[%s9847_s11 + $0xb0] sm:$0xff]  }
 0x304   : > { %5718 = vmatpush1.bf16.msra.mxu0 %v8904_v63  ;;  %6251 = vmatpush1.bf16.msra.mxu1 %v8907_v0  ;;  %v8981_v63 = vld [vmem:[%s9847_s11 + $0xf8] sm:$0xff]  }
 0x305   : > { %5719 = vmatprep.subr.bf16.mxu0 %v8912_v35  ;;  %6252 = vmatprep.subr.bf16.mxu1 %v8915_v2  ;;  %v8982_v0 = vld [vmem:[%s9847_s11 + $0x38] sm:$0xff]   ;;  %v1111_v2 = vsub.s32 0, %v9095_v42 }
 0x306   : > { %v8983_v35 = vld [vmem:[%s9847_s11 + $0xb8] sm:$0xff]  }
 0x308   : > { %5720 = vmatpush1.bf16.msra.mxu0 %v8910_v3  ;;  %6253 = vmatpush1.bf16.msra.mxu1 %v8913_v51  ;;  %v1119_v3 = vsub.s32 2, %v9095_v42  ;;  %v1107_v51 = vld [vmem:[%s305_s15] sm:$0xf] }
 0x309   : > { %5721 = vmatprep.subr.bf16.mxu0 %v8918_v4  ;;  %6254 = vmatprep.subr.bf16.mxu1 %v8921_v5  ;;  %v1115_v4 = vsub.s32 1, %v9095_v42  ;;  %v1123_v5 = vsub.s32 3, %v9095_v42 }
 0x30c   : > { %5722 = vmatpush1.bf16.msra.mxu0 %v8916_v6  ;;  %6255 = vmatpush1.bf16.msra.mxu1 %v8919_v61  ;;  %v1112_v6 = vrot.slane %v1107_v51, %v1111_v2  ;;  %v1120_v61 = vrot.slane %v1107_v51, %v1119_v3 }
 0x30d   : > { %5723 = vmatprep.subr.bf16.mxu0 %v8924_v7  ;;  %6256 = vmatprep.subr.bf16.mxu1 %v8927_v8  ;;  %v1116_v7 = vrot.slane %v1107_v51, %v1115_v4  ;;  %v1124_v8 = vrot.slane %v1107_v51, %v1123_v5 }
 0x310   : > { %5724 = vmatpush1.bf16.msra.mxu0 %v8922_v10  ;;  %6257 = vmatpush1.bf16.msra.mxu1 %v8925_v11 }
 0x311   : > { %5734 = vmatprep.subr.bf16.mxu0 %v8930_v12  ;;  %6267 = vmatprep.subr.bf16.mxu1 %v8933_v14 }
 0x313   : > { %5726 = vmatmul.mubr.bf16.vlgmr.msra.gmra.mrb[0].mxu0 %v1277_v16  ;;  %6259 = vmatmul.mubr.bf16.vlgmr.msra.gmra.mrb[0].mxu1 %v1277_v16 }
 0x314   : > { %5735 = vmatpush1.bf16.msra.mxu0 %v8928_v1  ;;  %6268 = vmatpush1.bf16.msra.mxu1 %v8931_v52 }
 0x315   : > { %5736 = vmatprep.subr.bf16.mxu0 %v8936_v17  ;;  %6269 = vmatprep.subr.bf16.mxu1 %v8939_v18 }
 0x316   : > { %5766 = vmatprep.mubr.bf16.mxu0 %v8999_v22  ;;  %6299 = vmatprep.mubr.bf16.mxu1 %v8999_v22 }
 0x318   : > { %5737 = vmatpush1.bf16.msra.mxu0 %v8934_v9  ;;  %6270 = vmatpush1.bf16.msra.mxu1 %v8937_v62 }
 0x319   : > { %5738 = vmatprep.subr.bf16.mxu0 %v8942_v19  ;;  %6271 = vmatprep.subr.bf16.mxu1 %v8945_v20 }
 0x31c   : > { %5739 = vmatpush1.bf16.msra.mxu0 %v8940_v23  ;;  %6272 = vmatpush1.bf16.msra.mxu1 %v8943_v24 }
 0x31d   : > { %5740 = vmatprep.subr.bf16.mxu0 %v8948_v26  ;;  %6273 = vmatprep.subr.bf16.mxu1 %v8951_v27 }
 0x320   : > { %5741 = vmatpush1.bf16.msra.mxu0 %v8946_v28  ;;  %6274 = vmatpush1.bf16.msra.mxu1 %v8949_v29 }
 0x321   : > { %7617 = vmatprep.subr.bf16.mxu0 %v8952_v15  ;;  %7639 = vmatprep.subr.bf16.mxu1 %v8953_v31  ;;  %v7580_v15 = vld [vmem:[%s313_s18] ss:$0 sm:$0xff] }
 0x323   : > { %7578 = vmatmul.mubr.msk.bf16.vlgmr.msra.gmra.mrb[0].mxu0 %vm5238_vm0, %v1293_v32  ;;  %7579 = vmatmul.mubr.msk.bf16.vlgmr.msra.gmra.mrb[0].mxu1 %vm5238_vm0, %v1293_v32 }
 0x324   : > { %7618 = vmatpush3.bf16.msra.mxu0 %v8954_v33  ;;  %7640 = vmatpush3.bf16.msra.mxu1 %v8955_v25 }
 0x325   : > { %7619 = vmatprep.subr.bf16.mxu0 %v8956_v34  ;;  %7641 = vmatprep.subr.bf16.mxu1 %v8957_v36 }
 0x328   : > { %7620 = vmatpush3.bf16.msra.mxu0 %v8958_v49  ;;  %7642 = vmatpush3.bf16.msra.mxu1 %v8959_v37 }
 0x329   : > { %7621 = vmatprep.subr.bf16.mxu0 %v8960_v39  ;;  %7643 = vmatprep.subr.bf16.mxu1 %v8961_v40  ;;  %v7613_v40 = vld [vmem:[%s10040_s5] ss:$0 sm:$0xff] }
 0x32c   : > { %7622 = vmatpush3.bf16.msra.mxu0 %v8962_v21  ;;  %7644 = vmatpush3.bf16.msra.mxu1 %v8963_v41 }
 0x32d   : > { %7623 = vmatprep.subr.bf16.mxu0 %v8964_v43  ;;  %7645 = vmatprep.subr.bf16.mxu1 %v8965_v44 }
 0x330   : > { %7624 = vmatpush3.bf16.msra.mxu0 %v8966_v45  ;;  %7646 = vmatpush3.bf16.msra.mxu1 %v8967_v46 }
 0x331   : > { %7625 = vmatprep.subr.bf16.mxu0 %v8968_v47  ;;  %7647 = vmatprep.subr.bf16.mxu1 %v8969_v50 }
 0x334   : > { %7626 = vmatpush3.bf16.msra.mxu0 %v8970_v53  ;;  %7648 = vmatpush3.bf16.msra.mxu1 %v8971_v54  ;;  %v6681_v54 = vstv %s6680_s24 }
 0x335   : > { %7627 = vmatprep.subr.bf16.mxu0 %v8972_v55  ;;  %7649 = vmatprep.subr.bf16.mxu1 %v8973_v38  ;;  %vm6682_vm2 = vcmp.eq.s32.totalorder %v6681_v54, 1 }
 0x338   : > { %7628 = vmatpush3.bf16.msra.mxu0 %v8974_v56  ;;  %7650 = vmatpush3.bf16.msra.mxu1 %v8975_v57 }
 0x339   : > { %7629 = vmatprep.subr.bf16.mxu0 %v8976_v58  ;;  %7651 = vmatprep.subr.bf16.mxu1 %v8977_v48 }
 0x33c   : > { %7630 = vmatpush3.bf16.msra.mxu0 %v8978_v59  ;;  %7652 = vmatpush3.bf16.msra.mxu1 %v8979_v60 }
 0x33d   : > { %7631 = vmatprep.subr.bf16.mxu0 %v8980_v13  ;;  %7653 = vmatprep.subr.bf16.mxu1 %v8981_v63 }
 0x340   : > { %7632 = vmatpush3.bf16.msra.mxu0 %v8982_v0  ;;  %7654 = vmatpush3.bf16.msra.mxu1 %v8983_v35 }
 0x3f6   : > { %v5768_v10 = vpop.f32.mrb[0].mxu0  ;;  %v6301_v11 = vpop.f32.mrb[0].mxu1 }
 0x3f7   : > { %v7661_v12 = vadd.f32 %v5768_v10, %v1112_v6  ;;  %v7663_v14 = vadd.f32 %v6301_v11, %v1120_v61  ;;  %v5770_v16 = vpop.f32.mrb[1].mxu0  ;;  %v6303_v1 = vpop.f32.mrb[1].mxu1 }
 0x3f8   : > { %v7662_v52 = vadd.f32 %v5770_v16, %v1116_v7  ;;  %v7664_v17 = vadd.f32 %v6303_v1, %v1124_v8  ;;  %v5772_v18 = vpop.f32.mrb[2].mxu0  ;;  %v6305_v9 = vpop.f32.mrb[2].mxu1 }
 0x3f9   : > { %v6308_v62 = vmax.f32 %v7661_v12, 0.0  ;;  %v6310_v19 = vmax.f32 %v7663_v14, 0.0  ;;  %v5773_v20 = vpop.f32.mrb[3].mxu0  ;;  %v6306_v22 = vpop.f32.mrb[3].mxu1 }
 0x3fa   : > { %v6309_v42 = vmax.f32 %v7662_v52, 0.0  ;;  %v6311_v23 = vmax.f32 %v7664_v17, 0.0 }
 0x3fb   : > { %v6312_v27 = vpack.c.bf16 %v6308_v62, %v6308_v62  ;;  %v6314_v28 = vpack.c.bf16 %v6310_v19, %v6310_v19 }
 0x3fc   : > { %v6313_v24 = vpack.c.bf16 %v6309_v42, %v6309_v42  ;;  %v6315_v26 = vpack.c.bf16 %v6311_v23, %v6311_v23 }
 0x3fe   : > { %6611 = vmatprep.mubr.bf16.mxu0 %v6313_v24  ;;  %6651 = vmatprep.mubr.bf16.mxu1 %v6315_v26 }
 0x3ff   : > { %6612 = vmatmul.mubr.bf16.vlgmr.msra.gmra.mrb[4].mxu0 %v6312_v27  ;;  %6652 = vmatmul.mubr.bf16.vlgmr.msra.gmra.mrb[4].mxu1 %v6314_v28 }
 0x4d2   : > { %v7633_v29 = vpop.f32.mrb[4].mxu0  ;;  %v7655_v30 = vpop.f32.mrb[4].mxu1 }
 0x4d3   : > { %v7634_v31 = vpop.f32.mrb[5].mxu0  ;;  %v7656_v32 = vpop.f32.mrb[5].mxu1 }
 0x4d4   : > { %v7635_v33 = vadd.f32 %v7634_v31, %v7633_v29  ;;  %v7657_v25 = vadd.f32 %v7656_v32, %v7655_v30  ;;  %v7636_v34 = vpop.f32.mrb[6].mxu0  ;;  %v7658_v36 = vpop.f32.mrb[6].mxu1 }
 0x4d5   : > { %v7637_v49 = vpop.f32.mrb[7].mxu0  ;;  %v7659_v37 = vpop.f32.mrb[7].mxu1 }
 0x4d6   : > { %v6614_v39 = vadd.f32 %v7635_v33, %v7580_v15 }
 0x4d8   : > { %v6654_v21 = vadd.f32 %v7657_v25, %v6614_v39 }
 0x4da   : > { %v6666_v41 = vadd.f32 %v7613_v40, %v6654_v21 }
 0x4dc   : > { %v6668_v43 = vsel %vm6667_vm1, %v6666_v41, -inf }
 0x4dd   : > { %6669 = vmax.xlane.f32.xlu0 %v6668_v43 }
 0x56a   : > { %v6670_v44 = vpop.xlane.xlu0 %6669 }
 0x56b   : > { %v6671_v45 = vsub.f32 %v6666_v41, %v6670_v44 }
 0x56d   : > { %v6672_v46 = vmul.f32 1.442695, %v6671_v45 }
 0x56f   : > { %8984 = vpow2.f32 %v6672_v46 }
 0x579   : > { %v8985_v47 = vpop.eup %8984 }
 0x57a   : > { %v6674_v50 = vsel %vm6667_vm1, %v8985_v47, 0.0 }
 0x57b   : > { %6675 = vadd.xlane.f32.xlu0 %v6674_v50 }
 0x608   : > { %v6676_v53 = vpop.xlane.xlu0 %6675 }
 0x609   : > { %8986 = vrcp.f32 %v6676_v53 }
 0x613   : > { %v8987_v55 = vpop.eup %8986 }
 0x614   : > { %v6678_v38 = vmul.f32 %v8987_v55, %v8985_v47 }
 0x616   : > { %v6683_v56 = vsel %vm6682_vm2, %v6678_v38, %v6654_v21 }
 0x617   : > { %6684 = vst [vmem:[%s317_s28] sm:$0x3] %v6683_v56 }
 0x618 PF: > { %s16_s21 = sadd.s32 1, %s8996_s21  }
 0x619   : > { %p13_p5 = scmp.ge.s32.totalorder %s16_s21, 4  }
 0x61b   :  { %15 = sbr.rel (!%p13_p5) target bundleno = 1 (0x1), region = 86 }

</bundles_post_ra>
